<compile_context>
chip_gen: v7x
topology: tpu7x:2x2x1
jax: 0.10.0
libtpu: 0.0.40
codegen_flags: <defaults>
</compile_context>

<pallas_src>
import jax
import jax.numpy as jnp
from jax import lax
from jax.experimental import pallas as pl
from jax.experimental.pallas import tpu as pltpu


def _round_up(n: int, m: int) -> int:
    return (n + m - 1) // m * m


# ---------------------------------------------------------------------------
# Parameter packing (done ONCE, outside the per-call path).
# ---------------------------------------------------------------------------
def pack_params(params):
    """Pack tied-autoencoder parameters into two slabs + static layer metadata.

    params = (w0, b0, ..., w_{L-1}, b_{L-1}, c0, ..., c_{L-1}) with nn.Linear
    conventions (weights (out, in), biases (out,)).  Decoder weights are tied:
    decoder layer i weight = encoder layer (L-1-i) weight transposed; the
    decoder keeps its own biases c_i.

    Returns (w_slab, b_slab, layers) where `layers` is a static tuple of
    (w_row, out_dim, in_dim, b_row, apply_act) consumed by the kernel.
    """
    L = len(params) // 3
    enc_w = [jnp.asarray(params[2 * i], jnp.float32) for i in range(L)]
    enc_b = [jnp.asarray(params[2 * i + 1], jnp.float32) for i in range(L)]
    dec_b = [jnp.asarray(b, jnp.float32) for b in params[2 * L:]]
    dec_w = [enc_w[L - 1 - i].T for i in range(L)]          # tied weights

    all_w = enc_w + dec_w
    all_b = enc_b + dec_b
    acts = [True] * L + [True] * (L - 1) + [False]          # decoder last: no act

    lane_w = max(int(w.shape[1]) for w in all_w)

    w_segs, b_segs, layers = [], [], []
    wr = 0
    for w, b, act in zip(all_w, all_b, acts):
        out_d, in_d = int(w.shape[0]), int(w.shape[1])
        rows = _round_up(out_d, 8)                           # sublane-aligned segments
        w_segs.append(
            jnp.zeros((rows, lane_w), jnp.float32).at[:out_d, :in_d].set(w))
        b_segs.append(
            jnp.zeros((rows, 1), jnp.float32).at[:out_d, 0].set(b))
        layers.append((wr, out_d, in_d, wr, act))
        wr += rows

    return (jnp.concatenate(w_segs, axis=0),
            jnp.concatenate(b_segs, axis=0),
            tuple(layers))


# ---------------------------------------------------------------------------
# Kernel: full encoder + decoder chain for one batch tile (batch on lanes).
# ---------------------------------------------------------------------------
def _make_kernel(layers):
    def kernel(x_ref, w_ref, b_ref, o_ref):
        h = None
        for idx, (wr, out_d, in_d, br, act) in enumerate(layers):
            w = w_ref[wr:wr + out_d, 0:in_d]      # (out, in) — static, aligned slice
            b = b_ref[br:br + out_d, :]           # (out, 1)  — broadcasts along lanes
            if idx == 0:
                # Layer 0 contracts the untransposed (TB, D) input block
                # directly: 'od,bd->ob' (A @ B^T), native MXU pattern, so no
                # input transpose in the kernel or the wrapper.
                x = x_ref[...].astype(jnp.float32)
                h = lax.dot_general(
                    w, x, (((1,), (1,)), ((), ())),
                    preferred_element_type=jnp.float32,
                    precision=lax.Precision.HIGHEST)
            else:
                h = jnp.dot(w, h,
                            preferred_element_type=jnp.float32,
                            precision=lax.Precision.HIGHEST)
            h = h + b
            if act:
                h = jnp.tanh(h)
        # (D, TB) -> (TB, D): one tiny in-kernel transpose (idle XLU slot)
        # instead of a separate XLA transpose op on the output.
        o_ref[...] = h.T.astype(o_ref.dtype)

    return kernel


# ---------------------------------------------------------------------------
# Wrapper
# ---------------------------------------------------------------------------
def _pick_tile_b(batch: int, tile_b=None) -> int:
    bp = _round_up(batch, 128)
    if tile_b is None:
        # One grid step per TensorCore: 1 step on v5e/v6e, 2 "parallel" steps
        # on v7x (2 TCs/chip) so neither core idles.
        try:
            kind = jax.devices()[0].device_kind.lower()
        except Exception:
            kind = ""
        n_tc = 2 if "v7" in kind else 1
        tile_b = _round_up(pl.cdiv(bp, n_tc), 128)
    # Lane-aligned (multiple of 128), capped at 512: the ceiling is f32 vreg
    # pressure for the (32, TB) intermediates, not VMEM.
    tile_b = max(128, (min(int(tile_b), bp) // 128) * 128)
    return min(tile_b, 512)


def autoencoder_apply(x, w_slab, b_slab, layers, *, tile_b=None):
    """Tied-autoencoder forward. x: (batch, extrinsic_dim) -> (batch, extrinsic_dim)."""
    batch, ext_dim = x.shape
    tile_b = _pick_tile_b(batch, tile_b)
    grid = (pl.cdiv(batch, tile_b),)   # ragged tail via Pallas edge-block masking

    return pl.pallas_call(
        _make_kernel(layers),
        out_shape=jax.ShapeDtypeStruct((batch, ext_dim), x.dtype),
        grid=grid,
        in_specs=[
            pl.BlockSpec((tile_b, ext_dim), lambda i: (i, 0)),
            # Grid-invariant operands: constant block index -> fetched once.
            pl.BlockSpec(w_slab.shape, lambda i: (0, 0)),
            pl.BlockSpec(b_slab.shape, lambda i: (0, 0)),
        ],
        out_specs=pl.BlockSpec((tile_b, ext_dim), lambda i: (i, 0)),
        compiler_params=pltpu.CompilerParams(
            dimension_semantics=("parallel",)),
    )(x, w_slab, b_slab)


def autoencoder_forward(x, params, *, tile_b=None):
    """Convenience wrapper: pack (amortize in real use!) + apply."""
    w_slab, b_slab, layers = pack_params(params)
    return autoencoder_apply(x, w_slab, b_slab, layers, tile_b=tile_b)


# ---------------------------------------------------------------------------
# Pure-JAX reference (same math) for a correctness check.
# ---------------------------------------------------------------------------
def reference_forward(x, params):
    w0, b0, w1, b1, w2, b2, c0, c1, c2 = params
    hp = lax.Precision.HIGHEST
    mm = lambda a, b: jnp.dot(a, b, precision=hp)
    h = jnp.tanh(mm(x, w0.T) + b0)
    h = jnp.tanh(mm(h, w1.T) + b1)
    z = jnp.tanh(mm(h, w2.T) + b2)
    g = jnp.tanh(mm(z, w2) + c0)   # decoder weight = w2.T (tied) -> z @ (w2.T).T = z @ w2
    g = jnp.tanh(mm(g, w1) + c1)
    return mm(g, w0) + c2


if __name__ == "__main__":
    # Module hyperparameters (small, consistent with the forward pass).
    extrinsic_dim = 16
    intrinsic_dim = 2
    hidden_dims = [32, 32]
    # Batch deliberately NOT a multiple of 128: exercises the ragged-tail
    # edge-block masking with no wrapper pad/slice.
    batch = 500

    key = jax.random.PRNGKey(0)
    keys = jax.random.split(key, 10)
    D, H0, H1, d = extrinsic_dim, hidden_dims[0], hidden_dims[1], intrinsic_dim

    # Deterministic synthetic parameters (nn.Linear weight shape = (out, in)).
    w0 = jax.random.normal(keys[0], (H0, D), jnp.float32) * 0.2
    b0 = jax.random.normal(keys[1], (H0,), jnp.float32) * 0.1
    w1 = jax.random.normal(keys[2], (H1, H0), jnp.float32) * 0.2
    b1 = jax.random.normal(keys[3], (H1,), jnp.float32) * 0.1
    w2 = jax.random.normal(keys[4], (d, H1), jnp.float32) * 0.2
    b2 = jax.random.normal(keys[5], (d,), jnp.float32) * 0.1
    # Decoder biases (decoder weights are tied = transposed encoder weights).
    c0 = jax.random.normal(keys[6], (H1,), jnp.float32) * 0.1
    c1 = jax.random.normal(keys[7], (H0,), jnp.float32) * 0.1
    c2 = jax.random.normal(keys[8], (D,), jnp.float32) * 0.1

    params = (w0, b0, w1, b1, w2, b2, c0, c1, c2)
    x = jax.random.normal(keys[9], (batch, D), jnp.float32)

    # Pack the (tiny) parameters once, then the per-call path is a single
    # pallas_call with three operand DMAs and no surrounding XLA ops.
    w_slab, b_slab, layers = pack_params(params)
    x_hat = autoencoder_apply(x, w_slab, b_slab, layers)
    x_hat = jax.block_until_ready(x_hat)

    x_ref = reference_forward(x, params)
    assert x_hat.shape == (batch, D)
    err = float(jnp.max(jnp.abs(x_hat - x_ref)))
    assert jnp.allclose(x_hat, x_ref, atol=1e-4, rtol=1e-4), err

    print("KERNEL_OK")
</pallas_src>

<mosaic_0001>
module attributes {stable_mosaic.version = 11 : i64} {
  func.func @kernel(%arg0: i32, %arg1: memref<512x16xf32, #tpu.memory_space<vmem>>, %arg2: memref<152x32xf32, #tpu.memory_space<vmem>>, %arg3: memref<152x1xf32, #tpu.memory_space<vmem>>, %arg4: memref<512x16xf32, #tpu.memory_space<vmem>>) attributes {dimension_semantics = [#tpu.dimension_semantics<parallel>], iteration_bounds = array<i64: 1>, scalar_prefetch = 0 : i64, scratch_operands = 0 : i64, tpu.core_type = #tpu.core_type<tc>, window_params = [{transform_indices = @transform_0, window_bounds = array<i64: 512, 16>}, {pipeline_mode = #tpu.pipeline_mode<synchronous>, transform_indices = @transform_1, window_bounds = array<i64: 152, 32>}, {pipeline_mode = #tpu.pipeline_mode<synchronous>, transform_indices = @transform_2, window_bounds = array<i64: 152, 1>}, {transform_indices = @transform_3, window_bounds = array<i64: 512, 16>}]} {
    %c0 = arith.constant 0 : index
    %c0_0 = arith.constant 0 : index
    %0 = vector.load %arg2[%c0, %c0_0] : memref<152x32xf32, #tpu.memory_space<vmem>>, vector<32x16xf32>
    %c0_1 = arith.constant 0 : index
    %c0_2 = arith.constant 0 : index
    %1 = vector.load %arg3[%c0_1, %c0_2] : memref<152x1xf32, #tpu.memory_space<vmem>>, vector<32x1xf32>
    %c0_3 = arith.constant 0 : index
    %c0_4 = arith.constant 0 : index
    %2 = vector.load %arg1[%c0_3, %c0_4] : memref<512x16xf32, #tpu.memory_space<vmem>>, vector<512x16xf32>
    %cst = arith.constant dense<0.000000e+00> : vector<32x512xf32>
    %3 = tpu.matmul %0, %2, %cst {dimension_numbers = #tpu.dot_dimension_numbers<[1], [1], [0], [0], [0, 0, 1, 0], [], []>, precision = #tpu.contract_precision<fp32>} : vector<32x16xf32>, vector<512x16xf32>, vector<32x512xf32> -> vector<32x512xf32>
    %4 = vector.broadcast %1 : vector<32x1xf32> to vector<32x512xf32>
    %5 = arith.addf %3, %4 : vector<32x512xf32>
    %6 = math.tanh %5 : vector<32x512xf32>
    %c32 = arith.constant 32 : index
    %c0_5 = arith.constant 0 : index
    %7 = vector.load %arg2[%c32, %c0_5] : memref<152x32xf32, #tpu.memory_space<vmem>>, vector<32x32xf32>
    %c32_6 = arith.constant 32 : index
    %c0_7 = arith.constant 0 : index
    %8 = vector.load %arg3[%c32_6, %c0_7] : memref<152x1xf32, #tpu.memory_space<vmem>>, vector<32x1xf32>
    %cst_8 = arith.constant dense<0.000000e+00> : vector<32x512xf32>
    %9 = tpu.matmul %7, %6, %cst_8 {dimension_numbers = #tpu.dot_dimension_numbers<[1], [0], [0], [1], [0, 0, 1, 1], [], []>, precision = #tpu.contract_precision<fp32>} : vector<32x32xf32>, vector<32x512xf32>, vector<32x512xf32> -> vector<32x512xf32>
    %10 = vector.broadcast %8 : vector<32x1xf32> to vector<32x512xf32>
    %11 = arith.addf %9, %10 : vector<32x512xf32>
    %12 = math.tanh %11 : vector<32x512xf32>
    %c64 = arith.constant 64 : index
    %c0_9 = arith.constant 0 : index
    %13 = vector.load %arg2[%c64, %c0_9] : memref<152x32xf32, #tpu.memory_space<vmem>>, vector<2x32xf32>
    %c64_10 = arith.constant 64 : index
    %c0_11 = arith.constant 0 : index
    %14 = vector.load %arg3[%c64_10, %c0_11] : memref<152x1xf32, #tpu.memory_space<vmem>>, vector<2x1xf32>
    %cst_12 = arith.constant dense<0.000000e+00> : vector<2x512xf32>
    %15 = tpu.matmul %13, %12, %cst_12 {dimension_numbers = #tpu.dot_dimension_numbers<[1], [0], [0], [1], [0, 0, 1, 1], [], []>, precision = #tpu.contract_precision<fp32>} : vector<2x32xf32>, vector<32x512xf32>, vector<2x512xf32> -> vector<2x512xf32>
    %16 = vector.broadcast %14 : vector<2x1xf32> to vector<2x512xf32>
    %17 = arith.addf %15, %16 : vector<2x512xf32>
    %18 = math.tanh %17 : vector<2x512xf32>
    %c72 = arith.constant 72 : index
    %c0_13 = arith.constant 0 : index
    %19 = vector.load %arg2[%c72, %c0_13] : memref<152x32xf32, #tpu.memory_space<vmem>>, vector<32x2xf32>
    %c72_14 = arith.constant 72 : index
    %c0_15 = arith.constant 0 : index
    %20 = vector.load %arg3[%c72_14, %c0_15] : memref<152x1xf32, #tpu.memory_space<vmem>>, vector<32x1xf32>
    %cst_16 = arith.constant dense<0.000000e+00> : vector<32x512xf32>
    %21 = tpu.matmul %19, %18, %cst_16 {dimension_numbers = #tpu.dot_dimension_numbers<[1], [0], [0], [1], [0, 0, 1, 1], [], []>, precision = #tpu.contract_precision<fp32>} : vector<32x2xf32>, vector<2x512xf32>, vector<32x512xf32> -> vector<32x512xf32>
    %22 = vector.broadcast %20 : vector<32x1xf32> to vector<32x512xf32>
    %23 = arith.addf %21, %22 : vector<32x512xf32>
    %24 = math.tanh %23 : vector<32x512xf32>
    %c104 = arith.constant 104 : index
    %c0_17 = arith.constant 0 : index
    %25 = vector.load %arg2[%c104, %c0_17] : memref<152x32xf32, #tpu.memory_space<vmem>>, vector<32x32xf32>
    %c104_18 = arith.constant 104 : index
    %c0_19 = arith.constant 0 : index
    %26 = vector.load %arg3[%c104_18, %c0_19] : memref<152x1xf32, #tpu.memory_space<vmem>>, vector<32x1xf32>
    %cst_20 = arith.constant dense<0.000000e+00> : vector<32x512xf32>
    %27 = tpu.matmul %25, %24, %cst_20 {dimension_numbers = #tpu.dot_dimension_numbers<[1], [0], [0], [1], [0, 0, 1, 1], [], []>, precision = #tpu.contract_precision<fp32>} : vector<32x32xf32>, vector<32x512xf32>, vector<32x512xf32> -> vector<32x512xf32>
    %28 = vector.broadcast %26 : vector<32x1xf32> to vector<32x512xf32>
    %29 = arith.addf %27, %28 : vector<32x512xf32>
    %30 = math.tanh %29 : vector<32x512xf32>
    %c136 = arith.constant 136 : index
    %c0_21 = arith.constant 0 : index
    %31 = vector.load %arg2[%c136, %c0_21] : memref<152x32xf32, #tpu.memory_space<vmem>>, vector<16x32xf32>
    %c136_22 = arith.constant 136 : index
    %c0_23 = arith.constant 0 : index
    %32 = vector.load %arg3[%c136_22, %c0_23] : memref<152x1xf32, #tpu.memory_space<vmem>>, vector<16x1xf32>
    %cst_24 = arith.constant dense<0.000000e+00> : vector<16x512xf32>
    %33 = tpu.matmul %31, %30, %cst_24 {dimension_numbers = #tpu.dot_dimension_numbers<[1], [0], [0], [1], [0, 0, 1, 1], [], []>, precision = #tpu.contract_precision<fp32>} : vector<16x32xf32>, vector<32x512xf32>, vector<16x512xf32> -> vector<16x512xf32>
    %34 = vector.broadcast %32 : vector<16x1xf32> to vector<16x512xf32>
    %35 = arith.addf %33, %34 : vector<16x512xf32>
    %36 = tpu.transpose %35, [1, 0] : vector<16x512xf32> -> vector<512x16xf32>
    %c0_25 = arith.constant 0 : index
    %c0_26 = arith.constant 0 : index
    %37 = vector.load %arg4[%c0_25, %c0_26] : memref<512x16xf32, #tpu.memory_space<vmem>>, vector<512x16xf32>
    tpu.vector_store %arg4[%c0_25, %c0_26], %36 {strides = array<i32>} : memref<512x16xf32, #tpu.memory_space<vmem>>, vector<512x16xf32>,
    return
  }
  func.func @transform_0(%arg0: i32) -> (i32, i32) {
    %c0_i32 = arith.constant 0 : i32
    %c0_i32_0 = arith.constant 0 : i32
    return %arg0, %c0_i32 : i32, i32
  }
  func.func @transform_1(%arg0: i32) -> (i32, i32) {
    %c0_i32 = arith.constant 0 : i32
    %c0_i32_0 = arith.constant 0 : i32
    %c0_i32_1 = arith.constant 0 : i32
    return %c0_i32, %c0_i32_0 : i32, i32
  }
  func.func @transform_2(%arg0: i32) -> (i32, i32) {
    %c0_i32 = arith.constant 0 : i32
    %c0_i32_0 = arith.constant 0 : i32
    %c0_i32_1 = arith.constant 0 : i32
    return %c0_i32, %c0_i32_0 : i32, i32
  }
  func.func @transform_3(%arg0: i32) -> (i32, i32) {
    %c0_i32 = arith.constant 0 : i32
    %c0_i32_0 = arith.constant 0 : i32
    return %arg0, %c0_i32 : i32, i32
  }
}

</mosaic_0001>

<bundles_post_ra>
// kernel: tpu_custom_call.1
= control target key start
LH: loop header
LB: loop body
LE: loop exit
PB: predicated region body
PF: predicated region fallthrough
CT: control target
= control target key end

     0   :  { %vm106_vm0 = vcmask 130048   ;;  %vm2359_vm1 = vcmask 261120   ;;  %vm4896_vm2 = vcmask 15360   ;;  %vm4909_vm3 = vcmask 1041408   ;;  %s13867_s0 = inlined_call_operand.vmem [shape: f32[500,16], index: 0, kind: input, shape index: {}]   ;;  %s13868_s1 = inlined_call_operand.vmem [shape: f32[152,32], index: 1, kind: input, shape index: {}]   ;;  %s13869_s2 = inlined_call_operand.vmem [shape: f32[152,1], index: 2, kind: input, shape index: {}]   ;;  %s13870_s3 = inlined_call_operand.vmem [shape: f32[500,16], index: 3, kind: output, shape index: {}]  }
   0x1   :  { %v38_v0 = vld [vmem:[%s13867_s0 + $0x80] sm:$0xff]  ;;  %v39_v1 = vld [vmem:[%s13867_s0 + $0x88] sm:$0xff]  ;;  %v40_v19 = vld [vmem:[%s13867_s0 + $0x90] sm:$0xff] }
   0x2   :  { %v70_v2 = vld [vmem:[%s13867_s0 + $0x180] sm:$0xff]  ;;  %v168_v3 = vsel %vm106_vm0, %v38_v0, 0  ;;  %v171_v4 = vsel %vm106_vm0, %v39_v1, 0  ;;  %v71_v5 = vld [vmem:[%s13867_s0 + $0x188] sm:$0xff]  ;;  %v41_v20 = vld [vmem:[%s13867_s0 + $0x98] sm:$0xff]  ;;  %v174_v32 = vsel %vm106_vm0, %v40_v19, 0 }
   0x3   :  { %v264_v6 = vsel %vm106_vm0, %v70_v2, 0  ;;  %v22_v7 = vld [vmem:[%s13867_s0] sm:$0xff]  ;;  %v23_v8 = vld [vmem:[%s13867_s0 + $0x8] sm:$0xff]  ;;  %v360_v9 = vand.u32 4294901760, %v168_v3  ;;  %v363_v10 = vand.u32 4294901760, %v171_v4  ;;  %v267_v11 = vsel %vm106_vm0, %v71_v5, 0 }
   0x4   :  { %v1362_v12 = vand.u32 4294901760, %v264_v6  ;;  %v54_v13 = vld [vmem:[%s13867_s0 + $0x100] sm:$0xff]  ;;  %v55_v14 = vld [vmem:[%s13867_s0 + $0x108] sm:$0xff]  ;;  %v1365_v15 = vand.u32 4294901760, %v267_v11  ;;  %v120_v16 = vsel %vm106_vm0, %v22_v7, 0  ;;  %v123_v17 = vsel %vm106_vm0, %v23_v8, 0 }
   0x5   :  { %v216_v18 = vsel %vm106_vm0, %v54_v13, 0  ;;  %v11185_v21 = vpack.c.bf16 %v363_v10, %v360_v9  ;;  %v11187_v22 = vsub.f32 %v168_v3, %v360_v9  ;;  %v11189_v23 = vsub.f32 %v171_v4, %v363_v10  ;;  %v72_v29 = vld [vmem:[%s13867_s0 + $0x190] sm:$0xff]  ;;  %v73_v34 = vld [vmem:[%s13867_s0 + $0x198] sm:$0xff]  ;;  %v42_v55 = vld [vmem:[%s13867_s0 + $0xa0] sm:$0xff] }
   0x6   :  { %v11191_v24 = vsub.f32 %v264_v6, %v1362_v12  ;;  %v11193_v25 = vpack.c.bf16 %v1365_v15, %v1362_v12  ;;  %v11195_v26 = vsub.f32 %v267_v11, %v1365_v15  ;;  %v312_v27 = vand.u32 4294901760, %v120_v16  ;;  %v24_v43 = vld [vmem:[%s13867_s0 + $0x10] sm:$0xff]  ;;  %v25_v44 = vld [vmem:[%s13867_s0 + $0x18] sm:$0xff]  ;;  %v43_v56 = vld [vmem:[%s13867_s0 + $0xa8] sm:$0xff] }
   0x7   :  { %14115 = vst [vmem:[#allocation3_spill] sm:$0xff] %v11185_v21  ;;  %14116 = vst [vmem:[#allocation4_spill] sm:$0xff] %v11187_v22  ;;  %v315_v28 = vand.u32 4294901760, %v123_v17  ;;  %9763 = vmatprep.subr.bf16.mxu0 %v11185_v21  ;;  %v219_v30 = vsel %vm106_vm0, %v55_v14, 0  ;;  %v1314_v31 = vand.u32 4294901760, %v216_v18  ;;  %v177_v33 = vsel %vm106_vm0, %v41_v20, 0 }
   0x8   :  { %14117 = vst [vmem:[#allocation5_spill] sm:$0xff] %v11189_v23  ;;  %14118 = vst [vmem:[#allocation6_spill] sm:$0xff] %v11191_v24  ;;  %9955 = vmatprep.subr.bf16.mxu1 %v11193_v25  ;;  %v11210_v36 = vsub.f32 %v120_v16, %v312_v27  ;;  %v1317_v38 = vand.u32 4294901760, %v219_v30  ;;  %v366_v40 = vand.u32 4294901760, %v174_v32  ;;  %v369_v41 = vand.u32 4294901760, %v177_v33  ;;  %v56_v45 = vld [vmem:[%s13867_s0 + $0x110] sm:$0xff] }
   0x9   :  { %14119 = vst [vmem:[#allocation7_spill] sm:$0xff] %v11193_v25  ;;  %14120 = vst [vmem:[#allocation8_spill] sm:$0xff] %v11195_v26  ;;  %v11208_v35 = vpack.c.bf16 %v315_v28, %v312_v27  ;;  %v11212_v37 = vsub.f32 %v123_v17, %v315_v28  ;;  %v11214_v39 = vsub.f32 %v216_v18, %v1314_v31  ;;  %v270_v42 = vsel %vm106_vm0, %v72_v29, 0  ;;  %v57_v54 = vld [vmem:[%s13867_s0 + $0x118] sm:$0xff]  ;;  %v74_v1 = vld [vmem:[%s13867_s0 + $0x1a0] sm:$0xff] }
   0xa   :  { %14122 = vst [vmem:[#allocation10_spill] sm:$0xff] %v11210_v36  ;;  %v11227_v46 = vpack.c.bf16 %v1317_v38, %v1314_v31  ;;  %v11229_v47 = vsub.f32 %v219_v30, %v1317_v38  ;;  %v273_v48 = vsel %vm106_vm0, %v73_v34, 0  ;;  %v1368_v49 = vand.u32 4294901760, %v270_v42  ;;  %v75_v6 = vld [vmem:[%s13867_s0 + $0x1a8] sm:$0xff]  ;;  %v26_v15 = vld [vmem:[%s13867_s0 + $0x20] sm:$0xff]  ;;  %v45_v34 = vld [vmem:[%s13867_s0 + $0xb8] sm:$0xff] }
   0xb   :  { %14121 = vst [vmem:[#allocation9_spill] sm:$0xff] %v11208_v35  ;;  %14123 = vst [vmem:[#allocation11_spill] sm:$0xff] %v11212_v37  ;;  %9765 = vmatpush3.bf16.xpose.msra.mxu0 %v11208_v35  ;;  %v11232_v50 = vpack.c.bf16 %v369_v41, %v366_v40  ;;  %v11234_v51 = vsub.f32 %v174_v32, %v366_v40  ;;  %v11236_v52 = vsub.f32 %v177_v33, %v369_v41  ;;  %v27_v16 = vld [vmem:[%s13867_s0 + $0x28] sm:$0xff]  ;;  %v58_v17 = vld [vmem:[%s13867_s0 + $0x120] sm:$0xff] }
   0xc   :  { %14124 = vst [vmem:[#allocation12_spill] sm:$0xff] %v11214_v39  ;;  %14125 = vst [vmem:[#allocation13_spill] sm:$0xff] %v11227_v46  ;;  %v1371_v53 = vand.u32 4294901760, %v273_v48  ;;  %9957 = vmatpush3.bf16.xpose.msra.mxu1 %v11227_v46  ;;  %v11248_v57 = vsub.f32 %v270_v42, %v1368_v49  ;;  %v126_v58 = vsel %vm106_vm0, %v24_v43, 0  ;;  %v129_v59 = vsel %vm106_vm0, %v25_v44, 0  ;;  %v59_v32 = vld [vmem:[%s13867_s0 + $0x128] sm:$0xff] }
   0xd   :  { %14126 = vst [vmem:[#allocation14_spill] sm:$0xff] %v11229_v47  ;;  %14127 = vst [vmem:[#allocation15_spill] sm:$0xff] %v11232_v50  ;;  %v222_v60 = vsel %vm106_vm0, %v56_v45, 0  ;;  %9767 = vmatprep.subr.bf16.mxu0 %v11232_v50  ;;  %v318_v63 = vand.u32 4294901760, %v126_v58  ;;  %v321_v0 = vand.u32 4294901760, %v129_v59  ;;  %v225_v2 = vsel %vm106_vm0, %v57_v54, 0 }
   0xe   :  { %v11254_v61 = vpack.c.bf16 %v1371_v53, %v1368_v49  ;;  %v11256_v62 = vsub.f32 %v273_v48, %v1371_v53  ;;  %v1320_v3 = vand.u32 4294901760, %v222_v60  ;;  %v180_v4 = vsel %vm106_vm0, %v42_v55, 0  ;;  %v44_v33 = vld [vmem:[%s13867_s0 + $0xb0] sm:$0xff]  ;;  %v65_v50 = vld [vmem:[%s13867_s0 + $0x158] sm:$0xff]  ;;  %v82_v21 = vld [vmem:[%s13867_s0 + $0x1e0] sm:$0xff] }
   0xf   :  { %v183_v5 = vsel %vm106_vm0, %v43_v56, 0  ;;  %v11268_v7 = vpack.c.bf16 %v321_v0, %v318_v63  ;;  %v11270_v8 = vsub.f32 %v126_v58, %v318_v63  ;;  %v11272_v9 = vsub.f32 %v129_v59, %v321_v0  ;;  %v76_v49 = vld [vmem:[%s13867_s0 + $0x1b0] sm:$0xff]  ;;  %v77_v58 = vld [vmem:[%s13867_s0 + $0x1b8] sm:$0xff] }
  0x10   :  { %14128 = vst [vmem:[#allocation16_spill] sm:$0xff] %v11254_v61  ;;  %14129 = vst [vmem:[#allocation17_spill] sm:$0xff] %v11256_v62  ;;  %9959 = vmatprep.subr.bf16.mxu1 %v11254_v61  ;;  %v1323_v10 = vand.u32 4294901760, %v225_v2  ;;  %v11274_v11 = vsub.f32 %v222_v60, %v1320_v3  ;;  %v372_v12 = vand.u32 4294901760, %v180_v4  ;;  %v375_v13 = vand.u32 4294901760, %v183_v5 }
  0x11   :  { %14130 = vst [vmem:[#allocation18_spill] sm:$0xff] %v11268_v7  ;;  %14131 = vst [vmem:[#allocation19_spill] sm:$0xff] %v11272_v9  ;;  %v276_v14 = vsel %vm106_vm0, %v74_v1, 0  ;;  %v279_v20 = vsel %vm106_vm0, %v75_v6, 0  ;;  %v132_v40 = vsel %vm106_vm0, %v26_v15, 0  ;;  %v135_v41 = vsel %vm106_vm0, %v27_v16, 0 }
  0x12   :  { %14132 = vst [vmem:[#allocation20_spill] sm:$0xff] %v11274_v11  ;;  %v11286_v18 = vpack.c.bf16 %v1323_v10, %v1320_v3  ;;  %v11288_v19 = vsub.f32 %v225_v2, %v1323_v10  ;;  %v1374_v27 = vand.u32 4294901760, %v276_v14  ;;  %v11292_v28 = vpack.c.bf16 %v375_v13, %v372_v12  ;;  %v29_v6 = vld [vmem:[%s13867_s0 + $0x38] sm:$0xff]  ;;  %v60_v10 = vld [vmem:[%s13867_s0 + $0x130] sm:$0xff] }
  0x13   :  { %9769 = vmatpush3.bf16.xpose.msra.mxu0 %v11268_v7  ;;  %v11294_v29 = vsub.f32 %v180_v4, %v372_v12  ;;  %v11296_v30 = vsub.f32 %v183_v5, %v375_v13  ;;  %v1377_v31 = vand.u32 4294901760, %v279_v20  ;;  %v228_v42 = vsel %vm106_vm0, %v58_v17, 0  ;;  %v28_v5 = vld [vmem:[%s13867_s0 + $0x30] sm:$0xff] }
  0x14   :  { %14133 = vst [vmem:[#allocation21_spill] sm:$0xff] %v11286_v18  ;;  %14134 = vst [vmem:[#allocation22_spill] sm:$0xff] %v11288_v19  ;;  %v11307_v38 = vsub.f32 %v276_v14, %v1374_v27  ;;  %9961 = vmatpush3.bf16.xpose.msra.mxu1 %v11286_v18  ;;  %9771 = vmatprep.subr.bf16.mxu0 %v11292_v28  ;;  %v324_v45 = vand.u32 4294901760, %v132_v40  ;;  %v327_v48 = vand.u32 4294901760, %v135_v41  ;;  %v231_v53 = vsel %vm106_vm0, %v59_v32, 0  ;;  %v46_v32 = vld [vmem:[%s13867_s0 + $0xc0] sm:$0xff] }
  0x15   :  { %14135 = vst [vmem:[#allocation23_spill] sm:$0xff] %v11292_v28  ;;  %14136 = vst [vmem:[#allocation24_spill] sm:$0xff] %v11294_v29  ;;  %v11314_v43 = vpack.c.bf16 %v1377_v31, %v1374_v27  ;;  %v11316_v44 = vsub.f32 %v279_v20, %v1377_v31  ;;  %v1326_v54 = vand.u32 4294901760, %v228_v42  ;;  %v186_v55 = vsel %vm106_vm0, %v44_v33, 0  ;;  %v61_v31 = vld [vmem:[%s13867_s0 + $0x138] sm:$0xff]  ;;  %v47_v33 = vld [vmem:[%s13867_s0 + $0xc8] sm:$0xff] }
  0x16   :  { %14137 = vst [vmem:[#allocation25_spill] sm:$0xff] %v11296_v30  ;;  %14138 = vst [vmem:[#allocation26_spill] sm:$0xff] %v11307_v38  ;;  %v189_v56 = vsel %vm106_vm0, %v45_v34, 0  ;;  %v11328_v59 = vpack.c.bf16 %v327_v48, %v324_v45  ;;  %v11330_v60 = vsub.f32 %v132_v40, %v324_v45  ;;  %v11332_v63 = vsub.f32 %v135_v41, %v327_v48  ;;  %v80_v18 = vld [vmem:[%s13867_s0 + $0x1d0] sm:$0xff] }
  0x17   :  { %14139 = vst [vmem:[#allocation27_spill] sm:$0xff] %v11314_v43  ;;  %14140 = vst [vmem:[#allocation28_spill] sm:$0xff] %v11316_v44  ;;  %9963 = vmatprep.subr.bf16.mxu1 %v11314_v43  ;;  %v1329_v0 = vand.u32 4294901760, %v231_v53  ;;  %v11334_v1 = vsub.f32 %v228_v42, %v1326_v54  ;;  %v378_v2 = vand.u32 4294901760, %v186_v55  ;;  %v381_v3 = vand.u32 4294901760, %v189_v56  ;;  %v32_v7 = vld [vmem:[%s13867_s0 + $0x50] sm:$0xff] }
  0x18   :  { %14141 = vst [vmem:[#allocation29_spill] sm:$0xff] %v11328_v59  ;;  %14142 = vst [vmem:[#allocation30_spill] sm:$0xff] %v11330_v60  ;;  %v282_v4 = vsel %vm106_vm0, %v76_v49, 0  ;;  %v285_v14 = vsel %vm106_vm0, %v77_v58, 0  ;;  %v138_v40 = vsel %vm106_vm0, %v28_v5, 0  ;;  %v141_v41 = vsel %vm106_vm0, %v29_v6, 0 }
  0x19   :  { %14143 = vst [vmem:[#allocation31_spill] sm:$0xff] %v11332_v63  ;;  %v11346_v12 = vpack.c.bf16 %v1329_v0, %v1326_v54  ;;  %v11348_v13 = vsub.f32 %v231_v53, %v1329_v0  ;;  %v1380_v15 = vand.u32 4294901760, %v282_v4  ;;  %v11351_v16 = vpack.c.bf16 %v381_v3, %v378_v2  ;;  %v78_v54 = vld [vmem:[%s13867_s0 + $0x1c0] sm:$0xff] }
  0x1a   :  { %v11353_v17 = vsub.f32 %v186_v55, %v378_v2  ;;  %v11355_v20 = vsub.f32 %v189_v56, %v381_v3  ;;  %v1383_v27 = vand.u32 4294901760, %v285_v14  ;;  %v234_v42 = vsel %vm106_vm0, %v60_v10, 0  ;;  %v79_v2 = vld [vmem:[%s13867_s0 + $0x1c8] sm:$0xff] }
  0x1b   :  { %14144 = vst [vmem:[#allocation32_spill] sm:$0xff] %v11346_v12  ;;  %14145 = vst [vmem:[#allocation33_spill] sm:$0xff] %v11351_v16  ;;  %9773 = vmatpush3.bf16.xpose.msra.mxu0 %v11328_v59  ;;  %v11367_v34 = vsub.f32 %v282_v4, %v1380_v15  ;;  %v330_v49 = vand.u32 4294901760, %v138_v40  ;;  %v333_v53 = vand.u32 4294901760, %v141_v41  ;;  %v237_v55 = vsel %vm106_vm0, %v61_v31, 0  ;;  %v30_v31 = vld [vmem:[%s13867_s0 + $0x40] sm:$0xff] }
  0x1c   :  { %14146 = vst [vmem:[#allocation34_spill] sm:$0xff] %v11353_v17  ;;  %14147 = vst [vmem:[#allocation35_spill] sm:$0xff] %v11355_v20  ;;  %9775 = vmatprep.subr.bf16.mxu0 %v11351_v16  ;;  %v11373_v45 = vpack.c.bf16 %v1383_v27, %v1380_v15  ;;  %v11375_v48 = vsub.f32 %v285_v14, %v1383_v27  ;;  %9965 = vmatpush3.bf16.xpose.msra.mxu1 %v11346_v12  ;;  %v1332_v56 = vand.u32 4294901760, %v234_v42  ;;  %v63_v16 = vld [vmem:[%s13867_s0 + $0x148] sm:$0xff] }
  0x1d   :  { %14148 = vst [vmem:[#allocation36_spill] sm:$0xff] %v11367_v34  ;;  %v192_v58 = vsel %vm106_vm0, %v46_v32, 0  ;;  %v195_v0 = vsel %vm106_vm0, %v47_v33, 0  ;;  %v11388_v3 = vpack.c.bf16 %v333_v53, %v330_v49  ;;  %v11390_v4 = vsub.f32 %v138_v40, %v330_v49  ;;  %v31_v32 = vld [vmem:[%s13867_s0 + $0x48] sm:$0xff]  ;;  %v62_v33 = vld [vmem:[%s13867_s0 + $0x140] sm:$0xff] }
  0x1e   :  { %14149 = vst [vmem:[#allocation37_spill] sm:$0xff] %v11373_v45  ;;  %14150 = vst [vmem:[#allocation38_spill] sm:$0xff] %v11375_v48  ;;  %9967 = vmatprep.subr.bf16.mxu1 %v11373_v45  ;;  %v11392_v5 = vsub.f32 %v141_v41, %v333_v53  ;;  %v1335_v6 = vand.u32 4294901760, %v237_v55  ;;  %v11394_v10 = vsub.f32 %v234_v42, %v1332_v56  ;;  %v384_v14 = vand.u32 4294901760, %v192_v58 }
  0x1f   :  { %14151 = vst [vmem:[#allocation39_spill] sm:$0xff] %v11388_v3  ;;  %14152 = vst [vmem:[#allocation40_spill] sm:$0xff] %v11390_v4  ;;  %v387_v15 = vand.u32 4294901760, %v195_v0  ;;  %v288_v27 = vsel %vm106_vm0, %v78_v54, 0  ;;  %v291_v42 = vsel %vm106_vm0, %v79_v2, 0 }
  0x20   :  { %14153 = vst [vmem:[#allocation41_spill] sm:$0xff] %v11392_v5  ;;  %14154 = vst [vmem:[#allocation42_spill] sm:$0xff] %v11394_v10  ;;  %v11406_v40 = vpack.c.bf16 %v1335_v6, %v1332_v56  ;;  %v11408_v41 = vsub.f32 %v237_v55, %v1335_v6  ;;  %v1386_v49 = vand.u32 4294901760, %v288_v27  ;;  %v11413_v54 = vsub.f32 %v192_v58, %v384_v14  ;;  %v48_v56 = vld [vmem:[%s13867_s0 + $0xd0] sm:$0xff]  ;;  %v49_v55 = vld [vmem:[%s13867_s0 + $0xd8] sm:$0xff] }
  0x21   :  { %v11411_v53 = vpack.c.bf16 %v387_v15, %v384_v14  ;;  %v11415_v45 = vsub.f32 %v195_v0, %v387_v15  ;;  %v1389_v12 = vand.u32 4294901760, %v291_v42  ;;  %v144_v58 = vsel %vm106_vm0, %v30_v31, 0 }
  0x22   :  { %14155 = vst [vmem:[#allocation43_spill] sm:$0xff] %v11406_v40  ;;  %14156 = vst [vmem:[#allocation44_spill] sm:$0xff] %v11408_v41  ;;  %v11426_v2 = vsub.f32 %v288_v27, %v1386_v49  ;;  %v147_v0 = vsel %vm106_vm0, %v31_v32, 0  ;;  %v240_v6 = vsel %vm106_vm0, %v62_v33, 0  ;;  %v336_v59 = vand.u32 4294901760, %v144_v58 }
  0x23   :  { %14157 = vst [vmem:[#allocation45_spill] sm:$0xff] %v11411_v53  ;;  %14158 = vst [vmem:[#allocation46_spill] sm:$0xff] %v11413_v54  ;;  %9777 = vmatpush3.bf16.xpose.msra.mxu0 %v11388_v3  ;;  %v11432_v14 = vpack.c.bf16 %v1389_v12, %v1386_v49  ;;  %v11434_v15 = vsub.f32 %v291_v42, %v1389_v12  ;;  %v339_v43 = vand.u32 4294901760, %v147_v0  ;;  %v243_v27 = vsel %vm106_vm0, %v63_v16, 0  ;;  %v81_v12 = vld [vmem:[%s13867_s0 + $0x1d8] sm:$0xff] }
  0x24   :  { %14159 = vst [vmem:[#allocation47_spill] sm:$0xff] %v11415_v45  ;;  %14160 = vst [vmem:[#allocation48_spill] sm:$0xff] %v11426_v2  ;;  %9779 = vmatprep.subr.bf16.mxu0 %v11411_v53  ;;  %v1338_v31 = vand.u32 4294901760, %v240_v6  ;;  %v198_v32 = vsel %vm106_vm0, %v48_v56, 0  ;;  %v201_v33 = vsel %vm106_vm0, %v49_v55, 0  ;;  %9969 = vmatpush3.bf16.xpose.msra.mxu1 %v11406_v40  ;;  %v11449_v49 = vsub.f32 %v144_v58, %v336_v59 }
  0x25   :  { %14161 = vst [vmem:[#allocation49_spill] sm:$0xff] %v11432_v14  ;;  %14162 = vst [vmem:[#allocation50_spill] sm:$0xff] %v11434_v15  ;;  %v11447_v42 = vpack.c.bf16 %v339_v43, %v336_v59  ;;  %v11451_v3 = vsub.f32 %v147_v0, %v339_v43  ;;  %v1341_v53 = vand.u32 4294901760, %v243_v27  ;;  %9971 = vmatprep.subr.bf16.mxu1 %v11432_v14  ;;  %v390_v56 = vand.u32 4294901760, %v198_v32  ;;  %v33_v59 = vld [vmem:[%s13867_s0 + $0x58] sm:$0xff]  ;;  %v64_v43 = vld [vmem:[%s13867_s0 + $0x150] sm:$0xff] }
  0x26   :  { %14164 = vst [vmem:[#allocation52_spill] sm:$0xff] %v11449_v49  ;;  %v11454_v16 = vsub.f32 %v240_v6, %v1338_v31  ;;  %v393_v28 = vand.u32 4294901760, %v201_v33  ;;  %v294_v55 = vsel %vm106_vm0, %v80_v18, 0  ;;  %v297_v6 = vsel %vm106_vm0, %v81_v12, 0 }
  0x27   :  { %14163 = vst [vmem:[#allocation51_spill] sm:$0xff] %v11447_v42  ;;  %14165 = vst [vmem:[#allocation53_spill] sm:$0xff] %v11451_v3  ;;  %v11466_v58 = vpack.c.bf16 %v1341_v53, %v1338_v31  ;;  %v11468_v0 = vsub.f32 %v243_v27, %v1341_v53  ;;  %v1392_v14 = vand.u32 4294901760, %v294_v55  ;;  %v11473_v40 = vsub.f32 %v198_v32, %v390_v56  ;;  %v50_v31 = vld [vmem:[%s13867_s0 + $0xe0] sm:$0xff]  ;;  %v51_v53 = vld [vmem:[%s13867_s0 + $0xe8] sm:$0xff] }
  0x28   :  { %14166 = vst [vmem:[#allocation54_spill] sm:$0xff] %v11454_v16  ;;  %v11471_v18 = vpack.c.bf16 %v393_v28, %v390_v56  ;;  %v11475_v61 = vsub.f32 %v201_v33, %v393_v28  ;;  %v1395_v46 = vand.u32 4294901760, %v297_v6  ;;  %v150_v32 = vsel %vm106_vm0, %v32_v7, 0 }
  0x29   :  { %14167 = vst [vmem:[#allocation55_spill] sm:$0xff] %v11466_v58  ;;  %14168 = vst [vmem:[#allocation56_spill] sm:$0xff] %v11468_v0  ;;  %v11486_v27 = vsub.f32 %v294_v55, %v1392_v14  ;;  %v153_v28 = vsel %vm106_vm0, %v33_v59, 0  ;;  %v246_v33 = vsel %vm106_vm0, %v64_v43, 0  ;;  %v342_v35 = vand.u32 4294901760, %v150_v32 }
  0x2a   :  { %14169 = vst [vmem:[#allocation57_spill] sm:$0xff] %v11471_v18  ;;  %14170 = vst [vmem:[#allocation58_spill] sm:$0xff] %v11473_v40  ;;  %v11491_v12 = vpack.c.bf16 %v1395_v46, %v1392_v14  ;;  %v11493_v56 = vsub.f32 %v297_v6, %v1395_v46  ;;  %v345_v25 = vand.u32 4294901760, %v153_v28  ;;  %v249_v55 = vsel %vm106_vm0, %v65_v50, 0  ;;  %v83_v46 = vld [vmem:[%s13867_s0 + $0x1e8] sm:$0xff]  ;;  %v36_v40 = vld [vmem:[%s13867_s0 + $0x70] sm:$0xff] }
  0x2b   :  { %14171 = vst [vmem:[#allocation59_spill] sm:$0xff] %v11475_v61  ;;  %14172 = vst [vmem:[#allocation60_spill] sm:$0xff] %v11486_v27  ;;  %9781 = vmatpush3.bf16.xpose.msra.mxu0 %v11447_v42  ;;  %v1344_v27 = vand.u32 4294901760, %v246_v33  ;;  %v204_v7 = vsel %vm106_vm0, %v50_v31, 0  ;;  %v207_v59 = vsel %vm106_vm0, %v51_v53, 0  ;;  %v11508_v43 = vsub.f32 %v150_v32, %v342_v35  ;;  %v34_v61 = vld [vmem:[%s13867_s0 + $0x60] sm:$0xff] }
  0x2c   :  { %14173 = vst [vmem:[#allocation61_spill] sm:$0xff] %v11491_v12  ;;  %14174 = vst [vmem:[#allocation62_spill] sm:$0xff] %v11493_v56  ;;  %9783 = vmatprep.subr.bf16.mxu0 %v11471_v18  ;;  %v11506_v14 = vpack.c.bf16 %v345_v25, %v342_v35  ;;  %v11510_v6 = vsub.f32 %v153_v28, %v345_v25  ;;  %v1347_v42 = vand.u32 4294901760, %v249_v55  ;;  %9973 = vmatpush3.bf16.xpose.msra.mxu1 %v11466_v58  ;;  %v35_v35 = vld [vmem:[%s13867_s0 + $0x68] sm:$0xff]  ;;  %v66_v25 = vld [vmem:[%s13867_s0 + $0x160] sm:$0xff] }
  0x2d   :  { %14176 = vst [vmem:[#allocation64_spill] sm:$0xff] %v11508_v43  ;;  %v11513_v50 = vsub.f32 %v246_v33, %v1344_v27  ;;  %v396_v31 = vand.u32 4294901760, %v204_v7  ;;  %v399_v56 = vand.u32 4294901760, %v207_v59  ;;  %v300_v53 = vsel %vm106_vm0, %v82_v21, 0  ;;  %9975 = vmatprep.subr.bf16.mxu1 %v11491_v12  ;;  %v67_v43 = vld [vmem:[%s13867_s0 + $0x168] sm:$0xff] }
  0x2e   :  { %14175 = vst [vmem:[#allocation63_spill] sm:$0xff] %v11506_v14  ;;  %14177 = vst [vmem:[#allocation65_spill] sm:$0xff] %v11510_v6  ;;  %v11526_v32 = vpack.c.bf16 %v1347_v42, %v1344_v27  ;;  %v11528_v28 = vsub.f32 %v249_v55, %v1347_v42  ;;  %v303_v21 = vsel %vm106_vm0, %v83_v46, 0  ;;  %v1398_v33 = vand.u32 4294901760, %v300_v53  ;;  %v52_v27 = vld [vmem:[%s13867_s0 + $0xf0] sm:$0xff]  ;;  %v53_v42 = vld [vmem:[%s13867_s0 + $0xf8] sm:$0xff] }
  0x2f   :  { %14178 = vst [vmem:[#allocation66_spill] sm:$0xff] %v11513_v50  ;;  %v11531_v58 = vpack.c.bf16 %v399_v56, %v396_v31  ;;  %v11533_v18 = vsub.f32 %v204_v7, %v396_v31  ;;  %v11535_v50 = vsub.f32 %v207_v59, %v399_v56  ;;  %v1401_v6 = vand.u32 4294901760, %v303_v21 }
  0x30   :  { %14179 = vst [vmem:[#allocation67_spill] sm:$0xff] %v11526_v32  ;;  %14180 = vst [vmem:[#allocation68_spill] sm:$0xff] %v11528_v28  ;;  %v11546_v55 = vsub.f32 %v300_v53, %v1398_v33  ;;  %v156_v7 = vsel %vm106_vm0, %v34_v61, 0  ;;  %v159_v56 = vsel %vm106_vm0, %v35_v35, 0  ;;  %v252_v59 = vsel %vm106_vm0, %v66_v25, 0  ;;  %v85_v35 = vld [vmem:[%s13867_s0 + $0x1f8] sm:$0xff] }
  0x31   :  { %14181 = vst [vmem:[#allocation69_spill] sm:$0xff] %v11531_v58  ;;  %14182 = vst [vmem:[#allocation70_spill] sm:$0xff] %v11533_v18  ;;  %v11551_v46 = vpack.c.bf16 %v1401_v6, %v1398_v33  ;;  %v11553_v31 = vsub.f32 %v303_v21, %v1401_v6  ;;  %v348_v12 = vand.u32 4294901760, %v156_v7  ;;  %v84_v18 = vld [vmem:[%s13867_s0 + $0x1f0] sm:$0xff]  ;;  %v255_v28 = vsel %vm106_vm0, %v67_v43, 0 }
  0x32   :  { %14183 = vst [vmem:[#allocation71_spill] sm:$0xff] %v11535_v50  ;;  %14184 = vst [vmem:[#allocation72_spill] sm:$0xff] %v11546_v55  ;;  %v351_v50 = vand.u32 4294901760, %v159_v56  ;;  %v1350_v53 = vand.u32 4294901760, %v252_v59  ;;  %v210_v55 = vsel %vm106_vm0, %v52_v27, 0  ;;  %v213_v61 = vsel %vm106_vm0, %v53_v42, 0 }
  0x33   :  { %14185 = vst [vmem:[#allocation73_spill] sm:$0xff] %v11551_v46  ;;  %14186 = vst [vmem:[#allocation74_spill] sm:$0xff] %v11553_v31  ;;  %9785 = vmatpush3.bf16.xpose.msra.mxu0 %v11506_v14  ;;  %v11567_v25 = vsub.f32 %v156_v7, %v348_v12  ;;  %v1353_v33 = vand.u32 4294901760, %v255_v28  ;;  %v402_v27 = vand.u32 4294901760, %v210_v55  ;;  %v405_v31 = vand.u32 4294901760, %v213_v61 }
  0x34   :  { %v11565_v6 = vpack.c.bf16 %v351_v50, %v348_v12  ;;  %v11569_v21 = vsub.f32 %v159_v56, %v351_v50  ;;  %9787 = vmatprep.subr.bf16.mxu0 %v11531_v58  ;;  %v11572_v43 = vsub.f32 %v252_v59, %v1350_v53  ;;  %v306_v42 = vsel %vm106_vm0, %v84_v18, 0  ;;  %v37_v12 = vld [vmem:[%s13867_s0 + $0x78] sm:$0xff]  ;;  %v68_v50 = vld [vmem:[%s13867_s0 + $0x170] sm:$0xff]  ;;  %9977 = vmatpush3.bf16.xpose.msra.mxu1 %v11526_v32 }
  0x35   :  { %14188 = vst [vmem:[#allocation76_spill] sm:$0xff] %v11567_v25  ;;  %v11585_v7 = vpack.c.bf16 %v1353_v33, %v1350_v53  ;;  %v11587_v56 = vsub.f32 %v255_v28, %v1353_v33  ;;  %v309_v18 = vsel %vm106_vm0, %v85_v35, 0  ;;  %v1404_v59 = vand.u32 4294901760, %v306_v42  ;;  %9979 = vmatprep.subr.bf16.mxu1 %v11551_v46  ;;  %v69_v32 = vld [vmem:[%s13867_s0 + $0x178] sm:$0xff]  ;;  %v14_v28 = vld [vmem:[%s13868_s1] sm:$0xff] }
  0x36   :  { %14187 = vst [vmem:[#allocation75_spill] sm:$0xff] %v11565_v6  ;;  %14189 = vst [vmem:[#allocation77_spill] sm:$0xff] %v11569_v21  ;;  %v11591_v58 = vpack.c.bf16 %v405_v31, %v402_v27  ;;  %v11593_v14 = vsub.f32 %v210_v55, %v402_v27  ;;  %v1407_v21 = vand.u32 4294901760, %v309_v18  ;;  %v162_v35 = vsel %vm106_vm0, %v36_v40, 0 }
  0x37   :  { %14190 = vst [vmem:[#allocation78_spill] sm:$0xff] %v11572_v43  ;;  %14191 = vst [vmem:[#allocation79_spill] sm:$0xff] %v11585_v7  ;;  %v11595_v43 = vsub.f32 %v213_v61, %v405_v31  ;;  %v11603_v53 = vsub.f32 %v306_v42, %v1404_v59  ;;  %v165_v33 = vsel %vm106_vm0, %v37_v12, 0  ;;  %v258_v55 = vsel %vm106_vm0, %v68_v50, 0 }
  0x38   :  { %14192 = vst [vmem:[#allocation80_spill] sm:$0xff] %v11587_v56  ;;  %14193 = vst [vmem:[#allocation81_spill] sm:$0xff] %v11591_v58  ;;  %v11608_v27 = vpack.c.bf16 %v1407_v21, %v1404_v59  ;;  %v11610_v31 = vsub.f32 %v309_v18, %v1407_v21  ;;  %v354_v61 = vand.u32 4294901760, %v162_v35  ;;  %v357_v46 = vand.u32 4294901760, %v165_v33 }
  0x39   :  { %14194 = vst [vmem:[#allocation82_spill] sm:$0xff] %v11593_v14  ;;  %14195 = vst [vmem:[#allocation83_spill] sm:$0xff] %v11595_v43  ;;  %v261_v43 = vsel %vm106_vm0, %v69_v32, 0  ;;  %v1356_v14 = vand.u32 4294901760, %v258_v55  ;;  %v108_v56 = vsel %vm106_vm0, %v14_v28, 0  ;;  %v13941_v42 = vand.u32 4294901760, %v11187_v22 }
  0x3a   :  { %14196 = vst [vmem:[#allocation84_spill] sm:$0xff] %v11603_v53  ;;  %14197 = vst [vmem:[#allocation85_spill] sm:$0xff] %v11608_v27  ;;  %v11615_v53 = vpack.c.bf16 %v357_v46, %v354_v61  ;;  %v11617_v40 = vsub.f32 %v162_v35, %v354_v61  ;;  %v11619_v12 = vsub.f32 %v165_v33, %v357_v46  ;;  %v1359_v50 = vand.u32 4294901760, %v261_v43 }
  0x3b   :  { %14198 = vst [vmem:[#allocation86_spill] sm:$0xff] %v11610_v31  ;;  %9789 = vmatpush3.bf16.xpose.msra.mxu0 %v11565_v6  ;;  %v11622_v21 = vsub.f32 %v258_v55, %v1356_v14  ;;  %v11624_v18 = vand.u32 4294901760, %v108_v56  ;;  %v568_v32 = vsub.f32 %v11187_v22, %v13941_v42  ;;  %v13944_v59 = vand.u32 4294901760, %v11189_v23 }
  0x3c   :  { %14199 = vst [vmem:[#allocation87_spill] sm:$0xff] %v11615_v53  ;;  %9791 = vmatprep.subr.bf16.mxu0 %v11591_v58  ;;  %v11631_v28 = vpack.c.bf16 %v1359_v50, %v1356_v14  ;;  %v11633_v35 = vsub.f32 %v261_v43, %v1359_v50  ;;  %v13951_v46 = vand.u32 4294901760, %v11191_v24  ;;  %v13952_v33 = vand.u32 4294901760, %v11195_v26  ;;  %9981 = vmatpush3.bf16.xpose.msra.mxu1 %v11585_v7 }
  0x3d   :  { %14200 = vst [vmem:[#allocation88_spill] sm:$0xff] %v11624_v18  ;;  %v11639_v55 = vsub.f32 %v108_v56, %v11624_v18  ;;  %v569_v61 = vand.u32 4294901760, %v568_v32  ;;  %v575_v42 = vsub.f32 %v11189_v23, %v13944_v59  ;;  %v13959_v58 = vand.u32 4294901760, %v11210_v36  ;;  %9983 = vmatprep.subr.bf16.mxu1 %v11608_v27 }
  0x3e   :  { %14201 = vst [vmem:[#allocation89_spill] sm:$0xff] %v11631_v28  ;;  %v1570_v14 = vsub.f32 %v11191_v24, %v13951_v46  ;;  %v1577_v43 = vsub.f32 %v11195_v26, %v13952_v33  ;;  %v13964_v56 = vand.u32 4294901760, %v11212_v37  ;;  %v13967_v50 = vand.u32 4294901760, %v11214_v39 }
  0x3f   :  { %14202 = vst [vmem:[#allocation90_spill] sm:$0xff] %v11639_v55  ;;  %v11655_v32 = vand.u32 4294901760, %v11639_v55  ;;  %v576_v59 = vand.u32 4294901760, %v575_v42  ;;  %v456_v27 = vsub.f32 %v11210_v36, %v13959_v58  ;;  %v13971_v7 = vand.u32 4294901760, %v11229_v47 }
  0x40   :  { %v1571_v6 = vand.u32 4294901760, %v1570_v14  ;;  %v1578_v46 = vand.u32 4294901760, %v1577_v43  ;;  %v463_v33 = vsub.f32 %v11212_v37, %v13964_v56  ;;  %v1458_v18 = vsub.f32 %v11214_v39, %v13967_v50 }
  0x41   :  { %14203 = vst [vmem:[#allocation91_spill] sm:$0xff] %v11655_v32  ;;  %v411_v26 = vsub.f32 %v11639_v55, %v11655_v32  ;;  %v9794_v42 = vpack.c.bf16 %v576_v59, %v569_v61  ;;  %v457_v24 = vand.u32 4294901760, %v456_v27  ;;  %v1465_v58 = vsub.f32 %v11229_v47, %v13971_v7 }
  0x42   :  { %v9986_v36 = vpack.c.bf16 %v1578_v46, %v1571_v6  ;;  %v464_v14 = vand.u32 4294901760, %v463_v33  ;;  %v1459_v43 = vand.u32 4294901760, %v1458_v18  ;;  %v13974_v23 = vand.u32 4294901760, %v11234_v51 }
  0x43   :  { %9793 = vmatpush3.bf16.xpose.msra.mxu0 %v11615_v53  ;;  %v412_v56 = vand.u32 4294901760, %v411_v26  ;;  %v1466_v37 = vand.u32 4294901760, %v1465_v58  ;;  %v13973_v50 = vand.u32 4294901760, %v11236_v52  ;;  %v13970_v39 = vand.u32 4294901760, %v11248_v57 }
  0x44   :  { %9795 = vmatprep.subr.bf16.mxu0 %v9794_v42  ;;  %v9796_v59 = vpack.c.bf16 %v464_v14, %v457_v24  ;;  %v582_v27 = vsub.f32 %v11234_v51, %v13974_v23  ;;  %v13972_v6 = vand.u32 4294901760, %v11256_v62  ;;  %v13975_v18 = vand.u32 4294901760, %v11270_v8  ;;  %9985 = vmatpush3.bf16.xpose.msra.mxu1 %v11631_v28 }
  0x45   :  { %9314 = vmatprep.mubr.f32.mxu0 %v412_v56  ;;  %v9988_v46 = vpack.c.bf16 %v1466_v37, %v1459_v43  ;;  %v589_v26 = vsub.f32 %v11236_v52, %v13973_v50  ;;  %v1584_v24 = vsub.f32 %v11248_v57, %v13970_v39  ;;  %v13976_v58 = vand.u32 4294901760, %v11272_v9  ;;  %9554 = vmatprep.mubr.f32.mxu1 %v412_v56 }
  0x46   :  { %9987 = vmatprep.subr.bf16.mxu1 %v9986_v36  ;;  %v583_v33 = vand.u32 4294901760, %v582_v27  ;;  %v1591_v61 = vsub.f32 %v11256_v62, %v13972_v6  ;;  %v470_v37 = vsub.f32 %v11270_v8, %v13975_v18  ;;  %v13979_v42 = vand.u32 4294901760, %v11274_v11 }
  0x47   :  { %v590_v14 = vand.u32 4294901760, %v589_v26  ;;  %v1585_v43 = vand.u32 4294901760, %v1584_v24  ;;  %v477_v39 = vsub.f32 %v11272_v9, %v13976_v58  ;;  %v13985_v7 = vand.u32 4294901760, %v11288_v19 }
  0x48   :  { %v1592_v36 = vand.u32 4294901760, %v1591_v61  ;;  %v471_v27 = vand.u32 4294901760, %v470_v37  ;;  %v1472_v6 = vsub.f32 %v11274_v11, %v13979_v42  ;;  %v14003_v50 = vand.u32 4294901760, %v11294_v29 }
  0x49   :  { %v9798_v23 = vpack.c.bf16 %v590_v14, %v583_v33  ;;  %v478_v18 = vand.u32 4294901760, %v477_v39  ;;  %v1479_v26 = vsub.f32 %v11288_v19, %v13985_v7  ;;  %v13995_v24 = vand.u32 4294901760, %v11296_v30 }
  0x4a   :  { %9315 = vmatmul.mubr.f32.vlgmr.msra.gmra.mrb[0].mxu0 %v412_v56  ;;  %v9990_v58 = vpack.c.bf16 %v1592_v36, %v1585_v43  ;;  %v1473_v28 = vand.u32 4294901760, %v1472_v6  ;;  %v596_v61 = vsub.f32 %v11294_v29, %v14003_v50  ;;  %v13984_v37 = vand.u32 4294901760, %v11307_v38  ;;  %v14205_v50 = vld [vmem:[#allocation59_spill] sm:$0xff] }
  0x4b   :  { %9797 = vmatpush3.bf16.xpose.msra.mxu0 %v9796_v59  ;;  %v9800_v42 = vpack.c.bf16 %v478_v18, %v471_v27  ;;  %v1480_v53 = vand.u32 4294901760, %v1479_v26  ;;  %v603_v39 = vsub.f32 %v11296_v30, %v13995_v24  ;;  %v13982_v33 = vand.u32 4294901760, %v11316_v44  ;;  %9555 = vmatmul.mubr.f32.vlgmr.msra.gmra.mrb[0].mxu1 %v412_v56 }
  0x4c   :  { %9799 = vmatprep.subr.bf16.mxu0 %v9798_v23  ;;  %v597_v14 = vand.u32 4294901760, %v596_v61  ;;  %v1598_v6 = vsub.f32 %v11307_v38, %v13984_v37  ;;  %v13983_v43 = vand.u32 4294901760, %v11330_v60  ;;  %v13986_v36 = vand.u32 4294901760, %v11332_v63  ;;  %9989 = vmatpush3.bf16.xpose.msra.mxu1 %v9988_v46 }
  0x4d   :  { %v9992_v59 = vpack.c.bf16 %v1480_v53, %v1473_v28  ;;  %v604_v18 = vand.u32 4294901760, %v603_v39  ;;  %v1605_v27 = vsub.f32 %v11316_v44, %v13982_v33  ;;  %v13987_v26 = vand.u32 4294901760, %v11334_v1  ;;  %9991 = vmatprep.subr.bf16.mxu1 %v9990_v58 }
  0x4e   :  { %v1599_v23 = vand.u32 4294901760, %v1598_v6  ;;  %v484_v56 = vsub.f32 %v11330_v60, %v13983_v43  ;;  %v491_v61 = vsub.f32 %v11332_v63, %v13986_v36  ;;  %v13988_v46 = vand.u32 4294901760, %v11348_v13 }
  0x4f   :  { %v9802_v53 = vpack.c.bf16 %v604_v18, %v597_v14  ;;  %v1606_v28 = vand.u32 4294901760, %v1605_v27  ;;  %v1486_v39 = vsub.f32 %v11334_v1, %v13987_v26  ;;  %v13989_v33 = vand.u32 4294901760, %v11353_v17 }
  0x50   :  { %v485_v58 = vand.u32 4294901760, %v484_v56  ;;  %v492_v6 = vand.u32 4294901760, %v491_v61  ;;  %v1493_v43 = vsub.f32 %v11348_v13, %v13988_v46  ;;  %v13993_v37 = vand.u32 4294901760, %v11355_v20 }
  0x51   :  { %v9994_v7 = vpack.c.bf16 %v1606_v28, %v1599_v23  ;;  %v1487_v36 = vand.u32 4294901760, %v1486_v39  ;;  %v610_v14 = vsub.f32 %v11353_v17, %v13989_v33  ;;  %v13990_v18 = vand.u32 4294901760, %v11367_v34 }
  0x52   :  { %v9804_v27 = vpack.c.bf16 %v492_v6, %v485_v58  ;;  %v1494_v26 = vand.u32 4294901760, %v1493_v43  ;;  %v617_v56 = vsub.f32 %v11355_v20, %v13993_v37  ;;  %v13991_v61 = vand.u32 4294901760, %v11375_v48 }
  0x53   :  { %9801 = vmatpush3.bf16.xpose.msra.mxu0 %v9800_v42  ;;  %v611_v46 = vand.u32 4294901760, %v610_v14  ;;  %v1612_v23 = vsub.f32 %v11367_v34, %v13990_v18  ;;  %v13992_v28 = vand.u32 4294901760, %v11390_v4  ;;  %v13994_v39 = vand.u32 4294901760, %v11392_v5 }
  0x54   :  { %9803 = vmatprep.subr.bf16.mxu0 %v9802_v53  ;;  %v9996_v33 = vpack.c.bf16 %v1494_v26, %v1487_v36  ;;  %v618_v58 = vand.u32 4294901760, %v617_v56  ;;  %v1619_v43 = vsub.f32 %v11375_v48, %v13991_v61  ;;  %v13996_v6 = vand.u32 4294901760, %v11394_v10  ;;  %9993 = vmatpush3.bf16.xpose.msra.mxu1 %v9992_v59 }
  0x55   :  { %v1613_v42 = vand.u32 4294901760, %v1612_v23  ;;  %v498_v14 = vsub.f32 %v11390_v4, %v13992_v28  ;;  %v505_v18 = vsub.f32 %v11392_v5, %v13994_v39  ;;  %v13997_v53 = vand.u32 4294901760, %v11408_v41  ;;  %9995 = vmatprep.subr.bf16.mxu1 %v9994_v7 }
  0x56   :  { %v9806_v36 = vpack.c.bf16 %v618_v58, %v611_v46  ;;  %v1620_v26 = vand.u32 4294901760, %v1619_v43  ;;  %v1500_v56 = vsub.f32 %v11394_v10, %v13996_v6  ;;  %v13998_v59 = vand.u32 4294901760, %v11413_v54 }
  0x57   :  { %v499_v23 = vand.u32 4294901760, %v498_v14  ;;  %v506_v61 = vand.u32 4294901760, %v505_v18  ;;  %v1507_v28 = vsub.f32 %v11408_v41, %v13997_v53  ;;  %v14001_v37 = vand.u32 4294901760, %v11415_v45 }
  0x58   :  { %v9998_v39 = vpack.c.bf16 %v1620_v26, %v1613_v42  ;;  %v1501_v24 = vand.u32 4294901760, %v1500_v56  ;;  %v624_v7 = vsub.f32 %v11413_v54, %v13998_v59  ;;  %v13999_v46 = vand.u32 4294901760, %v11426_v2 }
  0x59   :  { %v9808_v58 = vpack.c.bf16 %v506_v61, %v499_v23  ;;  %v1508_v43 = vand.u32 4294901760, %v1507_v28  ;;  %v631_v18 = vsub.f32 %v11415_v45, %v14001_v37  ;;  %v14000_v14 = vand.u32 4294901760, %v11434_v15 }
  0x5a   :  { %v625_v6 = vand.u32 4294901760, %v624_v7  ;;  %v1626_v42 = vsub.f32 %v11426_v2, %v13999_v46  ;;  %v14002_v26 = vand.u32 4294901760, %v11449_v49  ;;  %v14004_v56 = vand.u32 4294901760, %v11451_v3 }
  0x5b   :  { %9805 = vmatpush3.bf16.xpose.msra.mxu0 %v9804_v27  ;;  %v10000_v53 = vpack.c.bf16 %v1508_v43, %v1501_v24  ;;  %v632_v59 = vand.u32 4294901760, %v631_v18  ;;  %v1633_v61 = vsub.f32 %v11434_v15, %v14000_v14  ;;  %v14009_v28 = vand.u32 4294901760, %v11454_v16  ;;  %v14204_v14 = vld [vmem:[#allocation58_spill] sm:$0xff] }
  0x5c   :  { %9807 = vmatprep.subr.bf16.mxu0 %v9806_v36  ;;  %v1627_v23 = vand.u32 4294901760, %v1626_v42  ;;  %v512_v7 = vsub.f32 %v11449_v49, %v14002_v26  ;;  %v519_v46 = vsub.f32 %v11451_v3, %v14004_v56  ;;  %v14012_v27 = vand.u32 4294901760, %v11468_v0  ;;  %9997 = vmatpush3.bf16.xpose.msra.mxu1 %v9996_v33 }
  0x5d   :  { %v9810_v24 = vpack.c.bf16 %v632_v59, %v625_v6  ;;  %v1634_v43 = vand.u32 4294901760, %v1633_v61  ;;  %v1514_v18 = vsub.f32 %v11454_v16, %v14009_v28  ;;  %v14015_v36 = vand.u32 4294901760, %v14204_v14  ;;  %9999 = vmatprep.subr.bf16.mxu1 %v9998_v39  ;;  %v14206_v6 = vld [vmem:[#allocation60_spill] sm:$0xff] }
  0x5e   :  { %v513_v42 = vand.u32 4294901760, %v512_v7  ;;  %v520_v37 = vand.u32 4294901760, %v519_v46  ;;  %v1521_v26 = vsub.f32 %v11468_v0, %v14012_v27  ;;  %v14017_v56 = vand.u32 4294901760, %v14205_v50  ;;  %v14207_v46 = vld [vmem:[#allocation62_spill] sm:$0xff]  ;;  %v14209_v27 = vld [vmem:[#allocation65_spill] sm:$0xff] }
  0x5f   :  { %v10002_v32 = vpack.c.bf16 %v1634_v43, %v1627_v23  ;;  %v1515_v55 = vand.u32 4294901760, %v1514_v18  ;;  %v638_v33 = vsub.f32 %v14204_v14, %v14015_v36  ;;  %v14018_v59 = vand.u32 4294901760, %v14206_v6  ;;  %v14208_v43 = vld [vmem:[#allocation64_spill] sm:$0xff] }
  0x60   :  { %v9812_v61 = vpack.c.bf16 %v520_v37, %v513_v42  ;;  %v1522_v28 = vand.u32 4294901760, %v1521_v26  ;;  %v645_v39 = vsub.f32 %v14205_v50, %v14017_v56  ;;  %v14021_v7 = vand.u32 4294901760, %v14207_v46  ;;  %v14210_v26 = vld [vmem:[#allocation66_spill] sm:$0xff] }
  0x61   :  { %v639_v16 = vand.u32 4294901760, %v638_v33  ;;  %v1640_v23 = vsub.f32 %v14206_v6, %v14018_v59  ;;  %v14023_v18 = vand.u32 4294901760, %v14208_v43  ;;  %v14025_v0 = vand.u32 4294901760, %v14209_v27  ;;  %v14211_v6 = vld [vmem:[#allocation68_spill] sm:$0xff] }
  0x62   :  { %v10004_v36 = vpack.c.bf16 %v1522_v28, %v1515_v55  ;;  %v646_v14 = vand.u32 4294901760, %v645_v39  ;;  %v1647_v37 = vsub.f32 %v14207_v46, %v14021_v7  ;;  %v14027_v42 = vand.u32 4294901760, %v14210_v26  ;;  %v14212_v7 = vld [vmem:[#allocation70_spill] sm:$0xff] }
  0x63   :  { %9809 = vmatpush3.bf16.xpose.msra.mxu0 %v9808_v58  ;;  %v1641_v56 = vand.u32 4294901760, %v1640_v23  ;;  %v526_v33 = vsub.f32 %v14208_v43, %v14023_v18  ;;  %v533_v59 = vsub.f32 %v14209_v27, %v14025_v0  ;;  %v14029_v50 = vand.u32 4294901760, %v14211_v6  ;;  %v14213_v43 = vld [vmem:[#allocation71_spill] sm:$0xff] }
  0x64   :  { %9811 = vmatprep.subr.bf16.mxu0 %v9810_v24  ;;  %v9814_v55 = vpack.c.bf16 %v646_v14, %v639_v16  ;;  %v1648_v28 = vand.u32 4294901760, %v1647_v37  ;;  %v1528_v39 = vsub.f32 %v14210_v26, %v14027_v42  ;;  %v14031_v58 = vand.u32 4294901760, %v14212_v7  ;;  %10001 = vmatpush3.bf16.xpose.msra.mxu1 %v10000_v53  ;;  %v14214_v14 = vld [vmem:[#allocation72_spill] sm:$0xff] }
  0x65   :  { %v527_v23 = vand.u32 4294901760, %v526_v33  ;;  %v534_v46 = vand.u32 4294901760, %v533_v59  ;;  %v1535_v18 = vsub.f32 %v14211_v6, %v14029_v50  ;;  %v14030_v0 = vand.u32 4294901760, %v14213_v43  ;;  %10003 = vmatprep.subr.bf16.mxu1 %v10002_v32  ;;  %v14215_v59 = vld [vmem:[#allocation74_spill] sm:$0xff] }
  0x66   :  { %v10006_v27 = vpack.c.bf16 %v1648_v28, %v1641_v56  ;;  %v1529_v24 = vand.u32 4294901760, %v1528_v39  ;;  %v652_v16 = vsub.f32 %v14212_v7, %v14031_v58  ;;  %v14033_v37 = vand.u32 4294901760, %v14214_v14  ;;  %v14216_v28 = vld [vmem:[#allocation77_spill] sm:$0xff]  ;;  %v14217_v58 = vld [vmem:[#allocation78_spill] sm:$0xff]  ;;  %v14218_v7 = vld [vmem:[#allocation80_spill] sm:$0xff] }
  0x67   :  { %v9816_v42 = vpack.c.bf16 %v534_v46, %v527_v23  ;;  %v1536_v26 = vand.u32 4294901760, %v1535_v18  ;;  %v659_v53 = vsub.f32 %v14213_v43, %v14030_v0  ;;  %v14037_v33 = vand.u32 4294901760, %v14215_v59  ;;  %v15_v46 = vld [vmem:[%s13868_s1 + $0x8] sm:$0xff] }
  0x68   :  { %v653_v50 = vand.u32 4294901760, %v652_v16  ;;  %v1654_v32 = vsub.f32 %v14214_v14, %v14033_v37  ;;  %v14038_v56 = vand.u32 4294901760, %v11567_v25  ;;  %v14041_v39 = vand.u32 4294901760, %v14216_v28 }
  0x69   :  { %v10008_v18 = vpack.c.bf16 %v1536_v26, %v1529_v24  ;;  %v660_v23 = vand.u32 4294901760, %v659_v53  ;;  %v1661_v0 = vsub.f32 %v14215_v59, %v14037_v33  ;;  %v14044_v16 = vand.u32 4294901760, %v14217_v58  ;;  %v16_v26 = vld [vmem:[%s13868_s1 + $0x10] sm:$0xff] }
  0x6a   :  { %v1655_v43 = vand.u32 4294901760, %v1654_v32  ;;  %v540_v37 = vsub.f32 %v11567_v25, %v14038_v56  ;;  %v547_v14 = vsub.f32 %v14216_v28, %v14041_v39  ;;  %v14046_v6 = vand.u32 4294901760, %v14218_v7 }
  0x6b   :  { %9813 = vmatpush3.bf16.xpose.msra.mxu0 %v9812_v61  ;;  %v9818_v24 = vpack.c.bf16 %v660_v23, %v653_v50  ;;  %v1662_v53 = vand.u32 4294901760, %v1661_v0  ;;  %v1542_v32 = vsub.f32 %v14217_v58, %v14044_v16  ;;  %v111_v33 = vsel %vm106_vm0, %v15_v46, 0  ;;  %v14220_v50 = vld [vmem:[#allocation82_spill] sm:$0xff]  ;;  %v14223_v46 = vld [vmem:[#allocation83_spill] sm:$0xff] }
  0x6c   :  { %9815 = vmatprep.subr.bf16.mxu0 %v9814_v55  ;;  %v541_v56 = vand.u32 4294901760, %v540_v37  ;;  %v548_v25 = vand.u32 4294901760, %v547_v14  ;;  %v1549_v39 = vsub.f32 %v14218_v7, %v14046_v6  ;;  %v11873_v28 = vand.u32 4294901760, %v111_v33  ;;  %10005 = vmatpush3.bf16.xpose.msra.mxu1 %v10004_v36 }
  0x6d   :  { %v10010_v59 = vpack.c.bf16 %v1662_v53, %v1655_v43  ;;  %v1543_v61 = vand.u32 4294901760, %v1542_v32  ;;  %v114_v0 = vsel %vm106_vm0, %v16_v26, 0  ;;  %v14048_v23 = vand.u32 4294901760, %v14220_v50  ;;  %10007 = vmatprep.subr.bf16.mxu1 %v10006_v27  ;;  %v14224_v43 = vld [vmem:[#allocation84_spill] sm:$0xff] }
  0x6e   :  { %14219 = vst [vmem:[#allocation80_spill] sm:$0xff] %v11873_v28  ;;  %v9820_v16 = vpack.c.bf16 %v548_v25, %v541_v56  ;;  %v1550_v58 = vand.u32 4294901760, %v1549_v39  ;;  %v11878_v55 = vsub.f32 %v111_v33, %v11873_v28  ;;  %v11880_v14 = vand.u32 4294901760, %v114_v0 }
  0x6f   :  { %v666_v37 = vsub.f32 %v14220_v50, %v14048_v23  ;;  %v14047_v36 = vand.u32 4294901760, %v14223_v46  ;;  %v14051_v53 = vand.u32 4294901760, %v14224_v43  ;;  %v14054_v26 = vand.u32 4294901760, %v11610_v31 }
  0x70   :  { %14221 = vst [vmem:[#allocation82_spill] sm:$0xff] %v11878_v55  ;;  %14222 = vst [vmem:[#allocation92_spill] sm:$0xff] %v11880_v14  ;;  %v11888_v32 = vpack.c.bf16 %v1550_v58, %v1543_v61  ;;  %v11891_v25 = vand.u32 4294901760, %v11878_v55  ;;  %v11894_v27 = vsub.f32 %v114_v0, %v11880_v14  ;;  %v14061_v33 = vand.u32 4294901760, %v11617_v40 }
  0x71   :  { %v667_v56 = vand.u32 4294901760, %v666_v37  ;;  %v673_v39 = vsub.f32 %v14223_v46, %v14047_v36  ;;  %v1668_v6 = vsub.f32 %v14224_v43, %v14051_v53  ;;  %v1675_v58 = vsub.f32 %v11610_v31, %v14054_v26  ;;  %v17_v26 = vld [vmem:[%s13868_s1 + $0x18] sm:$0xff] }
  0x72   :  { %14225 = vst [vmem:[#allocation83_spill] sm:$0xff] %v11891_v25  ;;  %14226 = vst [vmem:[#allocation84_spill] sm:$0xff] %v11894_v27  ;;  %v422_v61 = vsub.f32 %v11878_v55, %v11891_v25  ;;  %v11909_v0 = vand.u32 4294901760, %v11894_v27  ;;  %v554_v37 = vsub.f32 %v11617_v40, %v14061_v33  ;;  %v14067_v36 = vand.u32 4294901760, %v11619_v12 }
  0x73   :  { %9817 = vmatpush3.bf16.xpose.msra.mxu0 %v9816_v42  ;;  %v674_v23 = vand.u32 4294901760, %v673_v39  ;;  %v1669_v14 = vand.u32 4294901760, %v1668_v6  ;;  %v1676_v53 = vand.u32 4294901760, %v1675_v58  ;;  %v14066_v28 = vand.u32 4294901760, %v11622_v21 }
  0x74   :  { %14227 = vst [vmem:[#allocation93_spill] sm:$0xff] %v11909_v0  ;;  %9819 = vmatprep.subr.bf16.mxu0 %v9818_v24  ;;  %v423_v25 = vand.u32 4294901760, %v422_v61  ;;  %v433_v55 = vsub.f32 %v11894_v27, %v11909_v0  ;;  %v555_v31 = vand.u32 4294901760, %v554_v37  ;;  %v561_v33 = vsub.f32 %v11619_v12, %v14067_v36  ;;  %10009 = vmatpush3.bf16.xpose.msra.mxu1 %v10008_v18  ;;  %v14228_v37 = vld [vmem:[#allocation5_spill] sm:$0xff]  ;;  %v14233_v36 = vld [vmem:[#allocation12_spill] sm:$0xff] }
  0x75   :  { %v9822_v42 = vpack.c.bf16 %v674_v23, %v667_v56  ;;  %v10014_v6 = vpack.c.bf16 %v1676_v53, %v1669_v14  ;;  %v1556_v39 = vsub.f32 %v11622_v21, %v14066_v28  ;;  %v14069_v58 = vand.u32 4294901760, %v11633_v35  ;;  %10011 = vmatprep.subr.bf16.mxu1 %v10010_v59  ;;  %v14229_v53 = vld [vmem:[#allocation6_spill] sm:$0xff]  ;;  %v14230_v56 = vld [vmem:[#allocation8_spill] sm:$0xff] }
  0x76   :  { %9316 = vmatprep.mubr.f32.mxu0 %v423_v25  ;;  %v434_v24 = vand.u32 4294901760, %v433_v55  ;;  %v562_v61 = vand.u32 4294901760, %v561_v33  ;;  %v117_v0 = vsel %vm106_vm0, %v17_v26, 0  ;;  %v9826_v27 = vpack.c.bf16 %v14228_v37, %v11187_v22  ;;  %9556 = vmatprep.mubr.f32.mxu1 %v423_v25  ;;  %v14231_v33 = vld [vmem:[#allocation10_spill] sm:$0xff]  ;;  %v14232_v26 = vld [vmem:[#allocation11_spill] sm:$0xff] }
  0x77   :  { %9317 = vmatmul.mubr.f32.gmra.mrb[2].mxu0 %v423_v25  ;;  %v1557_v18 = vand.u32 4294901760, %v1556_v39  ;;  %v1563_v23 = vsub.f32 %v11633_v35, %v14069_v58  ;;  %v11934_v14 = vand.u32 4294901760, %v117_v0  ;;  %v10018_v59 = vpack.c.bf16 %v14230_v56, %v14229_v53  ;;  %9557 = vmatmul.mubr.f32.gmra.mrb[2].mxu1 %v423_v25 }
  0x78   :  { %9318 = vmatprep.mubr.f32.mxu0 %v434_v24  ;;  %v9824_v55 = vpack.c.bf16 %v562_v61, %v555_v31  ;;  %v9828_v28 = vpack.c.bf16 %v14232_v26, %v14231_v33  ;;  %v10020_v37 = vpack.c.bf16 %v11229_v47, %v14233_v36  ;;  %9558 = vmatprep.mubr.f32.mxu1 %v434_v24 }
  0x79   :  { %v1564_v39 = vand.u32 4294901760, %v1563_v23  ;;  %v11943_v22 = vsub.f32 %v117_v0, %v11934_v14  ;;  %v9830_v58 = vpack.c.bf16 %v11236_v52, %v11234_v51  ;;  %v10022_v56 = vpack.c.bf16 %v11256_v62, %v11248_v57 }
  0x7a   :  { %v9832_v31 = vpack.c.bf16 %v11272_v9, %v11270_v8  ;;  %v10024_v25 = vpack.c.bf16 %v11288_v19, %v11274_v11  ;;  %v9834_v61 = vpack.c.bf16 %v11296_v30, %v11294_v29  ;;  %v10026_v23 = vpack.c.bf16 %v11316_v44, %v11307_v38  ;;  %v14243_v44 = vld [vmem:[#allocation66_spill] sm:$0xff] }
  0x7b   :  { %9821 = vmatpush3.bf16.xpose.msra.mxu0 %v9820_v16  ;;  %v10016_v0 = vpack.c.bf16 %v1564_v39, %v1557_v18  ;;  %v11958_v47 = vand.u32 4294901760, %v11943_v22  ;;  %v9836_v62 = vpack.c.bf16 %v11332_v63, %v11330_v60  ;;  %v9838_v19 = vpack.c.bf16 %v11355_v20, %v11353_v17  ;;  %9559 = vmatmul.mubr.f32.gmra.mrb[4].mxu1 %v434_v24  ;;  %v14238_v20 = vld [vmem:[#allocation59_spill] sm:$0xff]  ;;  %v14239_v60 = vld [vmem:[#allocation60_spill] sm:$0xff] }
  0x7c   :  { %9823 = vmatprep.subr.bf16.mxu0 %v9822_v42  ;;  %9319 = vmatmul.mubr.f32.gmra.mrb[4].mxu0 %v434_v24  ;;  %v10030_v11 = vpack.c.bf16 %v11375_v48, %v11367_v34  ;;  %v9840_v16 = vpack.c.bf16 %v11392_v5, %v11390_v4  ;;  %v10032_v39 = vpack.c.bf16 %v11408_v41, %v11394_v10  ;;  %v14235_v5 = vld [vmem:[#allocation54_spill] sm:$0xff]  ;;  %v14236_v4 = vld [vmem:[#allocation56_spill] sm:$0xff] }
  0x7d   :  { %14234 = vst [vmem:[#allocation6_spill] sm:$0xff] %v11958_v47  ;;  %10013 = vmatpush3.bf16.xpose.msra.mxu1 %v11888_v32  ;;  %v444_v18 = vsub.f32 %v11943_v22, %v11958_v47  ;;  %v9842_v42 = vpack.c.bf16 %v11415_v45, %v11413_v54  ;;  %v10034_v9 = vpack.c.bf16 %v11434_v15, %v11426_v2  ;;  %v14237_v34 = vld [vmem:[#allocation58_spill] sm:$0xff]  ;;  %v14241_v47 = vld [vmem:[#allocation64_spill] sm:$0xff]  ;;  %v14242_v45 = vld [vmem:[#allocation65_spill] sm:$0xff] }
  0x7e   :  { %10015 = vmatprep.subr.bf16.mxu1 %v10014_v6  ;;  %v9844_v48 = vpack.c.bf16 %v11451_v3, %v11449_v49  ;;  %v10036_v32 = vpack.c.bf16 %v14236_v4, %v14235_v5  ;;  %v9846_v17 = vpack.c.bf16 %v14238_v20, %v14237_v34  ;;  %v14240_v41 = vld [vmem:[#allocation62_spill] sm:$0xff]  ;;  %v9848_v54 = vpack.c.bf16 %v14242_v45, %v14241_v47  ;;  %v14244_v15 = vld [vmem:[#allocation68_spill] sm:$0xff]  ;;  %v14246_v2 = vld [vmem:[#allocation71_spill] sm:$0xff] }
  0x7f   :  { %v445_v63 = vand.u32 4294901760, %v444_v18  ;;  %v10038_v10 = vpack.c.bf16 %v14240_v41, %v14239_v60  ;;  %v10040_v6 = vpack.c.bf16 %v14244_v15, %v14243_v44  ;;  %v14245_v24 = vld [vmem:[#allocation70_spill] sm:$0xff]  ;;  %v14247_v3 = vld [vmem:[#allocation72_spill] sm:$0xff]  ;;  %v14250_v5 = vld [vmem:[#allocation77_spill] sm:$0xff]  ;;  %v9854_v45 = vpack.c.bf16 %v14223_v46, %v14220_v50 }
  0x80   :  { %v9850_v38 = vpack.c.bf16 %v14246_v2, %v14245_v24  ;;  %v14248_v49 = vld [vmem:[#allocation74_spill] sm:$0xff]  ;;  %v14249_v4 = vld [vmem:[#allocation76_spill] sm:$0xff]  ;;  %v9856_v44 = vpack.c.bf16 %v11619_v12, %v11617_v40 }
  0x81   :  { %v10042_v30 = vpack.c.bf16 %v14248_v49, %v14247_v3  ;;  %v9852_v29 = vpack.c.bf16 %v14250_v5, %v14249_v4  ;;  %v14251_v20 = vld [vmem:[#allocation78_spill] sm:$0xff]  ;;  %9320 = vmatprep.mubr.f32.mxu0 %v445_v63  ;;  %9560 = vmatprep.mubr.f32.mxu1 %v445_v63  ;;  %v10048_v49 = vpack.c.bf16 %v11633_v35, %v11622_v21  ;;  %v14253_v5 = vld [vmem:[#allocation88_spill] sm:$0xff] }
  0x82   :  { %v10044_v18 = vpack.c.bf16 %v14218_v7, %v14251_v20  ;;  %v14252_v47 = vld [vmem:[#allocation86_spill] sm:$0xff]  ;;  %9321 = vmatmul.mubr.f32.gmra.mrb[6].mxu0 %v445_v63  ;;  %9561 = vmatmul.mubr.f32.gmra.mrb[6].mxu1 %v445_v63  ;;  %v14255_v63 = vld [vmem:[#allocation92_spill] sm:$0xff] }
  0x83   :  { %v10046_v15 = vpack.c.bf16 %v14252_v47, %v14224_v43  ;;  %9825 = vmatpush3.bf16.xpose.msra.mxu0 %v9824_v55  ;;  %9354 = vmatprep.mubr.f32.mxu0 %v14253_v5  ;;  %v14254_v47 = vld [vmem:[#allocation80_spill] sm:$0xff]  ;;  %v14277_v55 = vld [vmem:[#allocation43_spill] sm:$0xff] }
  0x84   :  { %9827 = vmatprep.subr.bf16.mxu0 %v9826_v27  ;;  %9594 = vmatprep.mubr.f32.mxu1 %v14253_v5  ;;  %v14257_v27 = vpack.c.bf16 %v11348_v13, %v11334_v1 }
  0x85   :  { %10017 = vmatpush3.bf16.xpose.msra.mxu1 %v10016_v0  ;;  %v14283_v0 = vld [vmem:[#allocation63_spill] sm:$0xff] }
  0x86   :  { %10019 = vmatprep.subr.bf16.mxu1 %v10018_v59  ;;  %v14276_v59 = vld [vmem:[#allocation45_spill] sm:$0xff] }
  0x8a   :  { %9355 = vmatmul.mubr.f32.vlgmr.msra.gmra.mrb[0].mxu0 %v14253_v5 }
  0x8b   :  { %9829 = vmatpush3.bf16.xpose.msra.mxu0 %v9828_v28  ;;  %9356 = vmatprep.mubr.f32.mxu0 %v14254_v47  ;;  %v14256_v28 = vld [vmem:[#allocation90_spill] sm:$0xff] }
  0x8c   :  { %9595 = vmatmul.mubr.f32.vlgmr.msra.gmra.mrb[0].mxu1 %v14253_v5  ;;  %9831 = vmatprep.subr.bf16.mxu0 %v9830_v58  ;;  %v14273_v58 = vld [vmem:[#allocation32_spill] sm:$0xff] }
  0x8d   :  { %10021 = vmatpush3.bf16.xpose.msra.mxu1 %v10020_v37  ;;  %9596 = vmatprep.mubr.f32.mxu1 %v14254_v47  ;;  %v14274_v37 = vld [vmem:[#allocation37_spill] sm:$0xff] }
  0x8e   :  { %10023 = vmatprep.subr.bf16.mxu1 %v10022_v56  ;;  %9357 = vmatmul.mubr.f32.gmra.mrb[2].mxu0 %v14254_v47  ;;  %v14275_v56 = vld [vmem:[#allocation39_spill] sm:$0xff] }
  0x8f   :  { %9358 = vmatprep.mubr.f32.mxu0 %v14255_v63 }
  0x90   :  { %9597 = vmatmul.mubr.f32.gmra.mrb[2].mxu1 %v14254_v47 }
  0x91   :  { %9598 = vmatprep.mubr.f32.mxu1 %v14255_v63 }
  0x92   :  { %9359 = vmatmul.mubr.f32.gmra.mrb[4].mxu0 %v14255_v63 }
  0x93   :  { %9833 = vmatpush3.bf16.xpose.msra.mxu0 %v9832_v31  ;;  %9360 = vmatprep.mubr.f32.mxu0 %v11934_v14  ;;  %v14278_v31 = vld [vmem:[#allocation49_spill] sm:$0xff] }
  0x94   :  { %9835 = vmatprep.subr.bf16.mxu0 %v9834_v61  ;;  %9599 = vmatmul.mubr.f32.gmra.mrb[4].mxu1 %v14255_v63  ;;  %v14281_v61 = vld [vmem:[#allocation55_spill] sm:$0xff] }
  0x95   :  { %10025 = vmatpush3.bf16.xpose.msra.mxu1 %v10024_v25  ;;  %9600 = vmatprep.mubr.f32.mxu1 %v11934_v14  ;;  %v14279_v25 = vld [vmem:[#allocation51_spill] sm:$0xff] }
  0x96   :  { %10027 = vmatprep.subr.bf16.mxu1 %v10026_v23  ;;  %9361 = vmatmul.mubr.f32.gmra.mrb[6].mxu0 %v11934_v14  ;;  %v14282_v23 = vld [vmem:[#allocation61_spill] sm:$0xff] }
  0x97   :  { %9394 = vmatprep.mubr.f32.mxu0 %v14256_v28 }
  0x98   :  { %9601 = vmatmul.mubr.f32.gmra.mrb[6].mxu1 %v11934_v14 }
  0x99   :  { %9634 = vmatprep.mubr.f32.mxu1 %v14256_v28 }
  0x9b   :  { %9837 = vmatpush3.bf16.xpose.msra.mxu0 %v9836_v62  ;;  %v14258_v62 = vld [vmem:[#allocation3_spill] sm:$0xff] }
  0x9c   :  { %9839 = vmatprep.subr.bf16.mxu0 %v9838_v19  ;;  %v14261_v19 = vld [vmem:[#allocation82_spill] sm:$0xff] }
  0x9d   :  { %10029 = vmatpush3.bf16.xpose.msra.mxu1 %v14257_v27  ;;  %v14291_v27 = vld [vmem:[#allocation4_spill] sm:$0xff] }
  0x9e   :  { %10031 = vmatprep.subr.bf16.mxu1 %v10030_v11  ;;  %v14259_v11 = vld [vmem:[#allocation7_spill] sm:$0xff] }
  0xa3   :  { %9841 = vmatpush3.bf16.xpose.msra.mxu0 %v9840_v16  ;;  %v14284_v16 = vld [vmem:[#allocation69_spill] sm:$0xff] }
  0xa4   :  { %9843 = vmatprep.subr.bf16.mxu0 %v9842_v42  ;;  %v14286_v42 = vld [vmem:[#allocation73_spill] sm:$0xff] }
  0xa5   :  { %10033 = vmatpush3.bf16.xpose.msra.mxu1 %v10032_v39  ;;  %v14285_v39 = vld [vmem:[#allocation67_spill] sm:$0xff] }
  0xa6   :  { %10035 = vmatprep.subr.bf16.mxu1 %v10034_v9  ;;  %v14260_v9 = vld [vmem:[#allocation9_spill] sm:$0xff] }
  0xab   :  { %9845 = vmatpush3.bf16.xpose.msra.mxu0 %v9844_v48  ;;  %v14268_v48 = vld [vmem:[#allocation21_spill] sm:$0xff] }
  0xac   :  { %9847 = vmatprep.subr.bf16.mxu0 %v9846_v17  ;;  %v14266_v17 = vld [vmem:[#allocation18_spill] sm:$0xff] }
  0xad   :  { %10037 = vmatpush3.bf16.xpose.msra.mxu1 %v10036_v32  ;;  %v14287_v32 = vld [vmem:[#allocation75_spill] sm:$0xff] }
  0xae   :  { %10039 = vmatprep.subr.bf16.mxu1 %v10038_v10  ;;  %v14269_v10 = vld [vmem:[#allocation27_spill] sm:$0xff] }
  0xb3   :  { %9849 = vmatpush3.bf16.xpose.msra.mxu0 %v9848_v54  ;;  %v14270_v54 = vld [vmem:[#allocation91_spill] sm:$0xff] }
  0xb4   :  { %9851 = vmatprep.subr.bf16.mxu0 %v9850_v38  ;;  %v14262_v38 = vld [vmem:[#allocation15_spill] sm:$0xff] }
  0xb5   :  { %10041 = vmatpush3.bf16.xpose.msra.mxu1 %v10040_v6  ;;  %v14288_v6 = vld [vmem:[#allocation81_spill] sm:$0xff] }
  0xb6   :  { %10043 = vmatprep.subr.bf16.mxu1 %v10042_v30  ;;  %v14264_v30 = vld [vmem:[#allocation16_spill] sm:$0xff] }
  0xbb   :  { %9853 = vmatpush3.bf16.xpose.msra.mxu0 %v9852_v29  ;;  %v14263_v29 = vld [vmem:[#allocation13_spill] sm:$0xff] }
  0xbc   :  { %9855 = vmatprep.subr.bf16.mxu0 %v9854_v45  ;;  %v14267_v45 = vld [vmem:[#allocation23_spill] sm:$0xff] }
  0xbd   :  { %10045 = vmatpush3.bf16.xpose.msra.mxu1 %v10044_v18  ;;  %v14289_v18 = vld [vmem:[#allocation79_spill] sm:$0xff] }
  0xbe   :  { %10047 = vmatprep.subr.bf16.mxu1 %v10046_v15  ;;  %v14271_v15 = vld [vmem:[#allocation29_spill] sm:$0xff] }
  0xc3   :  { %9857 = vmatpush3.bf16.xpose.msra.mxu0 %v9856_v44  ;;  %v14265_v44 = vld [vmem:[#allocation84_spill] sm:$0xff] }
  0xc4   :  { %9859 = vmatprep.subr.bf16.mxu0 %v14258_v62 }
  0xc5   :  { %10049 = vmatpush3.bf16.xpose.msra.mxu1 %v10048_v49  ;;  %v14272_v49 = vld [vmem:[#allocation33_spill] sm:$0xff] }
  0xc6   :  { %10051 = vmatprep.subr.bf16.mxu1 %v14259_v11 }
  0xca   :  { %9395 = vmatmul.mubr.f32.vlgmr.msra.gmra.mrb[0].mxu0 %v14256_v28 }
  0xcb   :  { %9861 = vmatpush3.bf16.xpose.msra.mxu0 %v14260_v9  ;;  %9396 = vmatprep.mubr.f32.mxu0 %v14261_v19 }
  0xcc   :  { %9635 = vmatmul.mubr.f32.vlgmr.msra.gmra.mrb[0].mxu1 %v14256_v28  ;;  %9863 = vmatprep.subr.bf16.mxu0 %v14262_v38  ;;  %v14290_v28 = vld [vmem:[#allocation85_spill] sm:$0xff] }
  0xcd   :  { %10053 = vmatpush3.bf16.xpose.msra.mxu1 %v14263_v29  ;;  %9636 = vmatprep.mubr.f32.mxu1 %v14261_v19 }
  0xce   :  { %10055 = vmatprep.subr.bf16.mxu1 %v14264_v30  ;;  %9397 = vmatmul.mubr.f32.gmra.mrb[2].mxu0 %v14261_v19 }
  0xcf   :  { %9398 = vmatprep.mubr.f32.mxu0 %v14265_v44 }
  0xd0   :  { %9637 = vmatmul.mubr.f32.gmra.mrb[2].mxu1 %v14261_v19  ;;  %v14292_v19 = vand.u32 4294901760, %v14291_v27  ;;  %v14302_v27 = vand.u32 4294901760, %v11234_v51  ;;  %v14311_v51 = vand.u32 4294901760, %v11270_v8  ;;  %v14323_v8 = vld [vmem:[#allocation26_spill] sm:$0xff] }
  0xd1   :  { %9638 = vmatprep.mubr.f32.mxu1 %v14265_v44 }
  0xd2   :  { %9399 = vmatmul.mubr.f32.gmra.mrb[4].mxu0 %v14265_v44 }
  0xd3   :  { %9865 = vmatpush3.bf16.xpose.msra.mxu0 %v14266_v17  ;;  %9400 = vmatprep.mubr.f32.mxu0 %v11943_v22 }
  0xd4   :  { %9867 = vmatprep.subr.bf16.mxu0 %v14267_v45  ;;  %9639 = vmatmul.mubr.f32.gmra.mrb[4].mxu1 %v14265_v44  ;;  %v14293_v44 = vld [vmem:[#allocation5_spill] sm:$0xff] }
  0xd5   :  { %10057 = vmatpush3.bf16.xpose.msra.mxu1 %v14268_v48  ;;  %9640 = vmatprep.mubr.f32.mxu1 %v11943_v22 }
  0xd6   :  { %10059 = vmatprep.subr.bf16.mxu1 %v14269_v10  ;;  %9401 = vmatmul.mubr.f32.gmra.mrb[6].mxu0 %v11943_v22 }
  0xd7   :  { %9434 = vmatprep.mubr.f32.mxu0 %v14270_v54 }
  0xd8   :  { %9641 = vmatmul.mubr.f32.gmra.mrb[6].mxu1 %v11943_v22  ;;  %v14280_v22 = vld [vmem:[#allocation57_spill] sm:$0xff] }
  0xd9   :  { %9674 = vmatprep.mubr.f32.mxu1 %v14270_v54 }
  0xdb   :  { %9869 = vmatpush3.bf16.xpose.msra.mxu0 %v14271_v15 }
  0xdc   :  { %9871 = vmatprep.subr.bf16.mxu0 %v14272_v49 }
  0xdd   :  { %10061 = vmatpush3.bf16.xpose.msra.mxu1 %v14273_v58 }
  0xde   :  { %10063 = vmatprep.subr.bf16.mxu1 %v14274_v37 }
  0xe3   :  { %9873 = vmatpush3.bf16.xpose.msra.mxu0 %v14275_v56 }
  0xe4   :  { %9875 = vmatprep.subr.bf16.mxu0 %v14276_v59 }
  0xe5   :  { %10065 = vmatpush3.bf16.xpose.msra.mxu1 %v14277_v55 }
  0xe6   :  { %10067 = vmatprep.subr.bf16.mxu1 %v14278_v31 }
  0xeb   :  { %9877 = vmatpush3.bf16.xpose.msra.mxu0 %v14279_v25  ;;  %v14298_v25 = vld [vmem:[#allocation87_spill] sm:$0xff] }
  0xec   :  { %9879 = vmatprep.subr.bf16.mxu0 %v14280_v22 }
  0xed   :  { %10069 = vmatpush3.bf16.xpose.msra.mxu1 %v14281_v61 }
  0xee   :  { %10071 = vmatprep.subr.bf16.mxu1 %v14282_v23  ;;  %v14294_v23 = vand.u32 4294901760, %v14293_v44 }
  0xf0   :  { %v9890_v61 = vpack.c.bf16 %v14294_v23, %v14292_v19  ;;  %v14303_v23 = vand.u32 4294901760, %v11236_v52  ;;  %v14312_v52 = vld [vmem:[#allocation19_spill] sm:$0xff] }
  0xf2   :  { %v9894_v19 = vpack.c.bf16 %v14303_v23, %v14302_v27  ;;  %v14317_v27 = vld [vmem:[#allocation25_spill] sm:$0xff] }
  0xf3   :  { %9881 = vmatpush3.bf16.xpose.msra.mxu0 %v14283_v0  ;;  %v14295_v0 = vand.u32 4294901760, %v14229_v53  ;;  %v14304_v53 = vand.u32 4294901760, %v14233_v36  ;;  %v14313_v36 = vand.u32 4294901760, %v14312_v52  ;;  %v14318_v23 = vand.u32 4294901760, %v14317_v27  ;;  %v14332_v27 = vld [vmem:[#allocation34_spill] sm:$0xff] }
  0xf4   :  { %9883 = vmatprep.subr.bf16.mxu0 %v14284_v16  ;;  %v14296_v16 = vld [vmem:[#allocation8_spill] sm:$0xff] }
  0xf5   :  { %10073 = vmatpush3.bf16.xpose.msra.mxu1 %v14285_v39  ;;  %v14297_v22 = vand.u32 4294901760, %v14296_v16  ;;  %v14305_v16 = vld [vmem:[#allocation14_spill] sm:$0xff] }
  0xf6   :  { %10075 = vmatprep.subr.bf16.mxu1 %v14286_v42 }
  0xf7   :  { %v10082_v39 = vpack.c.bf16 %v14297_v22, %v14295_v0  ;;  %v14306_v22 = vand.u32 4294901760, %v14305_v16  ;;  %v14321_v16 = vld [vmem:[#allocation22_spill] sm:$0xff] }
  0xf9   :  { %v10084_v0 = vpack.c.bf16 %v14306_v22, %v14304_v53  ;;  %v14322_v22 = vand.u32 4294901760, %v14321_v16  ;;  %v14337_v16 = vand.u32 4294901760, %v11348_v13  ;;  %v21_v13 = vld [vmem:[%s13869_s2 + $0x18] sm:$0xff] }
  0xfb   :  { %9885 = vmatpush3.bf16.xpose.msra.mxu0 %v14287_v32  ;;  %v14299_v32 = vld [vmem:[#allocation89_spill] sm:$0xff] }
  0xfc   :  { %9887 = vmatprep.subr.bf16.mxu0 %v14288_v6 }
  0xfd   :  { %10077 = vmatpush3.bf16.xpose.msra.mxu1 %v14289_v18  ;;  %v14300_v18 = vand.u32 4294901760, %v14231_v33 }
  0xfe   :  { %10079 = vmatprep.subr.bf16.mxu1 %v14290_v28  ;;  %v14301_v28 = vand.u32 4294901760, %v14232_v26  ;;  %v14310_v26 = vld [vmem:[#allocation83_spill] sm:$0xff] }
 0x100   :  { %v9892_v6 = vpack.c.bf16 %v14301_v28, %v14300_v18  ;;  %v14314_v18 = vld [vmem:[#allocation93_spill] sm:$0xff]  ;;  %v14315_v28 = vld [vmem:[#allocation24_spill] sm:$0xff] }
 0x103   :  { %9889 = vmatpush3.bf16.xpose.msra.mxu0 %v14298_v25 }
 0x104   :  { %9891 = vmatprep.subr.bf16.mxu0 %v9890_v61  ;;  %v14307_v61 = vand.u32 4294901760, %v11248_v57  ;;  %v9896_v57 = vpack.c.bf16 %v14313_v36, %v14311_v51  ;;  %v14327_v51 = vld [vmem:[#allocation6_spill] sm:$0xff]  ;;  %v14330_v36 = vld [vmem:[#allocation31_spill] sm:$0xff] }
 0x105   :  { %10081 = vmatpush3.bf16.xpose.msra.mxu1 %v14299_v32 }
 0x106   :  { %10083 = vmatprep.subr.bf16.mxu1 %v10082_v39  ;;  %v14308_v39 = vld [vmem:[#allocation17_spill] sm:$0xff] }
 0x107   :  { %v14309_v44 = vand.u32 4294901760, %v14308_v39  ;;  %v14325_v39 = vld [vmem:[#allocation28_spill] sm:$0xff] }
 0x109   :  { %v10086_v33 = vpack.c.bf16 %v14309_v44, %v14307_v61  ;;  %v14324_v61 = vand.u32 4294901760, %v14323_v8  ;;  %v14326_v44 = vand.u32 4294901760, %v14325_v39  ;;  %v20_v8 = vld [vmem:[%s13869_s2 + $0x10] sm:$0xff] }
 0x10a   :  { %9435 = vmatmul.mubr.f32.vlgmr.msra.gmra.mrb[0].mxu0 %v14270_v54 }
 0x10b   :  { %9893 = vmatpush3.bf16.xpose.msra.mxu0 %v9892_v6  ;;  %9436 = vmatprep.mubr.f32.mxu0 %v14310_v26  ;;  %v14316_v6 = vand.u32 4294901760, %v14315_v28  ;;  %v14331_v28 = vand.u32 4294901760, %v14330_v36  ;;  %v14344_v36 = vld [vmem:[#allocation41_spill] sm:$0xff] }
 0x10c   :  { %9675 = vmatmul.mubr.f32.vlgmr.msra.gmra.mrb[0].mxu1 %v14270_v54  ;;  %9895 = vmatprep.subr.bf16.mxu0 %v9894_v19  ;;  %v14319_v54 = vld [vmem:[#allocation20_spill] sm:$0xff] }
 0x10d   :  { %10085 = vmatpush3.bf16.xpose.msra.mxu1 %v10084_v0  ;;  %9676 = vmatprep.mubr.f32.mxu1 %v14310_v26  ;;  %v9898_v53 = vpack.c.bf16 %v14318_v23, %v14316_v6  ;;  %v14320_v19 = vand.u32 4294901760, %v14319_v54  ;;  %v14334_v23 = vld [vmem:[#allocation35_spill] sm:$0xff] }
 0x10e   :  { %10087 = vmatprep.subr.bf16.mxu1 %v10086_v33  ;;  %9437 = vmatmul.mubr.f32.gmra.mrb[2].mxu0 %v14310_v26  ;;  %v10090_v33 = vpack.c.bf16 %v14326_v44, %v14324_v61  ;;  %v14335_v54 = vand.u32 4294901760, %v14334_v23  ;;  %v14338_v61 = vld [vmem:[#allocation36_spill] sm:$0xff]  ;;  %v14340_v44 = vld [vmem:[#allocation38_spill] sm:$0xff] }
 0x10f   :  { %9438 = vmatprep.mubr.f32.mxu0 %v14314_v18  ;;  %v10088_v0 = vpack.c.bf16 %v14322_v22, %v14320_v19  ;;  %v14336_v19 = vand.u32 4294901760, %v11334_v1  ;;  %v14339_v39 = vand.u32 4294901760, %v14338_v61  ;;  %v19_v1 = vld [vmem:[%s13869_s2 + $0x8] sm:$0xff] }
 0x110   :  { %9677 = vmatmul.mubr.f32.gmra.mrb[2].mxu1 %v14310_v26  ;;  %v14328_v26 = vld [vmem:[#allocation30_spill] sm:$0xff] }
 0x111   :  { %9678 = vmatprep.mubr.f32.mxu1 %v14314_v18  ;;  %v14329_v52 = vand.u32 4294901760, %v14328_v26  ;;  %v10092_v22 = vpack.c.bf16 %v14337_v16, %v14336_v19  ;;  %v14342_v26 = vld [vmem:[#allocation40_spill] sm:$0xff]  ;;  %v14350_v16 = vld [vmem:[#allocation42_spill] sm:$0xff] }
 0x112   :  { %9439 = vmatmul.mubr.f32.gmra.mrb[4].mxu0 %v14314_v18  ;;  %v2336_v19 = vld [vmem:[%s13869_s2 + $0x28] sm:$0xff] }
 0x113   :  { %9897 = vmatpush3.bf16.xpose.msra.mxu0 %v9896_v57  ;;  %9440 = vmatprep.mubr.f32.mxu0 %v14327_v51  ;;  %v9900_v6 = vpack.c.bf16 %v14331_v28, %v14329_v52  ;;  %v14333_v57 = vand.u32 4294901760, %v14332_v27  ;;  %v14343_v52 = vand.u32 4294901760, %v14342_v26  ;;  %v14345_v28 = vand.u32 4294901760, %v14344_v36  ;;  %v2338_v26 = vld [vmem:[%s13869_s2 + $0x38] sm:$0xff] }
 0x114   :  { %9899 = vmatprep.subr.bf16.mxu0 %v9898_v53  ;;  %9679 = vmatmul.mubr.f32.gmra.mrb[4].mxu1 %v14314_v18  ;;  %v18_v18 = vld [vmem:[%s13869_s2] sm:$0xff] }
 0x115   :  { %10089 = vmatpush3.bf16.xpose.msra.mxu1 %v10088_v0  ;;  %9680 = vmatprep.mubr.f32.mxu1 %v14327_v51  ;;  %v9902_v53 = vpack.c.bf16 %v14335_v54, %v14333_v57  ;;  %v11126_v0 = vmov 0   ;;  %v9904_v27 = vpack.c.bf16 %v14345_v28, %v14343_v52  ;;  %v14346_v57 = vld [vmem:[#allocation46_spill] sm:$0xff]  ;;  %v14348_v54 = vld [vmem:[#allocation47_spill] sm:$0xff]  ;;  %v14358_v52 = vld [vmem:[#allocation52_spill] sm:$0xff] }
 0x116   :  { %10091 = vmatprep.subr.bf16.mxu1 %v10090_v33  ;;  %9441 = vmatmul.mubr.f32.gmra.mrb[6].mxu0 %v14327_v51  ;;  %v14341_v33 = vand.u32 4294901760, %v14340_v44  ;;  %v14347_v23 = vand.u32 4294901760, %v14346_v57  ;;  %v14359_v36 = vand.u32 4294901760, %v14358_v52  ;;  %v14360_v28 = vld [vmem:[#allocation53_spill] sm:$0xff]  ;;  %v4875_v52 = vld [vmem:[%s13869_s2 + $0x60] sm:$0xff] }
 0x117   :  { %9474 = vmatprep.mubr.f32.mxu0 %v14253_v5  ;;  %10988 = vset.pattern.permute.xlu0 %v11126_v0  ;;  %v14361_v57 = vand.u32 4294901760, %v14360_v28  ;;  %v14376_v28 = vand.u32 4294901760, %v14246_v2  ;;  %v6167_v2 = vld [vmem:[%s13869_s2 + $0x70] sm:$0xff] }
 0x118   :  { %9681 = vmatmul.mubr.f32.gmra.mrb[6].mxu1 %v14327_v51  ;;  %v10094_v51 = vpack.c.bf16 %v14341_v33, %v14339_v39  ;;  %88 = vperm.xlu0 %10988, %v18_v18   ;;  %v14354_v39 = vld [vmem:[#allocation48_spill] sm:$0xff]  ;;  %v14356_v33 = vld [vmem:[#allocation50_spill] sm:$0xff] }
 0x119   :  { %9714 = vmatprep.mubr.f32.mxu1 %v14253_v5  ;;  %10989 = vset.pattern.permute.xlu1 %v11126_v0  ;;  %v14352_v0 = vld [vmem:[#allocation44_spill] sm:$0xff]  ;;  %v14355_v44 = vand.u32 4294901760, %v14354_v39  ;;  %v14369_v39 = vand.u32 4294901760, %v14239_v60 }
 0x11a   :  { %98 = vperm.xlu1 %10989, %v20_v8   ;;  %v14353_v8 = vand.u32 4294901760, %v14352_v0  ;;  %v14367_v0 = vld [vmem:[#allocation56_spill] sm:$0xff] }
 0x11b   :  { %9901 = vmatpush3.bf16.xpose.msra.mxu0 %v9900_v6  ;;  %v2335_v6 = vld [vmem:[%s13869_s2 + $0x20] sm:$0xff] }
 0x11c   :  { %9903 = vmatprep.subr.bf16.mxu0 %v9902_v53  ;;  %93 = vperm.xlu0 %10988, %v19_v1   ;;  %v14349_v53 = vand.u32 4294901760, %v14348_v54  ;;  %v14363_v54 = vld [vmem:[#allocation59_spill] sm:$0xff] }
 0x11d   :  { %10093 = vmatpush3.bf16.xpose.msra.mxu1 %v10092_v22  ;;  %v14351_v22 = vand.u32 4294901760, %v14350_v16  ;;  %v14365_v16 = vld [vmem:[#allocation54_spill] sm:$0xff] }
 0x11e   :  { %10095 = vmatprep.subr.bf16.mxu1 %v10094_v51  ;;  %103 = vperm.xlu1 %10989, %v21_v13   ;;  %v9906_v18 = vpack.c.bf16 %v14349_v53, %v14347_v23  ;;  %v14357_v51 = vand.u32 4294901760, %v14356_v33  ;;  %v2337_v13 = vld [vmem:[%s13869_s2 + $0x30] sm:$0xff]  ;;  %v9908_v23 = vpack.c.bf16 %v14361_v57, %v14359_v36  ;;  %v14364_v53 = vand.u32 4294901760, %v14363_v54  ;;  %v14379_v54 = vld [vmem:[#allocation68_spill] sm:$0xff] }
 0x11f   :  { %v10096_v61 = vpack.c.bf16 %v14353_v8, %v14351_v22  ;;  %v14366_v22 = vand.u32 4294901760, %v14365_v16  ;;  %v14368_v8 = vand.u32 4294901760, %v14367_v0  ;;  %v14375_v36 = vand.u32 4294901760, %v14245_v24  ;;  %v14382_v16 = vld [vmem:[#allocation74_spill] sm:$0xff] }
 0x120   :  { %v10098_v1 = vpack.c.bf16 %v14357_v51, %v14355_v44  ;;  %2341 = vperm.xlu0 %10988, %v2335_v6   ;;  %v14362_v6 = vand.u32 4294901760, %v14237_v34  ;;  %v14370_v44 = vand.u32 4294901760, %v14240_v41  ;;  %v4873_v34 = vld [vmem:[%s13869_s2 + $0x50] sm:$0xff]  ;;  %v4874_v51 = vld [vmem:[%s13869_s2 + $0x58] sm:$0xff] }
 0x121   :  { %v9914_v57 = vpack.c.bf16 %v14376_v28, %v14375_v36  ;;  %v6168_v24 = vld [vmem:[%s13869_s2 + $0x78] sm:$0xff]  ;;  %v14397_v28 = vand.u32 4294901760, %v11633_v35  ;;  %v14401_v35 = vld [vmem:[#allocation61_spill] sm:$0xff] }
 0x122   :  { %2346 = vperm.xlu1 %10989, %v2336_v19   ;;  %v4872_v19 = vld [vmem:[%s13869_s2 + $0x48] sm:$0xff]  ;;  %v10102_v33 = vpack.c.bf16 %v14370_v44, %v14369_v39  ;;  %v6169_v44 = vld [vmem:[%s13869_s2 + $0x80] sm:$0xff] }
 0x123   :  { %9905 = vmatpush3.bf16.xpose.msra.mxu0 %v9904_v27  ;;  %v3769_v27 = vld [vmem:[%s13869_s2 + $0x40] sm:$0x3] }
 0x124   :  { %9907 = vmatprep.subr.bf16.mxu0 %v9906_v18  ;;  %2351 = vperm.xlu0 %10988, %v2337_v13   ;;  %v9910_v18 = vpack.c.bf16 %v14364_v53, %v14362_v6  ;;  %v14373_v13 = vld [vmem:[#allocation65_spill] sm:$0xff]  ;;  %v14380_v53 = vand.u32 4294901760, %v14379_v54 }
 0x125   :  { %10097 = vmatpush3.bf16.xpose.msra.mxu1 %v10096_v61  ;;  %v10100_v61 = vpack.c.bf16 %v14368_v8, %v14366_v22  ;;  %v14374_v41 = vand.u32 4294901760, %v14373_v13  ;;  %v14383_v22 = vand.u32 4294901760, %v14382_v16  ;;  %v14385_v8 = vld [vmem:[#allocation77_spill] sm:$0xff] }
 0x126   :  { %10099 = vmatprep.subr.bf16.mxu1 %v10098_v1  ;;  %2356 = vperm.xlu1 %10989, %v2338_v26   ;;  %v14371_v1 = vld [vmem:[#allocation64_spill] sm:$0xff] }
 0x127   :  { %v14372_v60 = vand.u32 4294901760, %v14371_v1  ;;  %v7600_v1 = vld [vmem:[%s13869_s2 + $0x88] sm:$0xff] }
 0x128   :  { %3772 = vperm.xlu0 %10988, %v3769_v27   ;;  %v14377_v27 = vld [vmem:[#allocation66_spill] sm:$0xff] }
 0x129   :  { %v9912_v26 = vpack.c.bf16 %v14374_v41, %v14372_v60  ;;  %v14378_v6 = vand.u32 4294901760, %v14377_v27  ;;  %v14389_v60 = vand.u32 4294901760, %v14251_v20  ;;  %v14391_v41 = vand.u32 4294901760, %v14224_v43 }
 0x12a   :  { %4878 = vperm.xlu1 %10989, %v4872_v19   ;;  %v14381_v19 = vand.u32 4294901760, %v14247_v3  ;;  %v14384_v3 = vand.u32 4294901760, %v14249_v4  ;;  %v14390_v4 = vand.u32 4294901760, %v14218_v7  ;;  %v14394_v20 = vand.u32 4294901760, %v11617_v40  ;;  %v14398_v40 = vld [vmem:[#allocation51_spill] sm:$0xff] }
 0x12b   :  { %9909 = vmatpush3.bf16.xpose.msra.mxu0 %v9908_v23  ;;  %v6166_v23 = vld [vmem:[%s13869_s2 + $0x68] sm:$0xff]  ;;  %v14395_v7 = vand.u32 4294901760, %v11619_v12  ;;  %v14396_v43 = vand.u32 4294901760, %v11622_v21  ;;  %v14399_v12 = vld [vmem:[#allocation57_spill] sm:$0xff]  ;;  %v14400_v21 = vld [vmem:[#allocation55_spill] sm:$0xff] }
 0x12c   :  { %9911 = vmatprep.subr.bf16.mxu0 %v9910_v18  ;;  %4883 = vperm.xlu0 %10988, %v4873_v34   ;;  %v10104_v18 = vpack.c.bf16 %v14380_v53, %v14378_v6  ;;  %v10106_v0 = vpack.c.bf16 %v14383_v22, %v14381_v19  ;;  %v14388_v34 = vand.u32 4294901760, %v14223_v46  ;;  %v10108_v13 = vpack.c.bf16 %v14390_v4, %v14389_v60 }
 0x12d   :  { %10101 = vmatpush3.bf16.xpose.msra.mxu1 %v10100_v61  ;;  %v14386_v61 = vand.u32 4294901760, %v14385_v8  ;;  %v9920_v46 = vpack.c.bf16 %v14395_v7, %v14394_v20 }
 0x12e   :  { %10103 = vmatprep.subr.bf16.mxu1 %v10102_v33  ;;  %4888 = vperm.xlu1 %10989, %v4874_v51   ;;  %v14387_v33 = vand.u32 4294901760, %v14220_v50  ;;  %v7601_v50 = vld [vmem:[%s13869_s2 + $0x90] sm:$0xff] }
 0x12f   :  { %v9916_v39 = vpack.c.bf16 %v14386_v61, %v14384_v3 }
 0x130   :  { %4893 = vperm.xlu0 %10988, %v4875_v52   ;;  %v9918_v51 = vpack.c.bf16 %v14388_v34, %v14387_v33 }
 0x132   :  { %6172 = vperm.xlu1 %10989, %v6166_v23  }
 0x133   :  { %9913 = vmatpush3.bf16.xpose.msra.mxu0 %v9912_v26  ;;  %v14392_v26 = vld [vmem:[#allocation86_spill] sm:$0xff] }
 0x134   :  { %9915 = vmatprep.subr.bf16.mxu0 %v9914_v57  ;;  %6177 = vperm.xlu0 %10988, %v6167_v2   ;;  %v14393_v52 = vand.u32 4294901760, %v14392_v26  ;;  %v10112_v57 = vpack.c.bf16 %v14397_v28, %v14396_v43 }
 0x135   :  { %10105 = vmatpush3.bf16.xpose.msra.mxu1 %v10104_v18 }
 0x136   :  { %10107 = vmatprep.subr.bf16.mxu1 %v10106_v0  ;;  %6182 = vperm.xlu1 %10989, %v6168_v24   ;;  %v10110_v36 = vpack.c.bf16 %v14393_v52, %v14391_v41 }
 0x138   :  { %6187 = vperm.xlu0 %10988, %v6169_v44  }
 0x13a   :  { %7604 = vperm.xlu1 %10989, %v7600_v1  }
 0x13b   :  { %9917 = vmatpush3.bf16.xpose.msra.mxu0 %v9916_v39 }
 0x13c   :  { %9919 = vmatprep.subr.bf16.mxu0 %v9918_v51  ;;  %7609 = vperm.xlu0 %10988, %v7601_v50  }
 0x13d   :  { %10109 = vmatpush3.bf16.xpose.msra.mxu1 %v10108_v13 }
 0x13e   :  { %10111 = vmatprep.subr.bf16.mxu1 %v10110_v36 }
 0x143   :  { %9921 = vmatpush3.bf16.xpose.msra.mxu0 %v9920_v46 }
 0x144   :  { %9923 = vmatprep.subr.bf16.mxu0 %v14258_v62  ;;  %v14402_v62 = vld [vmem:[#allocation63_spill] sm:$0xff] }
 0x145   :  { %10113 = vmatpush3.bf16.xpose.msra.mxu1 %v10112_v57 }
 0x146   :  { %10115 = vmatprep.subr.bf16.mxu1 %v14259_v11  ;;  %v14403_v11 = vld [vmem:[#allocation69_spill] sm:$0xff] }
 0x14a   :  { %9475 = vmatmul.mubr.f32.vlgmr.msra.gmra.mrb[0].mxu0 %v14253_v5 }
 0x14b   :  { %9925 = vmatpush3.bf16.xpose.msra.mxu0 %v14260_v9  ;;  %9476 = vmatprep.mubr.f32.mxu0 %v14254_v47  ;;  %v14404_v9 = vld [vmem:[#allocation67_spill] sm:$0xff] }
 0x14c   :  { %9715 = vmatmul.mubr.f32.vlgmr.msra.gmra.mrb[0].mxu1 %v14253_v5  ;;  %9927 = vmatprep.subr.bf16.mxu0 %v14262_v38  ;;  %v14405_v38 = vld [vmem:[#allocation75_spill] sm:$0xff] }
 0x14d   :  { %10117 = vmatpush3.bf16.xpose.msra.mxu1 %v14263_v29  ;;  %9716 = vmatprep.mubr.f32.mxu1 %v14254_v47  ;;  %v14406_v29 = vld [vmem:[#allocation81_spill] sm:$0xff] }
 0x14e   :  { %10119 = vmatprep.subr.bf16.mxu1 %v14264_v30  ;;  %9477 = vmatmul.mubr.f32.gmra.mrb[2].mxu0 %v14254_v47  ;;  %v14407_v30 = vld [vmem:[#allocation79_spill] sm:$0xff] }
 0x14f   :  { %9478 = vmatprep.mubr.f32.mxu0 %v14255_v63 }
 0x150   :  { %9717 = vmatmul.mubr.f32.gmra.mrb[2].mxu1 %v14254_v47 }
 0x151   :  { %9718 = vmatprep.mubr.f32.mxu1 %v14255_v63 }
 0x152   :  { %9479 = vmatmul.mubr.f32.gmra.mrb[4].mxu0 %v14255_v63 }
 0x153   :  { %9929 = vmatpush3.bf16.xpose.msra.mxu0 %v14266_v17  ;;  %9480 = vmatprep.mubr.f32.mxu0 %v11934_v14  ;;  %v14408_v17 = vld [vmem:[#allocation85_spill] sm:$0xff] }
 0x154   :  { %9931 = vmatprep.subr.bf16.mxu0 %v14267_v45  ;;  %9719 = vmatmul.mubr.f32.gmra.mrb[4].mxu1 %v14255_v63 }
 0x155   :  { %10121 = vmatpush3.bf16.xpose.msra.mxu1 %v14268_v48  ;;  %9720 = vmatprep.mubr.f32.mxu1 %v11934_v14 }
 0x156   :  { %10123 = vmatprep.subr.bf16.mxu1 %v14269_v10  ;;  %9481 = vmatmul.mubr.f32.gmra.mrb[6].mxu0 %v11934_v14  ;;  %v2334_v10 = vld [vmem:[%s13868_s1 + $0x38] sm:$0xff] }
 0x157   :  { %9514 = vmatprep.mubr.f32.mxu0 %v14253_v5 }
 0x158   :  { %9721 = vmatmul.mubr.f32.gmra.mrb[6].mxu1 %v11934_v14 }
 0x159   :  { %9754 = vmatprep.mubr.f32.mxu1 %v14253_v5 }
 0x15b   :  { %9933 = vmatpush3.bf16.xpose.msra.mxu0 %v14271_v15 }
 0x15c   :  { %9935 = vmatprep.subr.bf16.mxu0 %v14272_v49 }
 0x15d   :  { %10125 = vmatpush3.bf16.xpose.msra.mxu1 %v14273_v58 }
 0x15e   :  { %10127 = vmatprep.subr.bf16.mxu1 %v14274_v37 }
 0x163   :  { %9937 = vmatpush3.bf16.xpose.msra.mxu0 %v14275_v56  ;;  %v2370_v56 = vsel %vm2359_vm1, %v2334_v10, 0 }
 0x164   :  { %9939 = vmatprep.subr.bf16.mxu0 %v14276_v59  ;;  %v12366_v27 = vand.u32 4294901760, %v2370_v56 }
 0x165   :  { %10129 = vmatpush3.bf16.xpose.msra.mxu1 %v14277_v55 }
 0x166   :  { %10131 = vmatprep.subr.bf16.mxu1 %v14278_v31  ;;  %v12378_v39 = vsub.f32 %v2370_v56, %v12366_v27 }
 0x168   :  { %v12389_v36 = vand.u32 4294901760, %v12378_v39 }
 0x16a   :  { %14409 = vst [vmem:[#allocation10_spill] sm:$0xff] %v12389_v36 }
 0x16b   :  { %9941 = vmatpush3.bf16.xpose.msra.mxu0 %v14398_v40 }
 0x16c   :  { %9943 = vmatprep.subr.bf16.mxu0 %v14399_v12 }
 0x16d   :  { %10133 = vmatpush3.bf16.xpose.msra.mxu1 %v14400_v21 }
 0x16e   :  { %10135 = vmatprep.subr.bf16.mxu1 %v14401_v35 }
 0x173   :  { %9945 = vmatpush3.bf16.xpose.msra.mxu0 %v14402_v62 }
 0x174   :  { %9947 = vmatprep.subr.bf16.mxu0 %v14403_v11 }
 0x175   :  { %10137 = vmatpush3.bf16.xpose.msra.mxu1 %v14404_v9 }
 0x176   :  { %10139 = vmatprep.subr.bf16.mxu1 %v14286_v42 }
 0x17b   :  { %9949 = vmatpush3.bf16.xpose.msra.mxu0 %v14405_v38 }
 0x17c   :  { %9951 = vmatprep.subr.bf16.mxu0 %v14406_v29  ;;  %v2481_v29 = vsub.f32 %v12378_v39, %v12389_v36 }
 0x17d   :  { %10141 = vmatpush3.bf16.xpose.msra.mxu1 %v14407_v30 }
 0x17e   :  { %10143 = vmatprep.subr.bf16.mxu1 %v14408_v17 }
 0x183   :  { %9953 = vmatpush3.bf16.xpose.msra.mxu0 %v14298_v25 }
 0x185   :  { %10145 = vmatpush3.bf16.xpose.msra.mxu1 %v14299_v32 }
 0x18a   :  { %9515 = vmatmul.mubr.f32.vlgmr.msra.gmra.mrb[0].mxu0 %v14253_v5 }
 0x18b   :  { %9516 = vmatprep.mubr.f32.mxu0 %v14254_v47 }
 0x18c   :  { %9755 = vmatmul.mubr.f32.vlgmr.msra.gmra.mrb[0].mxu1 %v14253_v5  ;;  %v11127_v5 = vmov 0.0  }
 0x18d   :  { %9756 = vmatprep.mubr.f32.mxu1 %v14254_v47 }
 0x18e   :  { %9517 = vmatmul.mubr.f32.gmra.mrb[2].mxu0 %v14254_v47 }
 0x18f   :  { %9518 = vmatprep.mubr.f32.mxu0 %v14255_v63 }
 0x190   :  { %9757 = vmatmul.mubr.f32.gmra.mrb[2].mxu1 %v14254_v47  ;;  %v2331_v47 = vld [vmem:[%s13868_s1 + $0x20] sm:$0xff] }
 0x191   :  { %9758 = vmatprep.mubr.f32.mxu1 %v14255_v63  ;;  %v2361_v45 = vsel %vm2359_vm1, %v2331_v47, 0 }
 0x192   :  { %9519 = vmatmul.mubr.f32.gmra.mrb[4].mxu0 %v14255_v63  ;;  %v12355_v15 = vand.u32 4294901760, %v2361_v45 }
 0x193   :  { %9520 = vmatprep.mubr.f32.mxu0 %v11934_v14 }
 0x194   :  { %9759 = vmatmul.mubr.f32.gmra.mrb[4].mxu1 %v14255_v63  ;;  %v2332_v63 = vld [vmem:[%s13868_s1 + $0x28] sm:$0xff]  ;;  %v12362_v25 = vsub.f32 %v2361_v45, %v12355_v15 }
 0x195   :  { %9760 = vmatprep.mubr.f32.mxu1 %v11934_v14  ;;  %v2364_v48 = vsel %vm2359_vm1, %v2332_v63, 0 }
 0x196   :  { %9521 = vmatmul.mubr.f32.gmra.mrb[6].mxu0 %v11934_v14  ;;  %v12358_v37 = vand.u32 4294901760, %v2364_v48  ;;  %v12372_v2 = vand.u32 4294901760, %v12362_v25 }
 0x197   :  { %2444 = vmatprep.mubr.f32.mxu0 %v11127_v5  ;;  %v89_v49 = vpop.permute.xlu0 %88 }
 0x198   :  { %9761 = vmatmul.mubr.f32.gmra.mrb[6].mxu1 %v11934_v14  ;;  %v2333_v14 = vld [vmem:[%s13868_s1 + $0x30] sm:$0xff]  ;;  %v12369_v53 = vsub.f32 %v2364_v48, %v12358_v37  ;;  %v2448_v13 = vsub.f32 %v12362_v25, %v12372_v2 }
 0x199   :  { %3134 = vmatprep.mubr.f32.mxu1 %v11127_v5  ;;  %v2367_v58 = vsel %vm2359_vm1, %v2333_v14, 0  ;;  %v99_v3 = vpop.permute.xlu1 %98 }
 0x19a   :  { %v12364_v42 = vand.u32 4294901760, %v2367_v58  ;;  %v12381_v34 = vand.u32 4294901760, %v12369_v53  ;;  %v12393_v21 = vand.u32 4294901760, %v2448_v13 }
 0x19b   :  { %v94_v18 = vpop.permute.xlu0 %93 }
 0x19c   :  { %v12375_v24 = vsub.f32 %v2367_v58, %v12364_v42  ;;  %v2459_v7 = vsub.f32 %v12369_v53, %v12381_v34 }
 0x19d   :  { %v104_v46 = vpop.permute.xlu1 %103 }
 0x19e   :  { %v12386_v41 = vand.u32 4294901760, %v12375_v24  ;;  %v12399_v45 = vand.u32 4294901760, %v2459_v7 }
 0x1a0   :  { %v2470_v35 = vsub.f32 %v12375_v24, %v12386_v41 }
 0x25d   :  { %v1287_v59 = vpop.f32.mrb[0].mxu0 }
 0x25e   :  { %v10530_v55 = vadd.f32 %v1287_v59, %v89_v49  ;;  %v1289_v31 = vpop.f32.mrb[1].mxu0 }
 0x25f   :  { %v2289_v32 = vpop.f32.mrb[0].mxu1  ;;  %v10531_v23 = vadd.f32 %v1289_v31, %v89_v49 }
 0x260   :  { %10990 = vtanh.f32 %v10530_v55  ;;  %v10538_v6 = vadd.f32 %v2289_v32, %v89_v49  ;;  %v2291_v54 = vpop.f32.mrb[1].mxu1  ;;  %v12405_v55 = vand.u32 4294901760, %v2470_v35 }
 0x261   :  { %10992 = vtanh.f32 %v10531_v23  ;;  %v10539_v19 = vadd.f32 %v2291_v54, %v89_v49  ;;  %v1294_v16 = vpop.f32.mrb[2].mxu0 }
 0x262   :  { %10994 = vtanh.f32 %v10538_v6  ;;  %v10532_v22 = vadd.f32 %v1294_v16, %v94_v18  ;;  %v1296_v0 = vpop.f32.mrb[3].mxu0  ;;  %v12408_v6 = vand.u32 4294901760, %v2481_v29 }
 0x263   :  { %10996 = vtanh.f32 %v10539_v19  ;;  %v2296_v8 = vpop.f32.mrb[2].mxu1  ;;  %v10533_v61 = vadd.f32 %v1296_v0, %v94_v18 }
 0x264   :  { %10998 = vtanh.f32 %v10532_v22  ;;  %v10540_v44 = vadd.f32 %v2296_v8, %v94_v18  ;;  %v2298_v33 = vpop.f32.mrb[3].mxu1 }
 0x265   :  { %11000 = vtanh.f32 %v10533_v61  ;;  %v10541_v51 = vadd.f32 %v2298_v33, %v94_v18  ;;  %v1301_v1 = vpop.f32.mrb[4].mxu0 }
 0x266   :  { %11002 = vtanh.f32 %v10540_v44  ;;  %v10534_v60 = vadd.f32 %v1301_v1, %v99_v3  ;;  %v1303_v4 = vpop.f32.mrb[5].mxu0 }
 0x267   :  { %11004 = vtanh.f32 %v10541_v51  ;;  %v2303_v26 = vpop.f32.mrb[4].mxu1  ;;  %v10535_v52 = vadd.f32 %v1303_v4, %v99_v3 }
 0x268   :  { %11006 = vtanh.f32 %v10534_v60  ;;  %v10542_v50 = vadd.f32 %v2303_v26, %v99_v3  ;;  %v2305_v20 = vpop.f32.mrb[5].mxu1 }
 0x269   :  { %11008 = vtanh.f32 %v10535_v52  ;;  %v10543_v43 = vadd.f32 %v2305_v20, %v99_v3  ;;  %v1308_v28 = vpop.f32.mrb[6].mxu0 }
 0x26a   :  { %v10991_v57 = vpop.eup %10990  ;;  %11010 = vtanh.f32 %v10542_v50  ;;  %v10536_v40 = vadd.f32 %v1308_v28, %v104_v46  ;;  %v1310_v12 = vpop.f32.mrb[7].mxu0 }
 0x26b   :  { %v10993_v62 = vpop.eup %10992  ;;  %11012 = vtanh.f32 %v10543_v43  ;;  %v2310_v11 = vpop.f32.mrb[6].mxu1  ;;  %v10537_v9 = vadd.f32 %v1310_v12, %v104_v46  ;;  %v2374_v38 = vand.u32 4294901760, %v10991_v57 }
 0x26c   :  { %v10995_v30 = vpop.eup %10994  ;;  %11014 = vtanh.f32 %v10536_v40  ;;  %v10544_v17 = vadd.f32 %v2310_v11, %v104_v46  ;;  %v2312_v47 = vpop.f32.mrb[7].mxu1  ;;  %v2372_v63 = vand.u32 4294901760, %v10993_v62 }
 0x26d   :  { %v10997_v14 = vpop.eup %10996  ;;  %11016 = vtanh.f32 %v10537_v9  ;;  %v10545_v48 = vadd.f32 %v2312_v47, %v104_v46  ;;  %v12401_v10 = vsub.f32 %v10991_v57, %v2374_v38  ;;  %v3064_v49 = vand.u32 4294901760, %v10995_v30 }
 0x26e   :  { %v10999_v58 = vpop.eup %10998  ;;  %11018 = vtanh.f32 %v10544_v17  ;;  %v12403_v56 = vsub.f32 %v10993_v62, %v2372_v63  ;;  %v3062_v59 = vand.u32 4294901760, %v10997_v14 }
 0x26f   :  { %v11001_v31 = vpop.eup %11000  ;;  %11020 = vtanh.f32 %v10545_v48  ;;  %v2378_v32 = vand.u32 4294901760, %v10999_v58  ;;  %v14097_v23 = vand.u32 4294901760, %v12401_v10  ;;  %v12412_v16 = vsub.f32 %v10995_v30, %v3064_v49 }
 0x270   :  { %v11003_v54 = vpop.eup %11002  ;;  %v2376_v18 = vand.u32 4294901760, %v11001_v31  ;;  %v12410_v19 = vsub.f32 %v10997_v14, %v3062_v59  ;;  %v14103_v22 = vand.u32 4294901760, %v12403_v56 }
 0x271   :  { %v11005_v0 = vpop.eup %11004  ;;  %v12415_v3 = vpack.c.bf16 %v2378_v32, %v2374_v38  ;;  %v12417_v8 = vsub.f32 %v10999_v58, %v2378_v32  ;;  %v3068_v61 = vand.u32 4294901760, %v11003_v54  ;;  %v12422_v44 = vsub.f32 %v12401_v10, %v14097_v23 }
 0x272   :  { %v11007_v33 = vpop.eup %11006  ;;  %v12424_v51 = vpack.c.bf16 %v2376_v18, %v2372_v63  ;;  %v12426_v1 = vsub.f32 %v11001_v31, %v2376_v18  ;;  %v3066_v60 = vand.u32 4294901760, %v11005_v0  ;;  %v2492_v4 = vsub.f32 %v12403_v56, %v14103_v22 }
 0x273   :  { %v11009_v13 = vpop.eup %11008  ;;  %v12431_v26 = vpack.c.bf16 %v3068_v61, %v3064_v49  ;;  %v12433_v52 = vsub.f32 %v11003_v54, %v3068_v61  ;;  %v2382_v50 = vand.u32 4294901760, %v11007_v33  ;;  %v14101_v20 = vand.u32 4294901760, %v12410_v19 }
 0x274   :  { %v11011_v7 = vpop.eup %11010  ;;  %10147 = vmatprep.subr.bf16.mxu0 %v12424_v51  ;;  %v12437_v46 = vpack.c.bf16 %v3066_v60, %v3062_v59  ;;  %v12439_v43 = vsub.f32 %v11005_v0, %v3066_v60  ;;  %v2380_v28 = vand.u32 4294901760, %v11009_v13  ;;  %v2493_v57 = vand.u32 4294901760, %v2492_v4 }
 0x275   :  { %v11013_v40 = vpop.eup %11012  ;;  %10149 = vmatpush1.bf16.msra.mxu0 %v12415_v3  ;;  %v12442_v12 = vsub.f32 %v11007_v33, %v2382_v50  ;;  %v3072_v35 = vand.u32 4294901760, %v11011_v7  ;;  %v14102_v62 = vand.u32 4294901760, %v12426_v1  ;;  %v3182_v11 = vsub.f32 %v12410_v19, %v14101_v20 }
 0x276   :  { %v11015_v9 = vpop.eup %11014  ;;  %10195 = vmatprep.subr.bf16.mxu1 %v12437_v46  ;;  %v12449_v38 = vsub.f32 %v11009_v13, %v2380_v28  ;;  %v3070_v29 = vand.u32 4294901760, %v11013_v40  ;;  %v14100_v30 = vand.u32 4294901760, %v12439_v43  ;;  %v2499_v17 = vand.u32 4294901760, %v12422_v44 }
 0x277   :  { %v11017_v47 = vpop.eup %11016  ;;  %10197 = vmatpush1.bf16.msra.mxu1 %v12431_v26  ;;  %v2386_v63 = vand.u32 4294901760, %v11015_v9  ;;  %v12454_v14 = vsub.f32 %v11011_v7, %v3072_v35  ;;  %v2504_v48 = vsub.f32 %v12426_v1, %v14102_v62  ;;  %v3183_v49 = vand.u32 4294901760, %v3182_v11 }
 0x278   :  { %v11019_v58 = vpop.eup %11018  ;;  %v2384_v59 = vand.u32 4294901760, %v11017_v47  ;;  %v12459_v31 = vsub.f32 %v11013_v40, %v3070_v29  ;;  %v3194_v32 = vsub.f32 %v12439_v43, %v14100_v30  ;;  %v14099_v54 = vand.u32 4294901760, %v12417_v8 }
 0x279   :  { %v11021_v18 = vpop.eup %11020  ;;  %v12465_v0 = vpack.c.bf16 %v2386_v63, %v2382_v50  ;;  %v12467_v61 = vsub.f32 %v11015_v9, %v2386_v63  ;;  %v3076_v44 = vand.u32 4294901760, %v11019_v58  ;;  %v2505_v33 = vand.u32 4294901760, %v2504_v48 }
 0x27a   :  { %v12469_v60 = vpack.c.bf16 %v2384_v59, %v2380_v28  ;;  %v12471_v4 = vsub.f32 %v11017_v47, %v2384_v59  ;;  %v3074_v13 = vand.u32 4294901760, %v11021_v18  ;;  %v3195_v7 = vand.u32 4294901760, %v3194_v32 }
 0x27b   :  { %v12473_v40 = vpack.c.bf16 %v3076_v44, %v3072_v35  ;;  %v12475_v11 = vsub.f32 %v11019_v58, %v3076_v44  ;;  %v10154_v23 = vpack.c.bf16 %v2505_v33, %v2493_v57  ;;  %v2510_v50 = vsub.f32 %v12417_v8, %v14099_v54 }
 0x27c   :  { %10151 = vmatprep.subr.bf16.mxu0 %v12469_v60  ;;  %v12481_v9 = vpack.c.bf16 %v3074_v13, %v3070_v29  ;;  %v12483_v63 = vsub.f32 %v11021_v18, %v3074_v13  ;;  %v10202_v28 = vpack.c.bf16 %v3195_v7, %v3183_v49  ;;  %v14098_v47 = vand.u32 4294901760, %v12412_v16 }
 0x27d   :  { %10153 = vmatpush1.bf16.msra.mxu0 %v12465_v0  ;;  %v2511_v35 = vand.u32 4294901760, %v2510_v50  ;;  %v3199_v48 = vand.u32 4294901760, %v12433_v52  ;;  %v2515_v57 = vand.u32 4294901760, %v12449_v38  ;;  %v2527_v58 = vand.u32 4294901760, %v12471_v4 }
 0x27e   :  { %10199 = vmatprep.subr.bf16.mxu1 %v12481_v9  ;;  %10155 = vmatprep.subr.bf16.mxu0 %v10154_v23  ;;  %v3188_v29 = vsub.f32 %v12412_v16, %v14098_v47  ;;  %v3205_v49 = vand.u32 4294901760, %v12459_v31  ;;  %v3217_v59 = vand.u32 4294901760, %v12483_v63  ;;  %v2521_v32 = vand.u32 4294901760, %v12442_v12 }
 0x27f   :  { %10201 = vmatpush1.bf16.msra.mxu1 %v12473_v40  ;;  %v10156_v18 = vpack.c.bf16 %v2511_v35, %v2499_v17  ;;  %v3200_v44 = vsub.f32 %v12433_v52, %v3199_v48  ;;  %v2516_v33 = vsub.f32 %v12449_v38, %v2515_v57  ;;  %v2528_v13 = vsub.f32 %v12471_v4, %v2527_v58 }
 0x280   :  { %10203 = vmatprep.subr.bf16.mxu1 %v10202_v28  ;;  %2450 = vmatmul.mubr.f32.vlgmr.msra.gmra.mrb[8].mxu0 %v12393_v21  ;;  %v3189_v23 = vand.u32 4294901760, %v3188_v29  ;;  %v3206_v7 = vsub.f32 %v12459_v31, %v3205_v49  ;;  %v3218_v50 = vsub.f32 %v12483_v63, %v3217_v59  ;;  %v2522_v47 = vsub.f32 %v12442_v12, %v2521_v32 }
 0x281   :  { %10157 = vmatpush1.bf16.msra.mxu0 %v10156_v18  ;;  %v3201_v54 = vand.u32 4294901760, %v3200_v44  ;;  %2455 = vmatprep.mubr.f32.mxu0 %v11127_v5  ;;  %v2517_v17 = vand.u32 4294901760, %v2516_v33  ;;  %v2529_v35 = vand.u32 4294901760, %v2528_v13  ;;  %v2533_v30 = vand.u32 4294901760, %v12467_v61 }
 0x282   :  { %3140 = vmatmul.mubr.f32.vlgmr.msra.gmra.mrb[8].mxu1 %v12393_v21  ;;  %v3207_v28 = vand.u32 4294901760, %v3206_v7  ;;  %v3219_v20 = vand.u32 4294901760, %v3218_v50  ;;  %v2523_v62 = vand.u32 4294901760, %v2522_v47  ;;  %v3211_v29 = vand.u32 4294901760, %v12454_v14 }
 0x283   :  { %v10204_v22 = vpack.c.bf16 %v3201_v54, %v3189_v23  ;;  %3145 = vmatprep.mubr.f32.mxu1 %v11127_v5  ;;  %v10158_v36 = vpack.c.bf16 %v2529_v35, %v2517_v17  ;;  %v2534_v18 = vsub.f32 %v12467_v61, %v2533_v30  ;;  %v3223_v44 = vand.u32 4294901760, %v12475_v11 }
 0x284   :  { %2461 = vmatmul.mubr.f32.gmra.mrb[10].mxu0 %v12399_v45  ;;  %v10206_v33 = vpack.c.bf16 %v3219_v20, %v3207_v28  ;;  %v3212_v13 = vsub.f32 %v12454_v14, %v3211_v29  ;;  %v10162_v21 = vpack.c.bf16 %v12426_v1, %v12403_v56  ;;  %v10210_v47 = vpack.c.bf16 %v12439_v43, %v12410_v19 }
 0x285   :  { %10205 = vmatpush1.bf16.msra.mxu1 %v10204_v22  ;;  %10159 = vmatprep.subr.bf16.mxu0 %v10158_v36  ;;  %v2535_v54 = vand.u32 4294901760, %v2534_v18  ;;  %v3224_v23 = vsub.f32 %v12475_v11, %v3223_v44  ;;  %v10164_v7 = vpack.c.bf16 %v12417_v8, %v12401_v10  ;;  %v10212_v50 = vpack.c.bf16 %v12433_v52, %v12412_v16 }
 0x286   :  { %3151 = vmatmul.mubr.f32.gmra.mrb[10].mxu1 %v12399_v45  ;;  %10207 = vmatprep.subr.bf16.mxu1 %v10206_v33  ;;  %v3213_v20 = vand.u32 4294901760, %v3212_v13  ;;  %v10166_v17 = vpack.c.bf16 %v12471_v4, %v12449_v38  ;;  %v10214_v22 = vpack.c.bf16 %v12483_v63, %v12459_v31  ;;  %v10168_v36 = vpack.c.bf16 %v12467_v61, %v12442_v12 }
 0x287   :  { %v10160_v35 = vpack.c.bf16 %v2535_v54, %v2523_v62  ;;  %v3225_v28 = vand.u32 4294901760, %v3224_v23  ;;  %2466 = vmatprep.mubr.f32.mxu0 %v11127_v5  ;;  %3156 = vmatprep.mubr.f32.mxu1 %v11127_v5  ;;  %v10216_v45 = vpack.c.bf16 %v12475_v11, %v12454_v14  ;;  %v14410_v52 = vand.u32 4294901760, %v12403_v56 }
 0x288   :  { %v14411_v18 = vand.u32 4294901760, %v12426_v1  ;;  %2472 = vmatmul.mubr.f32.gmra.mrb[12].mxu0 %v12405_v55  ;;  %v14412_v31 = vand.u32 4294901760, %v12410_v19  ;;  %v14413_v12 = vand.u32 4294901760, %v12439_v43  ;;  %v14414_v61 = vand.u32 4294901760, %v12401_v10 }
 0x289   :  { %v14415_v4 = vand.u32 4294901760, %v12417_v8  ;;  %v14416_v14 = vand.u32 4294901760, %v12412_v16  ;;  %v12553_v56 = vpack.c.bf16 %v2527_v58, %v2515_v57  ;;  %10161 = vmatpush1.bf16.msra.mxu0 %v10160_v35  ;;  %v10208_v1 = vpack.c.bf16 %v3225_v28, %v3213_v20  ;;  %2477 = vmatprep.mubr.f32.mxu0 %v11127_v5 }
 0x28a   :  { %v10178_v38 = vpack.c.bf16 %v14411_v18, %v14410_v52  ;;  %v10226_v62 = vpack.c.bf16 %v14413_v12, %v14412_v31  ;;  %v12556_v19 = vpack.c.bf16 %v3217_v59, %v3205_v49  ;;  %v12558_v43 = vpack.c.bf16 %v2533_v30, %v2521_v32  ;;  %10163 = vmatprep.subr.bf16.mxu0 %v10162_v21 }
 0x28b   :  { %v12547_v63 = vpack.c.bf16 %v14415_v4, %v14414_v61  ;;  %v12551_v11 = vpack.c.bf16 %v3199_v48, %v14416_v14  ;;  %3162 = vmatmul.mubr.f32.gmra.mrb[12].mxu1 %v12405_v55  ;;  %v12561_v10 = vpack.c.bf16 %v3223_v44, %v3211_v29 }
 0x28c   :  { %10209 = vmatpush1.bf16.msra.mxu1 %v10208_v1  ;;  %3167 = vmatprep.mubr.f32.mxu1 %v11127_v5 }
 0x28d   :  { %10211 = vmatprep.subr.bf16.mxu1 %v10210_v47  ;;  %2483 = vmatmul.mubr.f32.gmra.mrb[14].mxu0 %v12408_v6 }
 0x28e   :  { %2593 = vmatprep.mubr.f32.mxu0 %v11127_v5 }
 0x28f   :  { %3173 = vmatmul.mubr.f32.gmra.mrb[14].mxu1 %v12408_v6 }
 0x290   :  { %3283 = vmatprep.mubr.f32.mxu1 %v11127_v5 }
 0x291   :  { %2595 = vmatmul.mubr.f32.vlgmr.msra.gmra.mrb[8].mxu0 %v12355_v15 }
 0x292   :  { %10165 = vmatpush1.bf16.msra.mxu0 %v10164_v7  ;;  %2600 = vmatprep.mubr.f32.mxu0 %v11127_v5 }
 0x293   :  { %3285 = vmatmul.mubr.f32.vlgmr.msra.gmra.mrb[8].mxu1 %v12355_v15  ;;  %10167 = vmatprep.subr.bf16.mxu0 %v10166_v17 }
 0x294   :  { %10213 = vmatpush1.bf16.msra.mxu1 %v10212_v50  ;;  %3290 = vmatprep.mubr.f32.mxu1 %v11127_v5 }
 0x295   :  { %10215 = vmatprep.subr.bf16.mxu1 %v10214_v22  ;;  %2602 = vmatmul.mubr.f32.gmra.mrb[10].mxu0 %v12358_v37 }
 0x296   :  { %10169 = vmatpush1.bf16.msra.mxu0 %v10168_v36  ;;  %2607 = vmatprep.mubr.f32.mxu0 %v11127_v5 }
 0x297   :  { %3292 = vmatmul.mubr.f32.gmra.mrb[10].mxu1 %v12358_v37  ;;  %10171 = vmatprep.subr.bf16.mxu0 %v12424_v51 }
 0x298   :  { %10217 = vmatpush1.bf16.msra.mxu1 %v10216_v45  ;;  %3297 = vmatprep.mubr.f32.mxu1 %v11127_v5 }
 0x299   :  { %10219 = vmatprep.subr.bf16.mxu1 %v12437_v46  ;;  %2609 = vmatmul.mubr.f32.gmra.mrb[12].mxu0 %v12364_v42 }
 0x29a   :  { %2614 = vmatprep.mubr.f32.mxu0 %v11127_v5 }
 0x29b   :  { %3299 = vmatmul.mubr.f32.gmra.mrb[12].mxu1 %v12364_v42 }
 0x29c   :  { %3304 = vmatprep.mubr.f32.mxu1 %v11127_v5 }
 0x29d   :  { %2616 = vmatmul.mubr.f32.gmra.mrb[14].mxu0 %v12366_v27 }
 0x29e   :  { %2702 = vmatprep.mubr.f32.mxu0 %v11127_v5 }
 0x29f   :  { %3306 = vmatmul.mubr.f32.gmra.mrb[14].mxu1 %v12366_v27 }
 0x2a0   :  { %3392 = vmatprep.mubr.f32.mxu1 %v11127_v5 }
 0x2a1   :  { %2705 = vmatmul.mubr.f32.vlgmr.msra.gmra.mrb[8].mxu0 %v12362_v25 }
 0x2a2   :  { %10173 = vmatpush1.bf16.msra.mxu0 %v12415_v3  ;;  %2710 = vmatprep.mubr.f32.mxu0 %v11127_v5 }
 0x2a3   :  { %3395 = vmatmul.mubr.f32.vlgmr.msra.gmra.mrb[8].mxu1 %v12362_v25  ;;  %10175 = vmatprep.subr.bf16.mxu0 %v12469_v60  ;;  %v14417_v25 = vld [vmem:[#allocation10_spill] sm:$0xff] }
 0x2a4   :  { %10221 = vmatpush1.bf16.msra.mxu1 %v12431_v26  ;;  %3400 = vmatprep.mubr.f32.mxu1 %v11127_v5 }
 0x2a5   :  { %10223 = vmatprep.subr.bf16.mxu1 %v12481_v9  ;;  %2713 = vmatmul.mubr.f32.gmra.mrb[10].mxu0 %v12369_v53 }
 0x2a6   :  { %10177 = vmatpush1.bf16.msra.mxu0 %v12465_v0  ;;  %2718 = vmatprep.mubr.f32.mxu0 %v11127_v5 }
 0x2a7   :  { %3403 = vmatmul.mubr.f32.gmra.mrb[10].mxu1 %v12369_v53  ;;  %10179 = vmatprep.subr.bf16.mxu0 %v10178_v38  ;;  %v2342_v53 = vpop.permute.xlu0 %2341 }
 0x2a8   :  { %10225 = vmatpush1.bf16.msra.mxu1 %v12473_v40  ;;  %3408 = vmatprep.mubr.f32.mxu1 %v11127_v5 }
 0x2a9   :  { %10227 = vmatprep.subr.bf16.mxu1 %v10226_v62  ;;  %2721 = vmatmul.mubr.f32.gmra.mrb[12].mxu0 %v12375_v24 }
 0x2aa   :  { %2726 = vmatprep.mubr.f32.mxu0 %v11127_v5 }
 0x2ab   :  { %3411 = vmatmul.mubr.f32.gmra.mrb[12].mxu1 %v12375_v24 }
 0x2ac   :  { %3416 = vmatprep.mubr.f32.mxu1 %v11127_v5 }
 0x2ad   :  { %2729 = vmatmul.mubr.f32.gmra.mrb[14].mxu0 %v12378_v39 }
 0x2ae   :  { %2807 = vmatprep.mubr.f32.mxu0 %v11127_v5 }
 0x2af   :  { %3419 = vmatmul.mubr.f32.gmra.mrb[14].mxu1 %v12378_v39 }
 0x2b0   :  { %3497 = vmatprep.mubr.f32.mxu1 %v11127_v5 }
 0x2b1   :  { %2811 = vmatmul.mubr.f32.vlgmr.msra.gmra.mrb[8].mxu0 %v12372_v2 }
 0x2b2   :  { %10181 = vmatpush1.bf16.msra.mxu0 %v12547_v63  ;;  %2816 = vmatprep.mubr.f32.mxu0 %v11127_v5 }
 0x2b3   :  { %3501 = vmatmul.mubr.f32.vlgmr.msra.gmra.mrb[8].mxu1 %v12372_v2  ;;  %10183 = vmatprep.subr.bf16.mxu0 %v12553_v56 }
 0x2b4   :  { %10229 = vmatpush1.bf16.msra.mxu1 %v12551_v11  ;;  %3506 = vmatprep.mubr.f32.mxu1 %v11127_v5 }
 0x2b5   :  { %10231 = vmatprep.subr.bf16.mxu1 %v12556_v19  ;;  %2820 = vmatmul.mubr.f32.gmra.mrb[10].mxu0 %v12381_v34 }
 0x2b6   :  { %10185 = vmatpush1.bf16.msra.mxu0 %v12558_v43  ;;  %2825 = vmatprep.mubr.f32.mxu0 %v11127_v5 }
 0x2b7   :  { %3510 = vmatmul.mubr.f32.gmra.mrb[10].mxu1 %v12381_v34  ;;  %10187 = vmatprep.subr.bf16.mxu0 %v12424_v51 }
 0x2b8   :  { %10233 = vmatpush1.bf16.msra.mxu1 %v12561_v10  ;;  %3515 = vmatprep.mubr.f32.mxu1 %v11127_v5 }
 0x2b9   :  { %10235 = vmatprep.subr.bf16.mxu1 %v12437_v46  ;;  %2829 = vmatmul.mubr.f32.gmra.mrb[12].mxu0 %v12386_v41 }
 0x2ba   :  { %2834 = vmatprep.mubr.f32.mxu0 %v11127_v5 }
 0x2bb   :  { %3519 = vmatmul.mubr.f32.gmra.mrb[12].mxu1 %v12386_v41 }
 0x2bc   :  { %3524 = vmatprep.mubr.f32.mxu1 %v11127_v5 }
 0x2bd   :  { %2838 = vmatmul.mubr.f32.gmra.mrb[14].mxu0 %v14417_v25 }
 0x2be   :  { %2932 = vmatprep.mubr.f32.mxu0 %v11127_v5 }
 0x2bf   :  { %3528 = vmatmul.mubr.f32.gmra.mrb[14].mxu1 %v14417_v25 }
 0x2c0   :  { %3622 = vmatprep.mubr.f32.mxu1 %v11127_v5 }
 0x2c1   :  { %2934 = vmatmul.mubr.f32.vlgmr.msra.gmra.mrb[8].mxu0 %v12355_v15 }
 0x2c2   :  { %10189 = vmatpush1.bf16.msra.mxu0 %v12415_v3  ;;  %2939 = vmatprep.mubr.f32.mxu0 %v11127_v5 }
 0x2c3   :  { %3624 = vmatmul.mubr.f32.vlgmr.msra.gmra.mrb[8].mxu1 %v12355_v15  ;;  %10191 = vmatprep.subr.bf16.mxu0 %v12469_v60 }
 0x2c4   :  { %10237 = vmatpush1.bf16.msra.mxu1 %v12431_v26  ;;  %3629 = vmatprep.mubr.f32.mxu1 %v11127_v5 }
 0x2c5   :  { %10239 = vmatprep.subr.bf16.mxu1 %v12481_v9  ;;  %2941 = vmatmul.mubr.f32.gmra.mrb[10].mxu0 %v12358_v37 }
 0x2c6   :  { %10193 = vmatpush1.bf16.msra.mxu0 %v12465_v0  ;;  %2946 = vmatprep.mubr.f32.mxu0 %v11127_v5 }
 0x2c7   :  { %3631 = vmatmul.mubr.f32.gmra.mrb[10].mxu1 %v12358_v37 }
 0x2c8   :  { %10241 = vmatpush1.bf16.msra.mxu1 %v12473_v40  ;;  %3636 = vmatprep.mubr.f32.mxu1 %v11127_v5  ;;  %v2352_v40 = vpop.permute.xlu0 %2351 }
 0x2c9   :  { %2948 = vmatmul.mubr.f32.gmra.mrb[12].mxu0 %v12364_v42 }
 0x2ca   :  { %2953 = vmatprep.mubr.f32.mxu0 %v11127_v5 }
 0x2cb   :  { %3638 = vmatmul.mubr.f32.gmra.mrb[12].mxu1 %v12364_v42 }
 0x2cc   :  { %3643 = vmatprep.mubr.f32.mxu1 %v11127_v5 }
 0x2cd   :  { %2955 = vmatmul.mubr.f32.gmra.mrb[14].mxu0 %v12366_v27 }
 0x2ce   :  { %3033 = vmatprep.mubr.f32.mxu0 %v11127_v5 }
 0x2cf   :  { %3645 = vmatmul.mubr.f32.gmra.mrb[14].mxu1 %v12366_v27 }
 0x2d0   :  { %3723 = vmatprep.mubr.f32.mxu1 %v11127_v5 }
 0x2d1   :  { %3035 = vmatmul.mubr.f32.vlgmr.msra.gmra.mrb[8].mxu0 %v12355_v15 }
 0x2d2   :  { %3040 = vmatprep.mubr.f32.mxu0 %v11127_v5 }
 0x2d3   :  { %3725 = vmatmul.mubr.f32.vlgmr.msra.gmra.mrb[8].mxu1 %v12355_v15  ;;  %v3768_v15 = vld [vmem:[%s13868_s1 + $0x40] sm:$0x3] }
 0x2d4   :  { %3730 = vmatprep.mubr.f32.mxu1 %v11127_v5 }
 0x2d5   :  { %3042 = vmatmul.mubr.f32.gmra.mrb[10].mxu0 %v12358_v37 }
 0x2d6   :  { %3047 = vmatprep.mubr.f32.mxu0 %v11127_v5 }
 0x2d7   :  { %3732 = vmatmul.mubr.f32.gmra.mrb[10].mxu1 %v12358_v37  ;;  %v3776_v37 = vsel %vm2359_vm1, %v3768_v15, 0 }
 0x2d8   :  { %3737 = vmatprep.mubr.f32.mxu1 %v11127_v5  ;;  %v12674_v41 = vand.u32 4294901760, %v3776_v37 }
 0x2d9   :  { %3049 = vmatmul.mubr.f32.gmra.mrb[12].mxu0 %v12364_v42 }
 0x2da   :  { %3054 = vmatprep.mubr.f32.mxu0 %v11127_v5  ;;  %v12677_v30 = vsub.f32 %v3776_v37, %v12674_v41 }
 0x2db   :  { %3739 = vmatmul.mubr.f32.gmra.mrb[12].mxu1 %v12364_v42 }
 0x2dc   :  { %3744 = vmatprep.mubr.f32.mxu1 %v11127_v5  ;;  %v12680_v32 = vand.u32 4294901760, %v12677_v30 }
 0x2dd   :  { %3056 = vmatmul.mubr.f32.gmra.mrb[14].mxu0 %v12366_v27 }
 0x2de   :  { %3850 = vmatprep.mubr.f32.mxu0 %v11127_v5  ;;  %v3854_v22 = vsub.f32 %v12677_v30, %v12680_v32 }
 0x2df   :  { %3746 = vmatmul.mubr.f32.gmra.mrb[14].mxu1 %v12366_v27  ;;  %v2347_v27 = vpop.permute.xlu1 %2346 }
 0x2e0   :  { %4393 = vmatprep.mubr.f32.mxu1 %v11127_v5  ;;  %v12688_v14 = vand.u32 4294901760, %v3854_v22 }
 0x2e3   :  { %v2357_v33 = vpop.permute.xlu1 %2356 }
 0x3a4   :  { %v3036_v2 = vpop.f32.mrb[8].mxu0 }
 0x3a5   :  { %v10546_v24 = vadd.f32 %v3036_v2, %v2342_v53  ;;  %v3038_v42 = vpop.f32.mrb[9].mxu0 }
 0x3a6   :  { %v3726_v39 = vpop.f32.mrb[8].mxu1  ;;  %v10547_v34 = vadd.f32 %v3038_v42, %v2342_v53 }
 0x3a7   :  { %11022 = vtanh.f32 %v10546_v24  ;;  %v10554_v55 = vadd.f32 %v3726_v39, %v2342_v53  ;;  %v3728_v6 = vpop.f32.mrb[9].mxu1 }
 0x3a8   :  { %11024 = vtanh.f32 %v10547_v34  ;;  %v10555_v16 = vadd.f32 %v3728_v6, %v2342_v53  ;;  %v3043_v3 = vpop.f32.mrb[10].mxu0 }
 0x3a9   :  { %11026 = vtanh.f32 %v10554_v55  ;;  %v10548_v8 = vadd.f32 %v3043_v3, %v2347_v27  ;;  %v3045_v51 = vpop.f32.mrb[11].mxu0 }
 0x3aa   :  { %11028 = vtanh.f32 %v10555_v16  ;;  %v3733_v26 = vpop.f32.mrb[10].mxu1  ;;  %v10549_v46 = vadd.f32 %v3045_v51, %v2347_v27 }
 0x3ab   :  { %11030 = vtanh.f32 %v10548_v8  ;;  %v10556_v0 = vadd.f32 %v3733_v26, %v2347_v27  ;;  %v3735_v60 = vpop.f32.mrb[11].mxu1 }
 0x3ac   :  { %11032 = vtanh.f32 %v10549_v46  ;;  %v10557_v9 = vadd.f32 %v3735_v60, %v2347_v27  ;;  %v3050_v48 = vpop.f32.mrb[12].mxu0 }
 0x3ad   :  { %11034 = vtanh.f32 %v10556_v0  ;;  %v10550_v57 = vadd.f32 %v3050_v48, %v2352_v40  ;;  %v3052_v58 = vpop.f32.mrb[13].mxu0 }
 0x3ae   :  { %11036 = vtanh.f32 %v10557_v9  ;;  %v3740_v49 = vpop.f32.mrb[12].mxu1  ;;  %v10551_v59 = vadd.f32 %v3052_v58, %v2352_v40 }
 0x3af   :  { %11038 = vtanh.f32 %v10550_v57  ;;  %v10558_v29 = vadd.f32 %v3740_v49, %v2352_v40  ;;  %v3742_v44 = vpop.f32.mrb[13].mxu1 }
 0x3b0   :  { %11040 = vtanh.f32 %v10551_v59  ;;  %v10559_v13 = vadd.f32 %v3742_v44, %v2352_v40  ;;  %v3057_v21 = vpop.f32.mrb[14].mxu0 }
 0x3b1   :  { %v11023_v47 = vpop.eup %11022  ;;  %11042 = vtanh.f32 %v10558_v29  ;;  %v10552_v54 = vadd.f32 %v3057_v21, %v2357_v33  ;;  %v3059_v23 = vpop.f32.mrb[15].mxu0 }
 0x3b2   :  { %v11025_v7 = vpop.eup %11024  ;;  %11044 = vtanh.f32 %v10559_v13  ;;  %v3747_v50 = vpop.f32.mrb[14].mxu1  ;;  %v10553_v20 = vadd.f32 %v3059_v23, %v2357_v33  ;;  %v3780_v17 = vand.u32 4294901760, %v11023_v47 }
 0x3b3   :  { %v11027_v36 = vpop.eup %11026  ;;  %11046 = vtanh.f32 %v10552_v54  ;;  %v10560_v35 = vadd.f32 %v3747_v50, %v2357_v33  ;;  %v3749_v28 = vpop.f32.mrb[15].mxu1  ;;  %v3778_v45 = vand.u32 4294901760, %v11025_v7 }
 0x3b4   :  { %v11029_v52 = vpop.eup %11028  ;;  %11048 = vtanh.f32 %v10553_v20  ;;  %v10561_v18 = vadd.f32 %v3749_v28, %v2357_v33  ;;  %v12684_v38 = vsub.f32 %v11023_v47, %v3780_v17  ;;  %v4323_v31 = vand.u32 4294901760, %v11027_v36 }
 0x3b5   :  { %v11031_v12 = vpop.eup %11030  ;;  %11050 = vtanh.f32 %v10560_v35  ;;  %v12686_v62 = vsub.f32 %v11025_v7, %v3778_v45  ;;  %v4321_v61 = vand.u32 4294901760, %v11029_v52 }
 0x3b6   :  { %v11033_v4 = vpop.eup %11032  ;;  %11052 = vtanh.f32 %v10561_v18  ;;  %v3784_v63 = vand.u32 4294901760, %v11031_v12  ;;  %v3870_v11 = vand.u32 4294901760, %v12684_v38  ;;  %v12693_v43 = vsub.f32 %v11027_v36, %v4323_v31 }
 0x3b7   :  { %v11035_v56 = vpop.eup %11034  ;;  %v3782_v1 = vand.u32 4294901760, %v11033_v4  ;;  %v12691_v19 = vsub.f32 %v11029_v52, %v4321_v61  ;;  %v3864_v10 = vand.u32 4294901760, %v12686_v62 }
 0x3b8   :  { %v11037_v25 = vpop.eup %11036  ;;  %v12696_v15 = vpack.c.bf16 %v3784_v63, %v3780_v17  ;;  %v12698_v37 = vsub.f32 %v11031_v12, %v3784_v63  ;;  %v4327_v53 = vand.u32 4294901760, %v11035_v56  ;;  %v12703_v2 = vsub.f32 %v12684_v38, %v3870_v11 }
 0x3b9   :  { %v11039_v24 = vpop.eup %11038  ;;  %v12705_v42 = vpack.c.bf16 %v3782_v1, %v3778_v45  ;;  %v12707_v39 = vsub.f32 %v11033_v4, %v3782_v1  ;;  %v4325_v34 = vand.u32 4294901760, %v11037_v25  ;;  %v3865_v55 = vsub.f32 %v12686_v62, %v3864_v10 }
 0x3ba   :  { %v11041_v6 = vpop.eup %11040  ;;  %v12712_v27 = vpack.c.bf16 %v4327_v53, %v4323_v31  ;;  %v12714_v16 = vsub.f32 %v11035_v56, %v4327_v53  ;;  %v3788_v3 = vand.u32 4294901760, %v11039_v24  ;;  %v4407_v8 = vand.u32 4294901760, %v12691_v19 }
 0x3bb   :  { %v11043_v51 = vpop.eup %11042  ;;  %10243 = vmatprep.subr.bf16.mxu0 %v12705_v42  ;;  %v12718_v26 = vpack.c.bf16 %v4325_v34, %v4321_v61  ;;  %v12720_v46 = vsub.f32 %v11037_v25, %v4325_v34  ;;  %v3786_v0 = vand.u32 4294901760, %v11041_v6  ;;  %v3866_v60 = vand.u32 4294901760, %v3865_v55 }
 0x3bc   :  { %v11045_v40 = vpop.eup %11044  ;;  %10245 = vmatpush1.bf16.msra.mxu0 %v12696_v15  ;;  %v12723_v9 = vsub.f32 %v11039_v24, %v3788_v3  ;;  %v4331_v48 = vand.u32 4294901760, %v11043_v51  ;;  %v3876_v57 = vand.u32 4294901760, %v12707_v39  ;;  %v4408_v58 = vsub.f32 %v12691_v19, %v4407_v8 }
 0x3bd   :  { %v11047_v49 = vpop.eup %11046  ;;  %10291 = vmatprep.subr.bf16.mxu1 %v12718_v26  ;;  %v12730_v59 = vsub.f32 %v11041_v6, %v3786_v0  ;;  %v4329_v29 = vand.u32 4294901760, %v11045_v40  ;;  %v4419_v44 = vand.u32 4294901760, %v12720_v46  ;;  %v3872_v33 = vand.u32 4294901760, %v12703_v2 }
 0x3be   :  { %v11049_v13 = vpop.eup %11048  ;;  %10293 = vmatpush1.bf16.msra.mxu1 %v12712_v27  ;;  %v3792_v21 = vand.u32 4294901760, %v11047_v49  ;;  %v12735_v47 = vsub.f32 %v11043_v51, %v4331_v48  ;;  %v3877_v54 = vsub.f32 %v12707_v39, %v3876_v57  ;;  %v4409_v23 = vand.u32 4294901760, %v4408_v58 }
 0x3bf   :  { %v11051_v7 = vpop.eup %11050  ;;  %v3790_v50 = vand.u32 4294901760, %v11049_v13  ;;  %v12740_v20 = vsub.f32 %v11045_v40, %v4329_v29  ;;  %v4420_v17 = vsub.f32 %v12720_v46, %v4419_v44  ;;  %v3882_v22 = vand.u32 4294901760, %v12698_v37 }
 0x3c0   :  { %v11053_v36 = vpop.eup %11052  ;;  %v12746_v35 = vpack.c.bf16 %v3792_v21, %v3788_v3  ;;  %v12748_v28 = vsub.f32 %v11047_v49, %v3792_v21  ;;  %v4335_v45 = vand.u32 4294901760, %v11051_v7  ;;  %v3878_v52 = vand.u32 4294901760, %v3877_v54 }
 0x3c1   :  { %v12750_v18 = vpack.c.bf16 %v3790_v50, %v3786_v0  ;;  %v12752_v31 = vsub.f32 %v11049_v13, %v3790_v50  ;;  %v4333_v12 = vand.u32 4294901760, %v11053_v36  ;;  %v4421_v61 = vand.u32 4294901760, %v4420_v17 }
 0x3c2   :  { %v12754_v4 = vpack.c.bf16 %v4335_v45, %v4331_v48  ;;  %v12756_v63 = vsub.f32 %v11051_v7, %v4335_v45  ;;  %v10250_v56 = vpack.c.bf16 %v3878_v52, %v3866_v60  ;;  %v3883_v1 = vsub.f32 %v12698_v37, %v3882_v22 }
 0x3c3   :  { %10247 = vmatprep.subr.bf16.mxu0 %v12750_v18  ;;  %v12762_v25 = vpack.c.bf16 %v4333_v12, %v4329_v29  ;;  %v12764_v53 = vsub.f32 %v11053_v36, %v4333_v12  ;;  %v10298_v2 = vpack.c.bf16 %v4421_v61, %v4409_v23  ;;  %v4413_v24 = vand.u32 4294901760, %v12693_v43 }
 0x3c4   :  { %10249 = vmatpush1.bf16.msra.mxu0 %v12746_v35  ;;  %v3884_v34 = vand.u32 4294901760, %v3883_v1  ;;  %v4425_v55 = vand.u32 4294901760, %v12714_v16  ;;  %v3888_v6 = vand.u32 4294901760, %v12730_v59  ;;  %v3900_v3 = vand.u32 4294901760, %v12752_v31 }
 0x3c5   :  { %10295 = vmatprep.subr.bf16.mxu1 %v12762_v25  ;;  %10251 = vmatprep.subr.bf16.mxu0 %v10250_v56  ;;  %v4414_v51 = vsub.f32 %v12693_v43, %v4413_v24  ;;  %v4431_v0 = vand.u32 4294901760, %v12740_v20  ;;  %v4443_v60 = vand.u32 4294901760, %v12764_v53  ;;  %v3894_v40 = vand.u32 4294901760, %v12723_v9 }
 0x3c6   :  { %10297 = vmatpush1.bf16.msra.mxu1 %v12754_v4  ;;  %v10252_v48 = vpack.c.bf16 %v3884_v34, %v3872_v33  ;;  %v4426_v58 = vsub.f32 %v12714_v16, %v4425_v55  ;;  %v3889_v49 = vsub.f32 %v12730_v59, %v3888_v6  ;;  %v3901_v29 = vsub.f32 %v12752_v31, %v3900_v3 }
 0x3c7   :  { %10299 = vmatprep.subr.bf16.mxu1 %v10298_v2  ;;  %3856 = vmatmul.mubr.f32.vlgmr.msra.gmra.mrb[16].mxu0 %v12688_v14  ;;  %v4415_v13 = vand.u32 4294901760, %v4414_v51  ;;  %v4432_v21 = vsub.f32 %v12740_v20, %v4431_v0  ;;  %v4444_v54 = vsub.f32 %v12764_v53, %v4443_v60  ;;  %v3895_v23 = vsub.f32 %v12723_v9, %v3894_v40 }
 0x3c8   :  { %10253 = vmatpush1.bf16.msra.mxu0 %v10252_v48  ;;  %v4427_v7 = vand.u32 4294901760, %v4426_v58  ;;  %v3890_v50 = vand.u32 4294901760, %v3889_v49  ;;  %v3902_v33 = vand.u32 4294901760, %v3901_v29  ;;  %v3906_v17 = vand.u32 4294901760, %v12748_v28  ;;  %3966 = vmatprep.mubr.f32.mxu0 %v11127_v5 }
 0x3c9   :  { %4399 = vmatmul.mubr.f32.vlgmr.msra.gmra.mrb[16].mxu1 %v12688_v14  ;;  %v4433_v36 = vand.u32 4294901760, %v4432_v21  ;;  %v4445_v45 = vand.u32 4294901760, %v4444_v54  ;;  %v3896_v52 = vand.u32 4294901760, %v3895_v23  ;;  %v4437_v12 = vand.u32 4294901760, %v12735_v47 }
 0x3ca   :  { %v10300_v61 = vpack.c.bf16 %v4427_v7, %v4415_v13  ;;  %v10254_v56 = vpack.c.bf16 %v3902_v33, %v3890_v50  ;;  %v3907_v1 = vsub.f32 %v12748_v28, %v3906_v17  ;;  %v4449_v2 = vand.u32 4294901760, %v12756_v63  ;;  %4509 = vmatprep.mubr.f32.mxu1 %v11127_v5 }
 0x3cb   :  { %v10302_v34 = vpack.c.bf16 %v4445_v45, %v4433_v36  ;;  %v4438_v51 = vsub.f32 %v12735_v47, %v4437_v12  ;;  %v10258_v48 = vpack.c.bf16 %v12707_v39, %v12686_v62  ;;  %v10306_v14 = vpack.c.bf16 %v12720_v46, %v12691_v19  ;;  %v3773_v19 = vpop.permute.xlu0 %3772 }
 0x3cc   :  { %10301 = vmatpush1.bf16.msra.mxu1 %v10300_v61  ;;  %10255 = vmatprep.subr.bf16.mxu0 %v10254_v56  ;;  %v3908_v58 = vand.u32 4294901760, %v3907_v1  ;;  %v4450_v49 = vsub.f32 %v12756_v63, %v4449_v2  ;;  %v10260_v29 = vpack.c.bf16 %v12698_v37, %v12684_v38  ;;  %v10308_v13 = vpack.c.bf16 %v12714_v16, %v12693_v43  ;;  %v4869_v38 = vld [vmem:[%s13868_s1 + $0x50] sm:$0xff] }
 0x3cd   :  { %10303 = vmatprep.subr.bf16.mxu1 %v10302_v34  ;;  %v4439_v21 = vand.u32 4294901760, %v4438_v51  ;;  %v10262_v54 = vpack.c.bf16 %v12752_v31, %v12730_v59  ;;  %v10310_v23 = vpack.c.bf16 %v12764_v53, %v12740_v20  ;;  %v10264_v7 = vpack.c.bf16 %v12748_v28, %v12723_v9 }
 0x3ce   :  { %v10256_v50 = vpack.c.bf16 %v3908_v58, %v3896_v52  ;;  %v4451_v33 = vand.u32 4294901760, %v4450_v49  ;;  %v10312_v36 = vpack.c.bf16 %v12756_v63, %v12735_v47  ;;  %v10274_v43 = vpack.c.bf16 %v3876_v57, %v3864_v10 }
 0x3cf   :  { %v10322_v16 = vpack.c.bf16 %v4419_v44, %v4407_v8  ;;  %v10276_v9 = vpack.c.bf16 %v3882_v22, %v3870_v11  ;;  %v10324_v59 = vpack.c.bf16 %v4425_v55, %v4413_v24  ;;  %v10278_v20 = vpack.c.bf16 %v3900_v3, %v3888_v6 }
 0x3d0   :  { %10257 = vmatpush1.bf16.msra.mxu0 %v10256_v50  ;;  %v10304_v28 = vpack.c.bf16 %v4451_v33, %v4439_v21  ;;  %v10326_v47 = vpack.c.bf16 %v4443_v60, %v4431_v0  ;;  %v10280_v31 = vpack.c.bf16 %v3906_v17, %v3894_v40  ;;  %v10328_v62 = vpack.c.bf16 %v4449_v2, %v4437_v12 }
 0x3d1   :  { %10259 = vmatprep.subr.bf16.mxu0 %v10258_v48 }
 0x3d2   :  { %10305 = vmatpush1.bf16.msra.mxu1 %v10304_v28 }
 0x3d3   :  { %10307 = vmatprep.subr.bf16.mxu1 %v10306_v14  ;;  %3968 = vmatmul.mubr.f32.vlgmr.msra.gmra.mrb[16].mxu0 %v12674_v41 }
 0x3d4   :  { %10261 = vmatpush1.bf16.msra.mxu0 %v10260_v29  ;;  %4054 = vmatprep.mubr.f32.mxu0 %v11127_v5 }
 0x3d5   :  { %4511 = vmatmul.mubr.f32.vlgmr.msra.gmra.mrb[16].mxu1 %v12674_v41  ;;  %10263 = vmatprep.subr.bf16.mxu0 %v10262_v54 }
 0x3d6   :  { %10309 = vmatpush1.bf16.msra.mxu1 %v10308_v13  ;;  %4597 = vmatprep.mubr.f32.mxu1 %v11127_v5 }
 0x3d7   :  { %10311 = vmatprep.subr.bf16.mxu1 %v10310_v23 }
 0x3d8   :  { %10265 = vmatpush1.bf16.msra.mxu0 %v10264_v7 }
 0x3d9   :  { %10267 = vmatprep.subr.bf16.mxu0 %v12705_v42 }
 0x3da   :  { %10313 = vmatpush1.bf16.msra.mxu1 %v10312_v36 }
 0x3db   :  { %10315 = vmatprep.subr.bf16.mxu1 %v12718_v26  ;;  %4057 = vmatmul.mubr.f32.vlgmr.msra.gmra.mrb[16].mxu0 %v12677_v30 }
 0x3dc   :  { %10269 = vmatpush1.bf16.msra.mxu0 %v12696_v15  ;;  %4135 = vmatprep.mubr.f32.mxu0 %v11127_v5 }
 0x3dd   :  { %4600 = vmatmul.mubr.f32.vlgmr.msra.gmra.mrb[16].mxu1 %v12677_v30  ;;  %10271 = vmatprep.subr.bf16.mxu0 %v12750_v18  ;;  %v4868_v30 = vld [vmem:[%s13868_s1 + $0x48] sm:$0xff] }
 0x3de   :  { %10317 = vmatpush1.bf16.msra.mxu1 %v12712_v27  ;;  %4678 = vmatprep.mubr.f32.mxu1 %v11127_v5 }
 0x3df   :  { %10319 = vmatprep.subr.bf16.mxu1 %v12762_v25 }
 0x3e0   :  { %10273 = vmatpush1.bf16.msra.mxu0 %v12746_v35 }
 0x3e1   :  { %10275 = vmatprep.subr.bf16.mxu0 %v10274_v43 }
 0x3e2   :  { %10321 = vmatpush1.bf16.msra.mxu1 %v12754_v4 }
 0x3e3   :  { %10323 = vmatprep.subr.bf16.mxu1 %v10322_v16  ;;  %4139 = vmatmul.mubr.f32.vlgmr.msra.gmra.mrb[16].mxu0 %v12680_v32 }
 0x3e4   :  { %10277 = vmatpush1.bf16.msra.mxu0 %v10276_v9  ;;  %4233 = vmatprep.mubr.f32.mxu0 %v11127_v5 }
 0x3e5   :  { %4682 = vmatmul.mubr.f32.vlgmr.msra.gmra.mrb[16].mxu1 %v12680_v32  ;;  %10279 = vmatprep.subr.bf16.mxu0 %v10278_v20  ;;  %v4898_v32 = vsel %vm4896_vm2, %v4868_v30, 0 }
 0x3e6   :  { %10325 = vmatpush1.bf16.msra.mxu1 %v10324_v59  ;;  %4776 = vmatprep.mubr.f32.mxu1 %v11127_v5  ;;  %v12864_v11 = vand.u32 4294901760, %v4898_v32 }
 0x3e7   :  { %10327 = vmatprep.subr.bf16.mxu1 %v10326_v47 }
 0x3e8   :  { %10281 = vmatpush1.bf16.msra.mxu0 %v10280_v31  ;;  %v12871_v46 = vsub.f32 %v4898_v32, %v12864_v11 }
 0x3e9   :  { %10283 = vmatprep.subr.bf16.mxu0 %v12705_v42 }
 0x3ea   :  { %10329 = vmatpush1.bf16.msra.mxu1 %v10328_v62 }
 0x3eb   :  { %10331 = vmatprep.subr.bf16.mxu1 %v12718_v26  ;;  %4235 = vmatmul.mubr.f32.vlgmr.msra.gmra.mrb[16].mxu0 %v12674_v41 }
 0x3ec   :  { %10285 = vmatpush1.bf16.msra.mxu0 %v12696_v15  ;;  %4313 = vmatprep.mubr.f32.mxu0 %v11127_v5  ;;  %v4901_v15 = vsel %vm4896_vm2, %v4869_v38, 0  ;;  %v6162_v38 = vld [vmem:[%s13868_s1 + $0x68] sm:$0xff] }
 0x3ed   :  { %4778 = vmatmul.mubr.f32.vlgmr.msra.gmra.mrb[16].mxu1 %v12674_v41  ;;  %10287 = vmatprep.subr.bf16.mxu0 %v12750_v18  ;;  %v12873_v57 = vand.u32 4294901760, %v4901_v15  ;;  %v12880_v18 = vand.u32 4294901760, %v12871_v46 }
 0x3ee   :  { %10333 = vmatpush1.bf16.msra.mxu1 %v12712_v27  ;;  %4856 = vmatprep.mubr.f32.mxu1 %v11127_v5  ;;  %v4870_v27 = vld [vmem:[%s13868_s1 + $0x58] sm:$0xff] }
 0x3ef   :  { %10335 = vmatprep.subr.bf16.mxu1 %v12762_v25  ;;  %v4904_v22 = vsel %vm4896_vm2, %v4870_v27, 0  ;;  %v4992_v53 = vsub.f32 %v12871_v46, %v12880_v18 }
 0x3f0   :  { %10289 = vmatpush1.bf16.msra.mxu0 %v12746_v35  ;;  %v4871_v35 = vld [vmem:[%s13868_s1 + $0x60] sm:$0xff]  ;;  %v12885_v63 = vand.u32 4294901760, %v4904_v22 }
 0x3f1   :  { %v4907_v25 = vsel %vm4896_vm2, %v4871_v35, 0  ;;  %v4993_v52 = vand.u32 4294901760, %v4992_v53 }
 0x3f2   :  { %10337 = vmatpush1.bf16.msra.mxu1 %v12754_v4  ;;  %v12883_v4 = vsub.f32 %v4901_v15, %v12873_v57  ;;  %v12894_v55 = vsub.f32 %v4904_v22, %v12885_v63  ;;  %v12896_v6 = vand.u32 4294901760, %v4907_v25 }
 0x3f3   :  { %4315 = vmatmul.mubr.f32.vlgmr.msra.gmra.mrb[16].mxu0 %v12674_v41 }
 0x3f4   :  { %4988 = vmatprep.mubr.f32.mxu0 %v11127_v5  ;;  %v12891_v24 = vand.u32 4294901760, %v12883_v4  ;;  %v12908_v2 = vand.u32 4294901760, %v12894_v55  ;;  %v12911_v34 = vsub.f32 %v4907_v25, %v12896_v6 }
 0x3f5   :  { %4858 = vmatmul.mubr.f32.vlgmr.msra.gmra.mrb[16].mxu1 %v12674_v41 }
 0x3f6   :  { %5600 = vmatprep.mubr.f32.mxu1 %v11127_v5  ;;  %v5003_v12 = vsub.f32 %v12883_v4, %v12891_v24  ;;  %v5014_v7 = vsub.f32 %v12894_v55, %v12908_v2  ;;  %v12938_v50 = vand.u32 4294901760, %v12911_v34 }
 0x3f8   :  { %v5004_v13 = vand.u32 4294901760, %v5003_v12  ;;  %v5015_v28 = vand.u32 4294901760, %v5014_v7  ;;  %v5025_v47 = vsub.f32 %v12911_v34, %v12938_v50 }
 0x3fa   :  { %v5026_v32 = vand.u32 4294901760, %v5025_v47 }
 0x4c6   :  { %v4316_v10 = vpop.f32.mrb[16].mxu0 }
 0x4c7   :  { %v10562_v41 = vadd.f32 %v4316_v10, %v3773_v19  ;;  %v4318_v37 = vpop.f32.mrb[17].mxu0  ;;  %v6164_v10 = vld [vmem:[%s13868_s1 + $0x78] sm:$0xff] }
 0x4c8   :  { %v4859_v42 = vpop.f32.mrb[16].mxu1  ;;  %v10563_v39 = vadd.f32 %v4318_v37, %v3773_v19 }
 0x4c9   :  { %11054 = vtanh.f32 %v10562_v41  ;;  %v10564_v8 = vadd.f32 %v4859_v42, %v3773_v19  ;;  %v4861_v26 = vpop.f32.mrb[17].mxu1  ;;  %v6165_v41 = vld [vmem:[%s13868_s1 + $0x80] sm:$0xff]  ;;  %v6197_v42 = vsel %vm2359_vm1, %v6164_v10, 0 }
 0x4ca   :  { %11056 = vtanh.f32 %v10563_v39  ;;  %v10565_v44 = vadd.f32 %v4861_v26, %v3773_v19  ;;  %v6191_v19 = vsel %vm2359_vm1, %v6162_v38, 0  ;;  %v6200_v27 = vsel %vm2359_vm1, %v6165_v41, 0 }
 0x4cb   :  { %11058 = vtanh.f32 %v10564_v8  ;;  %v13071_v37 = vand.u32 4294901760, %v6191_v19  ;;  %v4879_v8 = vpop.permute.xlu1 %4878  ;;  %v13080_v22 = vand.u32 4294901760, %v6197_v42 }
 0x4cc   :  { %11060 = vtanh.f32 %v10565_v44 }
 0x4cd   :  { %v13078_v44 = vsub.f32 %v6191_v19, %v13071_v37 }
 0x4d3   :  { %v11055_v3 = vpop.eup %11054 }
 0x4d4   :  { %v11057_v0 = vpop.eup %11056  ;;  %v4911_v60 = vsel %vm4909_vm3, %v11055_v3, 0 }
 0x4d5   :  { %v11059_v40 = vpop.eup %11058  ;;  %v4914_v17 = vsel %vm4909_vm3, %v11057_v0, 0  ;;  %v12900_v45 = vand.u32 4294901760, %v4911_v60 }
 0x4d6   :  { %v11061_v61 = vpop.eup %11060  ;;  %v12904_v56 = vand.u32 4294901760, %v4914_v17  ;;  %v4917_v1 = vsel %vm4909_vm3, %v11059_v40, 0  ;;  %v13091_v40 = vsub.f32 %v6197_v42, %v13080_v22 }
 0x4d7   :  { %v4920_v51 = vsel %vm4909_vm3, %v11061_v61, 0  ;;  %v12915_v48 = vsub.f32 %v4911_v60, %v12900_v45  ;;  %v12917_v14 = vand.u32 4294901760, %v4917_v1  ;;  %v13088_v60 = vand.u32 4294901760, %v13078_v44 }
 0x4d8   :  { %4923 = vmatprep.subr.mxu0 %v12904_v56  ;;  %v12920_v58 = vand.u32 4294901760, %v4920_v51  ;;  %v12923_v49 = vsub.f32 %v4914_v17, %v12904_v56 }
 0x4d9   :  { %4925 = vmatpush1.msra.mxu0 %v12900_v45  ;;  %v12927_v29 = vsub.f32 %v4917_v1, %v12917_v14  ;;  %v5041_v21 = vand.u32 4294901760, %v12915_v48  ;;  %v4889_v1 = vpop.permute.xlu1 %4888 }
 0x4da   :  { %5535 = vmatprep.subr.mxu1 %v12920_v58  ;;  %4994 = vmatmul.mubr.f32.vlgmr.msra.gmra.mrb[18].mxu0 %v4993_v52  ;;  %v5035_v54 = vand.u32 4294901760, %v12923_v49  ;;  %v12933_v23 = vsub.f32 %v4920_v51, %v12920_v58 }
 0x4db   :  { %5537 = vmatpush1.msra.mxu1 %v12917_v14  ;;  %4999 = vmatprep.mubr.f32.mxu0 %v11127_v5  ;;  %v5042_v33 = vsub.f32 %v12915_v48, %v5041_v21  ;;  %v5653_v36 = vand.u32 4294901760, %v12927_v29 }
 0x4dc   :  { %5606 = vmatmul.mubr.f32.vlgmr.msra.gmra.mrb[18].mxu1 %v4993_v52  ;;  %v5036_v43 = vsub.f32 %v12923_v49, %v5035_v54  ;;  %v5647_v16 = vand.u32 4294901760, %v12933_v23 }
 0x4dd   :  { %5611 = vmatprep.mubr.f32.mxu1 %v11127_v5  ;;  %v5654_v9 = vsub.f32 %v12927_v29, %v5653_v36  ;;  %v5043_v31 = vand.u32 4294901760, %v5042_v33 }
 0x4de   :  { %5005 = vmatmul.mubr.f32.gmra.mrb[20].mxu0 %v5004_v13  ;;  %v5037_v59 = vand.u32 4294901760, %v5036_v43  ;;  %v5648_v20 = vsub.f32 %v12933_v23, %v5647_v16 }
 0x4df   :  { %5010 = vmatprep.mubr.f32.mxu0 %v11127_v5  ;;  %v5655_v30 = vand.u32 4294901760, %v5654_v9 }
 0x4e0   :  { %5617 = vmatmul.mubr.f32.gmra.mrb[20].mxu1 %v5004_v13  ;;  %5038 = vmatprep.subr.mxu0 %v5037_v59  ;;  %v5649_v62 = vand.u32 4294901760, %v5648_v20 }
 0x4e1   :  { %5044 = vmatpush1.msra.mxu0 %v5043_v31  ;;  %5622 = vmatprep.mubr.f32.mxu1 %v11127_v5 }
 0x4e2   :  { %5650 = vmatprep.subr.mxu1 %v5649_v62  ;;  %5016 = vmatmul.mubr.f32.gmra.mrb[22].mxu0 %v5015_v28 }
 0x4e3   :  { %5656 = vmatpush1.msra.mxu1 %v5655_v30  ;;  %5138 = vmatprep.subr.mxu0 %v12923_v49 }
 0x4e4   :  { %5628 = vmatmul.mubr.f32.gmra.mrb[22].mxu1 %v5015_v28  ;;  %5750 = vmatprep.subr.mxu1 %v12933_v23 }
 0x4e5   :  { %5021 = vmatprep.mubr.f32.mxu0 %v11127_v5  ;;  %5633 = vmatprep.mubr.f32.mxu1 %v11127_v5 }
 0x4e6   :  { %5027 = vmatmul.mubr.f32.gmra.mrb[24].mxu0 %v5026_v32 }
 0x4e7   :  { %5107 = vmatprep.mubr.f32.mxu0 %v11127_v5 }
 0x4e8   :  { %5639 = vmatmul.mubr.f32.gmra.mrb[24].mxu1 %v5026_v32 }
 0x4e9   :  { %5719 = vmatprep.mubr.f32.mxu1 %v11127_v5 }
 0x4ea   :  { %5109 = vmatmul.mubr.f32.vlgmr.msra.gmra.mrb[18].mxu0 %v12864_v11 }
 0x4eb   :  { %5141 = vmatpush1.msra.mxu0 %v12915_v48  ;;  %5114 = vmatprep.mubr.f32.mxu0 %v11127_v5 }
 0x4ec   :  { %5721 = vmatmul.mubr.f32.vlgmr.msra.gmra.mrb[18].mxu1 %v12864_v11  ;;  %5238 = vmatprep.subr.mxu0 %v12904_v56 }
 0x4ed   :  { %5753 = vmatpush1.msra.mxu1 %v12927_v29  ;;  %5726 = vmatprep.mubr.f32.mxu1 %v11127_v5 }
 0x4ee   :  { %5850 = vmatprep.subr.mxu1 %v12920_v58  ;;  %5116 = vmatmul.mubr.f32.gmra.mrb[20].mxu0 %v12873_v57 }
 0x4ef   :  { %5121 = vmatprep.mubr.f32.mxu0 %v11127_v5 }
 0x4f0   :  { %5728 = vmatmul.mubr.f32.gmra.mrb[20].mxu1 %v12873_v57 }
 0x4f1   :  { %5733 = vmatprep.mubr.f32.mxu1 %v11127_v5 }
 0x4f2   :  { %5123 = vmatmul.mubr.f32.gmra.mrb[22].mxu0 %v12885_v63 }
 0x4f3   :  { %5128 = vmatprep.mubr.f32.mxu0 %v11127_v5 }
 0x4f4   :  { %5735 = vmatmul.mubr.f32.gmra.mrb[22].mxu1 %v12885_v63 }
 0x4f5   :  { %5740 = vmatprep.mubr.f32.mxu1 %v11127_v5 }
 0x4f6   :  { %5130 = vmatmul.mubr.f32.gmra.mrb[24].mxu0 %v12896_v6 }
 0x4f7   :  { %5204 = vmatprep.mubr.f32.mxu0 %v11127_v5 }
 0x4f8   :  { %5742 = vmatmul.mubr.f32.gmra.mrb[24].mxu1 %v12896_v6 }
 0x4f9   :  { %5816 = vmatprep.mubr.f32.mxu1 %v11127_v5 }
 0x4fa   :  { %5207 = vmatmul.mubr.f32.vlgmr.msra.gmra.mrb[18].mxu0 %v12871_v46 }
 0x4fb   :  { %5240 = vmatpush1.msra.mxu0 %v12900_v45  ;;  %5212 = vmatprep.mubr.f32.mxu0 %v11127_v5 }
 0x4fc   :  { %5819 = vmatmul.mubr.f32.vlgmr.msra.gmra.mrb[18].mxu1 %v12871_v46  ;;  %5343 = vmatprep.subr.mxu0 %v5035_v54 }
 0x4fd   :  { %5852 = vmatpush1.msra.mxu1 %v12917_v14  ;;  %5824 = vmatprep.mubr.f32.mxu1 %v11127_v5 }
 0x4fe   :  { %5955 = vmatprep.subr.mxu1 %v5647_v16  ;;  %5215 = vmatmul.mubr.f32.gmra.mrb[20].mxu0 %v12883_v4 }
 0x4ff   :  { %5220 = vmatprep.mubr.f32.mxu0 %v11127_v5 }
 0x500   :  { %5827 = vmatmul.mubr.f32.gmra.mrb[20].mxu1 %v12883_v4  ;;  %v13082_v4 = vand.u32 4294901760, %v6200_v27 }
 0x501   :  { %5832 = vmatprep.mubr.f32.mxu1 %v11127_v5 }
 0x502   :  { %5223 = vmatmul.mubr.f32.gmra.mrb[22].mxu0 %v12894_v55  ;;  %v13094_v52 = vsub.f32 %v6200_v27, %v13082_v4 }
 0x503   :  { %5228 = vmatprep.mubr.f32.mxu0 %v11127_v5 }
 0x504   :  { %5835 = vmatmul.mubr.f32.gmra.mrb[22].mxu1 %v12894_v55  ;;  %v13105_v13 = vand.u32 4294901760, %v13094_v52 }
 0x505   :  { %5840 = vmatprep.mubr.f32.mxu1 %v11127_v5 }
 0x506   :  { %5231 = vmatmul.mubr.f32.gmra.mrb[24].mxu0 %v12911_v34  ;;  %14418 = vst [vmem:[#allocation11_spill] sm:$0xff] %v13105_v13  ;;  %v6311_v62 = vsub.f32 %v13094_v52, %v13105_v13 }
 0x507   :  { %5303 = vmatprep.mubr.f32.mxu0 %v11127_v5 }
 0x508   :  { %5843 = vmatmul.mubr.f32.gmra.mrb[24].mxu1 %v12911_v34 }
 0x509   :  { %5915 = vmatprep.mubr.f32.mxu1 %v11127_v5 }
 0x50a   :  { %5307 = vmatmul.mubr.f32.vlgmr.msra.gmra.mrb[18].mxu0 %v12880_v18 }
 0x50b   :  { %5347 = vmatpush1.msra.mxu0 %v5041_v21  ;;  %5312 = vmatprep.mubr.f32.mxu0 %v11127_v5 }
 0x50c   :  { %5919 = vmatmul.mubr.f32.vlgmr.msra.gmra.mrb[18].mxu1 %v12880_v18  ;;  %5440 = vmatprep.subr.mxu0 %v12904_v56 }
 0x50d   :  { %5959 = vmatpush1.msra.mxu1 %v5653_v36  ;;  %5924 = vmatprep.mubr.f32.mxu1 %v11127_v5 }
 0x50e   :  { %6052 = vmatprep.subr.mxu1 %v12920_v58  ;;  %5316 = vmatmul.mubr.f32.gmra.mrb[20].mxu0 %v12891_v24  ;;  %v13102_v58 = vand.u32 4294901760, %v13091_v40 }
 0x50f   :  { %5321 = vmatprep.mubr.f32.mxu0 %v11127_v5 }
 0x510   :  { %5928 = vmatmul.mubr.f32.gmra.mrb[20].mxu1 %v12891_v24  ;;  %v4884_v24 = vpop.permute.xlu0 %4883  ;;  %v6300_v59 = vsub.f32 %v13091_v40, %v13102_v58 }
 0x511   :  { %5933 = vmatprep.mubr.f32.mxu1 %v11127_v5 }
 0x512   :  { %5325 = vmatmul.mubr.f32.gmra.mrb[22].mxu0 %v12908_v2 }
 0x513   :  { %5330 = vmatprep.mubr.f32.mxu0 %v11127_v5 }
 0x514   :  { %5937 = vmatmul.mubr.f32.gmra.mrb[22].mxu1 %v12908_v2  ;;  %v4894_v7 = vpop.permute.xlu0 %4893 }
 0x515   :  { %5942 = vmatprep.mubr.f32.mxu1 %v11127_v5 }
 0x516   :  { %5334 = vmatmul.mubr.f32.gmra.mrb[24].mxu0 %v12938_v50 }
 0x517   :  { %5410 = vmatprep.mubr.f32.mxu0 %v11127_v5 }
 0x518   :  { %5946 = vmatmul.mubr.f32.gmra.mrb[24].mxu1 %v12938_v50 }
 0x519   :  { %6022 = vmatprep.mubr.f32.mxu1 %v11127_v5 }
 0x51a   :  { %5412 = vmatmul.mubr.f32.vlgmr.msra.gmra.mrb[18].mxu0 %v12864_v11 }
 0x51b   :  { %5442 = vmatpush1.msra.mxu0 %v12900_v45  ;;  %5417 = vmatprep.mubr.f32.mxu0 %v11127_v5 }
 0x51c   :  { %6024 = vmatmul.mubr.f32.vlgmr.msra.gmra.mrb[18].mxu1 %v12864_v11 }
 0x51d   :  { %6054 = vmatpush1.msra.mxu1 %v12917_v14  ;;  %6029 = vmatprep.mubr.f32.mxu1 %v11127_v5  ;;  %v6278_v14 = vsub.f32 %v13078_v44, %v13088_v60 }
 0x51e   :  { %5419 = vmatmul.mubr.f32.gmra.mrb[20].mxu0 %v12873_v57 }
 0x51f   :  { %5424 = vmatprep.mubr.f32.mxu0 %v11127_v5  ;;  %v13109_v9 = vand.u32 4294901760, %v6278_v14 }
 0x520   :  { %6031 = vmatmul.mubr.f32.gmra.mrb[20].mxu1 %v12873_v57 }
 0x521   :  { %6036 = vmatprep.mubr.f32.mxu1 %v11127_v5 }
 0x522   :  { %5426 = vmatmul.mubr.f32.gmra.mrb[22].mxu0 %v12885_v63 }
 0x523   :  { %5431 = vmatprep.mubr.f32.mxu0 %v11127_v5 }
 0x524   :  { %6038 = vmatmul.mubr.f32.gmra.mrb[22].mxu1 %v12885_v63 }
 0x525   :  { %6043 = vmatprep.mubr.f32.mxu1 %v11127_v5 }
 0x526   :  { %5433 = vmatmul.mubr.f32.gmra.mrb[24].mxu0 %v12896_v6 }
 0x527   :  { %5505 = vmatprep.mubr.f32.mxu0 %v11127_v5 }
 0x528   :  { %6045 = vmatmul.mubr.f32.gmra.mrb[24].mxu1 %v12896_v6 }
 0x529   :  { %6117 = vmatprep.mubr.f32.mxu1 %v11127_v5 }
 0x52a   :  { %5507 = vmatmul.mubr.f32.vlgmr.msra.gmra.mrb[18].mxu0 %v12864_v11 }
 0x52b   :  { %5512 = vmatprep.mubr.f32.mxu0 %v11127_v5 }
 0x52c   :  { %6119 = vmatmul.mubr.f32.vlgmr.msra.gmra.mrb[18].mxu1 %v12864_v11  ;;  %v6163_v11 = vld [vmem:[%s13868_s1 + $0x70] sm:$0xff] }
 0x52d   :  { %6124 = vmatprep.mubr.f32.mxu1 %v11127_v5  ;;  %v6194_v15 = vsel %vm2359_vm1, %v6163_v11, 0 }
 0x52e   :  { %5514 = vmatmul.mubr.f32.gmra.mrb[20].mxu0 %v12873_v57  ;;  %v13074_v39 = vand.u32 4294901760, %v6194_v15 }
 0x52f   :  { %5519 = vmatprep.mubr.f32.mxu0 %v11127_v5 }
 0x530   :  { %6126 = vmatmul.mubr.f32.gmra.mrb[20].mxu1 %v12873_v57  ;;  %v13085_v53 = vsub.f32 %v6194_v15, %v13074_v39 }
 0x531   :  { %6131 = vmatprep.mubr.f32.mxu1 %v11127_v5 }
 0x532   :  { %5521 = vmatmul.mubr.f32.gmra.mrb[22].mxu0 %v12885_v63  ;;  %v13097_v56 = vand.u32 4294901760, %v13085_v53 }
 0x533   :  { %5526 = vmatprep.mubr.f32.mxu0 %v11127_v5 }
 0x534   :  { %6133 = vmatmul.mubr.f32.gmra.mrb[22].mxu1 %v12885_v63  ;;  %v6289_v23 = vsub.f32 %v13085_v53, %v13097_v56 }
 0x535   :  { %6138 = vmatprep.mubr.f32.mxu1 %v11127_v5 }
 0x536   :  { %5528 = vmatmul.mubr.f32.gmra.mrb[24].mxu0 %v12896_v6  ;;  %v13115_v19 = vand.u32 4294901760, %v6289_v23 }
 0x537   :  { %6274 = vmatprep.mubr.f32.mxu0 %v11127_v5 }
 0x538   :  { %6140 = vmatmul.mubr.f32.gmra.mrb[24].mxu1 %v12896_v6 }
 0x539   :  { %6964 = vmatprep.mubr.f32.mxu1 %v11127_v5 }
 0x5fd   :  { %v5508_v26 = vpop.f32.mrb[18].mxu0 }
 0x5fe   :  { %v10566_v46 = vadd.f32 %v5508_v26, %v4879_v8  ;;  %v5510_v57 = vpop.f32.mrb[19].mxu0 }
 0x5ff   :  { %v6120_v35 = vpop.f32.mrb[18].mxu1  ;;  %v10567_v18 = vadd.f32 %v5510_v57, %v4879_v8 }
 0x600   :  { %11062 = vtanh.f32 %v10566_v46  ;;  %v10574_v63 = vadd.f32 %v6120_v35, %v4879_v8  ;;  %v6122_v25 = vpop.f32.mrb[19].mxu1  ;;  %v13121_v46 = vand.u32 4294901760, %v6300_v59 }
 0x601   :  { %11064 = vtanh.f32 %v10567_v18  ;;  %v10575_v55 = vadd.f32 %v6122_v25, %v4879_v8  ;;  %v5515_v6 = vpop.f32.mrb[20].mxu0 }
 0x602   :  { %11066 = vtanh.f32 %v10574_v63  ;;  %v10568_v3 = vadd.f32 %v5515_v6, %v4884_v24  ;;  %v5517_v0 = vpop.f32.mrb[21].mxu0  ;;  %v13124_v63 = vand.u32 4294901760, %v6311_v62 }
 0x603   :  { %11068 = vtanh.f32 %v10575_v55  ;;  %v6127_v17 = vpop.f32.mrb[20].mxu1  ;;  %v10569_v45 = vadd.f32 %v5517_v0, %v4884_v24 }
 0x604   :  { %11070 = vtanh.f32 %v10568_v3  ;;  %v10576_v12 = vadd.f32 %v6127_v17, %v4884_v24  ;;  %v6129_v61 = vpop.f32.mrb[21].mxu1 }
 0x605   :  { %11072 = vtanh.f32 %v10569_v45  ;;  %v10577_v2 = vadd.f32 %v6129_v61, %v4884_v24  ;;  %v5522_v34 = vpop.f32.mrb[22].mxu0 }
 0x606   :  { %11074 = vtanh.f32 %v10576_v12  ;;  %v10570_v51 = vadd.f32 %v5522_v34, %v4889_v1  ;;  %v5524_v48 = vpop.f32.mrb[23].mxu0 }
 0x607   :  { %11076 = vtanh.f32 %v10577_v2  ;;  %v6134_v49 = vpop.f32.mrb[22].mxu1  ;;  %v10571_v29 = vadd.f32 %v5524_v48, %v4889_v1 }
 0x608   :  { %11078 = vtanh.f32 %v10570_v51  ;;  %v10578_v21 = vadd.f32 %v6134_v49, %v4889_v1  ;;  %v6136_v54 = vpop.f32.mrb[23].mxu1 }
 0x609   :  { %11080 = vtanh.f32 %v10571_v29  ;;  %v10579_v50 = vadd.f32 %v6136_v54, %v4889_v1  ;;  %v5529_v33 = vpop.f32.mrb[24].mxu0 }
 0x60a   :  { %v11063_v36 = vpop.eup %11062  ;;  %11082 = vtanh.f32 %v10578_v21  ;;  %v10572_v43 = vadd.f32 %v5529_v33, %v4894_v7  ;;  %v5531_v16 = vpop.f32.mrb[25].mxu0 }
 0x60b   :  { %v11065_v20 = vpop.eup %11064  ;;  %11084 = vtanh.f32 %v10579_v50  ;;  %v6141_v28 = vpop.f32.mrb[24].mxu1  ;;  %v10573_v47 = vadd.f32 %v5531_v16, %v4894_v7  ;;  %v6204_v31 = vand.u32 4294901760, %v11063_v36 }
 0x60c   :  { %v11067_v30 = vpop.eup %11066  ;;  %11086 = vtanh.f32 %v10572_v43  ;;  %v10580_v32 = vadd.f32 %v6141_v28, %v4894_v7  ;;  %v6143_v38 = vpop.f32.mrb[25].mxu1  ;;  %v6202_v11 = vand.u32 4294901760, %v11065_v20 }
 0x60d   :  { %v11069_v10 = vpop.eup %11068  ;;  %11088 = vtanh.f32 %v10573_v47  ;;  %v10581_v15 = vadd.f32 %v6143_v38, %v4894_v7  ;;  %v13117_v41 = vsub.f32 %v11063_v36, %v6204_v31  ;;  %v6894_v42 = vand.u32 4294901760, %v11067_v30 }
 0x60e   :  { %v11071_v27 = vpop.eup %11070  ;;  %11090 = vtanh.f32 %v10580_v32  ;;  %v13119_v8 = vsub.f32 %v11065_v20, %v6202_v11  ;;  %v6892_v26 = vand.u32 4294901760, %v11069_v10 }
 0x60f   :  { %v11073_v57 = vpop.eup %11072  ;;  %11092 = vtanh.f32 %v10581_v15  ;;  %v6208_v35 = vand.u32 4294901760, %v11071_v27  ;;  %v14106_v18 = vand.u32 4294901760, %v13117_v41  ;;  %v13128_v6 = vsub.f32 %v11067_v30, %v6894_v42 }
 0x610   :  { %v11075_v25 = vpop.eup %11074  ;;  %v6206_v24 = vand.u32 4294901760, %v11073_v57  ;;  %v13126_v55 = vsub.f32 %v11069_v10, %v6892_v26  ;;  %v14112_v3 = vand.u32 4294901760, %v13119_v8 }
 0x611   :  { %v11077_v0 = vpop.eup %11076  ;;  %v13131_v17 = vpack.c.bf16 %v6208_v35, %v6204_v31  ;;  %v13133_v45 = vsub.f32 %v11071_v27, %v6208_v35  ;;  %v6898_v12 = vand.u32 4294901760, %v11075_v25  ;;  %v13138_v61 = vsub.f32 %v13117_v41, %v14106_v18 }
 0x612   :  { %v11079_v1 = vpop.eup %11078  ;;  %v13140_v2 = vpack.c.bf16 %v6206_v24, %v6202_v11  ;;  %v13142_v34 = vsub.f32 %v11073_v57, %v6206_v24  ;;  %v6896_v51 = vand.u32 4294901760, %v11077_v0  ;;  %v6322_v48 = vsub.f32 %v13119_v8, %v14112_v3 }
 0x613   :  { %v11081_v14 = vpop.eup %11080  ;;  %v13147_v49 = vpack.c.bf16 %v6898_v12, %v6894_v42  ;;  %v13149_v29 = vsub.f32 %v11075_v25, %v6898_v12  ;;  %v6212_v21 = vand.u32 4294901760, %v11079_v1  ;;  %v14110_v54 = vand.u32 4294901760, %v13126_v55 }
 0x614   :  { %v11083_v23 = vpop.eup %11082  ;;  %10339 = vmatprep.subr.bf16.mxu0 %v13140_v2  ;;  %v13153_v7 = vpack.c.bf16 %v6896_v51, %v6892_v26  ;;  %v13155_v50 = vsub.f32 %v11077_v0, %v6896_v51  ;;  %v6210_v33 = vand.u32 4294901760, %v11081_v14  ;;  %v6323_v36 = vand.u32 4294901760, %v6322_v48 }
 0x615   :  { %v11085_v43 = vpop.eup %11084  ;;  %10341 = vmatpush1.bf16.msra.mxu0 %v13131_v17  ;;  %v13158_v16 = vsub.f32 %v11079_v1, %v6212_v21  ;;  %v6902_v59 = vand.u32 4294901760, %v11083_v23  ;;  %v14111_v20 = vand.u32 4294901760, %v13142_v34  ;;  %v7012_v28 = vsub.f32 %v13126_v55, %v14110_v54 }
 0x616   :  { %v11087_v47 = vpop.eup %11086  ;;  %10387 = vmatprep.subr.bf16.mxu1 %v13153_v7  ;;  %v13165_v31 = vsub.f32 %v11081_v14, %v6210_v33  ;;  %v6900_v62 = vand.u32 4294901760, %v11085_v43  ;;  %v14109_v30 = vand.u32 4294901760, %v13155_v50  ;;  %v6329_v32 = vand.u32 4294901760, %v13138_v61 }
 0x617   :  { %v11089_v38 = vpop.eup %11088  ;;  %10389 = vmatpush1.bf16.msra.mxu1 %v13147_v49  ;;  %v6216_v11 = vand.u32 4294901760, %v11087_v47  ;;  %v13170_v10 = vsub.f32 %v11083_v23, %v6902_v59  ;;  %v6334_v15 = vsub.f32 %v13142_v34, %v14111_v20  ;;  %v7013_v42 = vand.u32 4294901760, %v7012_v28 }
 0x618   :  { %v11091_v27 = vpop.eup %11090  ;;  %v6214_v26 = vand.u32 4294901760, %v11089_v38  ;;  %v13175_v57 = vsub.f32 %v11085_v43, %v6900_v62  ;;  %v7024_v35 = vsub.f32 %v13155_v50, %v14109_v30  ;;  %v14108_v25 = vand.u32 4294901760, %v13133_v45 }
 0x619   :  { %v11093_v24 = vpop.eup %11092  ;;  %v13181_v0 = vpack.c.bf16 %v6216_v11, %v6212_v21  ;;  %v13183_v12 = vsub.f32 %v11087_v47, %v6216_v11  ;;  %v6906_v61 = vand.u32 4294901760, %v11091_v27  ;;  %v6335_v1 = vand.u32 4294901760, %v6334_v15 }
 0x61a   :  { %v13185_v51 = vpack.c.bf16 %v6214_v26, %v6210_v33  ;;  %v13187_v48 = vsub.f32 %v11089_v38, %v6214_v26  ;;  %v6904_v14 = vand.u32 4294901760, %v11093_v24  ;;  %v7025_v23 = vand.u32 4294901760, %v7024_v35 }
 0x61b   :  { %v13189_v43 = vpack.c.bf16 %v6906_v61, %v6902_v59  ;;  %v13191_v28 = vsub.f32 %v11091_v27, %v6906_v61  ;;  %v10346_v18 = vpack.c.bf16 %v6335_v1, %v6323_v36  ;;  %v6340_v21 = vsub.f32 %v13133_v45, %v14108_v25 }
 0x61c   :  { %10343 = vmatprep.subr.bf16.mxu0 %v13185_v51  ;;  %v13197_v47 = vpack.c.bf16 %v6904_v14, %v6900_v62  ;;  %v13199_v11 = vsub.f32 %v11093_v24, %v6904_v14  ;;  %v10394_v33 = vpack.c.bf16 %v7025_v23, %v7013_v42  ;;  %v14107_v38 = vand.u32 4294901760, %v13128_v6 }
 0x61d   :  { %10345 = vmatpush1.bf16.msra.mxu0 %v13181_v0  ;;  %v6341_v59 = vand.u32 4294901760, %v6340_v21  ;;  %v7029_v15 = vand.u32 4294901760, %v13149_v29  ;;  %v6345_v36 = vand.u32 4294901760, %v13165_v31  ;;  %v6357_v27 = vand.u32 4294901760, %v13187_v48 }
 0x61e   :  { %10391 = vmatprep.subr.bf16.mxu1 %v13197_v47  ;;  %10347 = vmatprep.subr.bf16.mxu0 %v10346_v18  ;;  %v7018_v62 = vsub.f32 %v13128_v6, %v14107_v38  ;;  %v7035_v42 = vand.u32 4294901760, %v13175_v57  ;;  %v7047_v26 = vand.u32 4294901760, %v13199_v11  ;;  %v6351_v35 = vand.u32 4294901760, %v13158_v16 }
 0x61f   :  { %10393 = vmatpush1.bf16.msra.mxu1 %v13189_v43  ;;  %v10348_v24 = vpack.c.bf16 %v6341_v59, %v6329_v32  ;;  %v7030_v61 = vsub.f32 %v13149_v29, %v7029_v15  ;;  %v6346_v1 = vsub.f32 %v13165_v31, %v6345_v36  ;;  %v6358_v14 = vsub.f32 %v13187_v48, %v6357_v27 }
 0x620   :  { %10395 = vmatprep.subr.bf16.mxu1 %v10394_v33  ;;  %6280 = vmatmul.mubr.f32.vlgmr.msra.gmra.mrb[26].mxu0 %v13109_v9  ;;  %v7019_v18 = vand.u32 4294901760, %v7018_v62  ;;  %v7036_v23 = vsub.f32 %v13175_v57, %v7035_v42  ;;  %v7048_v21 = vsub.f32 %v13199_v11, %v7047_v26  ;;  %v6352_v38 = vsub.f32 %v13158_v16, %v6351_v35 }
 0x621   :  { %10349 = vmatpush1.bf16.msra.mxu0 %v10348_v24  ;;  %v7031_v25 = vand.u32 4294901760, %v7030_v61  ;;  %6285 = vmatprep.mubr.f32.mxu0 %v11127_v5  ;;  %v6347_v32 = vand.u32 4294901760, %v6346_v1  ;;  %v6359_v59 = vand.u32 4294901760, %v6358_v14  ;;  %v6363_v30 = vand.u32 4294901760, %v13183_v12 }
 0x622   :  { %6970 = vmatmul.mubr.f32.vlgmr.msra.gmra.mrb[26].mxu1 %v13109_v9  ;;  %v7037_v33 = vand.u32 4294901760, %v7036_v23  ;;  %v7049_v54 = vand.u32 4294901760, %v7048_v21  ;;  %v6353_v20 = vand.u32 4294901760, %v6352_v38  ;;  %v7041_v62 = vand.u32 4294901760, %v13170_v10 }
 0x623   :  { %v10396_v3 = vpack.c.bf16 %v7031_v25, %v7019_v18  ;;  %6975 = vmatprep.mubr.f32.mxu1 %v11127_v5  ;;  %v10350_v13 = vpack.c.bf16 %v6359_v59, %v6347_v32  ;;  %v6364_v24 = vsub.f32 %v13183_v12, %v6363_v30  ;;  %v7053_v61 = vand.u32 4294901760, %v13191_v28 }
 0x624   :  { %6291 = vmatmul.mubr.f32.gmra.mrb[28].mxu0 %v13115_v19  ;;  %v10398_v1 = vpack.c.bf16 %v7049_v54, %v7037_v33  ;;  %v7042_v14 = vsub.f32 %v13170_v10, %v7041_v62  ;;  %v10354_v9 = vpack.c.bf16 %v13142_v34, %v13119_v8  ;;  %v10402_v38 = vpack.c.bf16 %v13155_v50, %v13126_v55 }
 0x625   :  { %10397 = vmatpush1.bf16.msra.mxu1 %v10396_v3  ;;  %10351 = vmatprep.subr.bf16.mxu0 %v10350_v13  ;;  %v6365_v25 = vand.u32 4294901760, %v6364_v24  ;;  %v7054_v18 = vsub.f32 %v13191_v28, %v7053_v61  ;;  %v10356_v23 = vpack.c.bf16 %v13133_v45, %v13117_v41  ;;  %v10404_v21 = vpack.c.bf16 %v13149_v29, %v13128_v6 }
 0x626   :  { %6981 = vmatmul.mubr.f32.gmra.mrb[28].mxu1 %v13115_v19  ;;  %10399 = vmatprep.subr.bf16.mxu1 %v10398_v1  ;;  %v7043_v54 = vand.u32 4294901760, %v7042_v14  ;;  %v10358_v32 = vpack.c.bf16 %v13187_v48, %v13165_v31  ;;  %v10406_v3 = vpack.c.bf16 %v13199_v11, %v13175_v57  ;;  %v10360_v13 = vpack.c.bf16 %v13183_v12, %v13158_v16 }
 0x627   :  { %v10352_v59 = vpack.c.bf16 %v6365_v25, %v6353_v20  ;;  %v7055_v33 = vand.u32 4294901760, %v7054_v18  ;;  %6296 = vmatprep.mubr.f32.mxu0 %v11127_v5  ;;  %6986 = vmatprep.mubr.f32.mxu1 %v11127_v5  ;;  %v10408_v19 = vpack.c.bf16 %v13191_v28, %v13170_v10  ;;  %v14419_v29 = vand.u32 4294901760, %v13119_v8 }
 0x628   :  { %v14420_v24 = vand.u32 4294901760, %v13142_v34  ;;  %6302 = vmatmul.mubr.f32.gmra.mrb[30].mxu0 %v13121_v46  ;;  %v14421_v57 = vand.u32 4294901760, %v13126_v55  ;;  %v14422_v16 = vand.u32 4294901760, %v13155_v50  ;;  %v14423_v12 = vand.u32 4294901760, %v13117_v41 }
 0x629   :  { %v14424_v48 = vand.u32 4294901760, %v13133_v45  ;;  %v14425_v10 = vand.u32 4294901760, %v13128_v6  ;;  %v13269_v8 = vpack.c.bf16 %v6357_v27, %v6345_v36  ;;  %10353 = vmatpush1.bf16.msra.mxu0 %v10352_v59  ;;  %v10400_v34 = vpack.c.bf16 %v7055_v33, %v7043_v54  ;;  %6307 = vmatprep.mubr.f32.mxu0 %v11127_v5  ;;  %v6178_v45 = vpop.permute.xlu0 %6177 }
 0x62a   :  { %v10370_v31 = vpack.c.bf16 %v14420_v24, %v14419_v29  ;;  %v10418_v20 = vpack.c.bf16 %v14422_v16, %v14421_v57  ;;  %v13272_v55 = vpack.c.bf16 %v7047_v26, %v7035_v42  ;;  %v13274_v50 = vpack.c.bf16 %v6363_v30, %v6351_v35  ;;  %10355 = vmatprep.subr.bf16.mxu0 %v10354_v9 }
 0x62b   :  { %v13263_v11 = vpack.c.bf16 %v14424_v48, %v14423_v12  ;;  %v13267_v28 = vpack.c.bf16 %v7029_v15, %v14425_v10  ;;  %6992 = vmatmul.mubr.f32.gmra.mrb[30].mxu1 %v13121_v46  ;;  %v13277_v41 = vpack.c.bf16 %v7053_v61, %v7041_v62 }
 0x62c   :  { %10401 = vmatpush1.bf16.msra.mxu1 %v10400_v34  ;;  %6997 = vmatprep.mubr.f32.mxu1 %v11127_v5 }
 0x62d   :  { %10403 = vmatprep.subr.bf16.mxu1 %v10402_v38  ;;  %6313 = vmatmul.mubr.f32.gmra.mrb[32].mxu0 %v13124_v63  ;;  %v6188_v18 = vpop.permute.xlu0 %6187 }
 0x62e   :  { %6423 = vmatprep.mubr.f32.mxu0 %v11127_v5 }
 0x62f   :  { %7003 = vmatmul.mubr.f32.gmra.mrb[32].mxu1 %v13124_v63 }
 0x630   :  { %7113 = vmatprep.mubr.f32.mxu1 %v11127_v5 }
 0x631   :  { %6425 = vmatmul.mubr.f32.vlgmr.msra.gmra.mrb[26].mxu0 %v13071_v37 }
 0x632   :  { %10357 = vmatpush1.bf16.msra.mxu0 %v10356_v23  ;;  %6430 = vmatprep.mubr.f32.mxu0 %v11127_v5 }
 0x633   :  { %7115 = vmatmul.mubr.f32.vlgmr.msra.gmra.mrb[26].mxu1 %v13071_v37  ;;  %10359 = vmatprep.subr.bf16.mxu0 %v10358_v32 }
 0x634   :  { %10405 = vmatpush1.bf16.msra.mxu1 %v10404_v21  ;;  %7120 = vmatprep.mubr.f32.mxu1 %v11127_v5 }
 0x635   :  { %10407 = vmatprep.subr.bf16.mxu1 %v10406_v3  ;;  %6432 = vmatmul.mubr.f32.gmra.mrb[28].mxu0 %v13074_v39 }
 0x636   :  { %10361 = vmatpush1.bf16.msra.mxu0 %v10360_v13  ;;  %6437 = vmatprep.mubr.f32.mxu0 %v11127_v5 }
 0x637   :  { %7122 = vmatmul.mubr.f32.gmra.mrb[28].mxu1 %v13074_v39  ;;  %10363 = vmatprep.subr.bf16.mxu0 %v13140_v2 }
 0x638   :  { %10409 = vmatpush1.bf16.msra.mxu1 %v10408_v19  ;;  %7127 = vmatprep.mubr.f32.mxu1 %v11127_v5 }
 0x639   :  { %10411 = vmatprep.subr.bf16.mxu1 %v13153_v7  ;;  %6439 = vmatmul.mubr.f32.gmra.mrb[30].mxu0 %v13080_v22 }
 0x63a   :  { %6444 = vmatprep.mubr.f32.mxu0 %v11127_v5 }
 0x63b   :  { %7129 = vmatmul.mubr.f32.gmra.mrb[30].mxu1 %v13080_v22 }
 0x63c   :  { %7134 = vmatprep.mubr.f32.mxu1 %v11127_v5 }
 0x63d   :  { %6446 = vmatmul.mubr.f32.gmra.mrb[32].mxu0 %v13082_v4 }
 0x63e   :  { %6532 = vmatprep.mubr.f32.mxu0 %v11127_v5 }
 0x63f   :  { %7136 = vmatmul.mubr.f32.gmra.mrb[32].mxu1 %v13082_v4 }
 0x640   :  { %7222 = vmatprep.mubr.f32.mxu1 %v11127_v5 }
 0x641   :  { %6535 = vmatmul.mubr.f32.vlgmr.msra.gmra.mrb[26].mxu0 %v13078_v44 }
 0x642   :  { %10365 = vmatpush1.bf16.msra.mxu0 %v13131_v17  ;;  %6540 = vmatprep.mubr.f32.mxu0 %v11127_v5 }
 0x643   :  { %7225 = vmatmul.mubr.f32.vlgmr.msra.gmra.mrb[26].mxu1 %v13078_v44  ;;  %10367 = vmatprep.subr.bf16.mxu0 %v13185_v51  ;;  %v14426_v44 = vld [vmem:[#allocation11_spill] sm:$0xff] }
 0x644   :  { %10413 = vmatpush1.bf16.msra.mxu1 %v13147_v49  ;;  %7230 = vmatprep.mubr.f32.mxu1 %v11127_v5 }
 0x645   :  { %10415 = vmatprep.subr.bf16.mxu1 %v13197_v47  ;;  %6543 = vmatmul.mubr.f32.gmra.mrb[28].mxu0 %v13085_v53 }
 0x646   :  { %10369 = vmatpush1.bf16.msra.mxu0 %v13181_v0  ;;  %6548 = vmatprep.mubr.f32.mxu0 %v11127_v5 }
 0x647   :  { %7233 = vmatmul.mubr.f32.gmra.mrb[28].mxu1 %v13085_v53  ;;  %10371 = vmatprep.subr.bf16.mxu0 %v10370_v31 }
 0x648   :  { %10417 = vmatpush1.bf16.msra.mxu1 %v13189_v43  ;;  %7238 = vmatprep.mubr.f32.mxu1 %v11127_v5 }
 0x649   :  { %10419 = vmatprep.subr.bf16.mxu1 %v10418_v20  ;;  %6551 = vmatmul.mubr.f32.gmra.mrb[30].mxu0 %v13091_v40 }
 0x64a   :  { %6556 = vmatprep.mubr.f32.mxu0 %v11127_v5 }
 0x64b   :  { %7241 = vmatmul.mubr.f32.gmra.mrb[30].mxu1 %v13091_v40 }
 0x64c   :  { %7246 = vmatprep.mubr.f32.mxu1 %v11127_v5 }
 0x64d   :  { %6559 = vmatmul.mubr.f32.gmra.mrb[32].mxu0 %v13094_v52 }
 0x64e   :  { %6637 = vmatprep.mubr.f32.mxu0 %v11127_v5 }
 0x64f   :  { %7249 = vmatmul.mubr.f32.gmra.mrb[32].mxu1 %v13094_v52 }
 0x650   :  { %7327 = vmatprep.mubr.f32.mxu1 %v11127_v5 }
 0x651   :  { %6641 = vmatmul.mubr.f32.vlgmr.msra.gmra.mrb[26].mxu0 %v13088_v60 }
 0x652   :  { %10373 = vmatpush1.bf16.msra.mxu0 %v13263_v11  ;;  %6646 = vmatprep.mubr.f32.mxu0 %v11127_v5 }
 0x653   :  { %7331 = vmatmul.mubr.f32.vlgmr.msra.gmra.mrb[26].mxu1 %v13088_v60  ;;  %10375 = vmatprep.subr.bf16.mxu0 %v13269_v8  ;;  %v6173_v60 = vpop.permute.xlu1 %6172 }
 0x654   :  { %10421 = vmatpush1.bf16.msra.mxu1 %v13267_v28  ;;  %7336 = vmatprep.mubr.f32.mxu1 %v11127_v5 }
 0x655   :  { %10423 = vmatprep.subr.bf16.mxu1 %v13272_v55  ;;  %6650 = vmatmul.mubr.f32.gmra.mrb[28].mxu0 %v13097_v56 }
 0x656   :  { %10377 = vmatpush1.bf16.msra.mxu0 %v13274_v50  ;;  %6655 = vmatprep.mubr.f32.mxu0 %v11127_v5 }
 0x657   :  { %7340 = vmatmul.mubr.f32.gmra.mrb[28].mxu1 %v13097_v56  ;;  %10379 = vmatprep.subr.bf16.mxu0 %v13140_v2  ;;  %v6183_v27 = vpop.permute.xlu1 %6182 }
 0x658   :  { %10425 = vmatpush1.bf16.msra.mxu1 %v13277_v41  ;;  %7345 = vmatprep.mubr.f32.mxu1 %v11127_v5 }
 0x659   :  { %10427 = vmatprep.subr.bf16.mxu1 %v13153_v7  ;;  %6659 = vmatmul.mubr.f32.gmra.mrb[30].mxu0 %v13102_v58 }
 0x65a   :  { %6664 = vmatprep.mubr.f32.mxu0 %v11127_v5 }
 0x65b   :  { %7349 = vmatmul.mubr.f32.gmra.mrb[30].mxu1 %v13102_v58 }
 0x65c   :  { %7354 = vmatprep.mubr.f32.mxu1 %v11127_v5 }
 0x65d   :  { %6668 = vmatmul.mubr.f32.gmra.mrb[32].mxu0 %v14426_v44 }
 0x65e   :  { %6762 = vmatprep.mubr.f32.mxu0 %v11127_v5 }
 0x65f   :  { %7358 = vmatmul.mubr.f32.gmra.mrb[32].mxu1 %v14426_v44 }
 0x660   :  { %7452 = vmatprep.mubr.f32.mxu1 %v11127_v5 }
 0x661   :  { %6764 = vmatmul.mubr.f32.vlgmr.msra.gmra.mrb[26].mxu0 %v13071_v37 }
 0x662   :  { %10381 = vmatpush1.bf16.msra.mxu0 %v13131_v17  ;;  %6769 = vmatprep.mubr.f32.mxu0 %v11127_v5 }
 0x663   :  { %7454 = vmatmul.mubr.f32.vlgmr.msra.gmra.mrb[26].mxu1 %v13071_v37  ;;  %10383 = vmatprep.subr.bf16.mxu0 %v13185_v51 }
 0x664   :  { %10429 = vmatpush1.bf16.msra.mxu1 %v13147_v49  ;;  %7459 = vmatprep.mubr.f32.mxu1 %v11127_v5 }
 0x665   :  { %10431 = vmatprep.subr.bf16.mxu1 %v13197_v47  ;;  %6771 = vmatmul.mubr.f32.gmra.mrb[28].mxu0 %v13074_v39 }
 0x666   :  { %10385 = vmatpush1.bf16.msra.mxu0 %v13181_v0  ;;  %6776 = vmatprep.mubr.f32.mxu0 %v11127_v5 }
 0x667   :  { %7461 = vmatmul.mubr.f32.gmra.mrb[28].mxu1 %v13074_v39 }
 0x668   :  { %10433 = vmatpush1.bf16.msra.mxu1 %v13189_v43  ;;  %7466 = vmatprep.mubr.f32.mxu1 %v11127_v5 }
 0x669   :  { %6778 = vmatmul.mubr.f32.gmra.mrb[30].mxu0 %v13080_v22 }
 0x66a   :  { %6783 = vmatprep.mubr.f32.mxu0 %v11127_v5 }
 0x66b   :  { %7468 = vmatmul.mubr.f32.gmra.mrb[30].mxu1 %v13080_v22 }
 0x66c   :  { %7473 = vmatprep.mubr.f32.mxu1 %v11127_v5 }
 0x66d   :  { %6785 = vmatmul.mubr.f32.gmra.mrb[32].mxu0 %v13082_v4 }
 0x66e   :  { %6863 = vmatprep.mubr.f32.mxu0 %v11127_v5 }
 0x66f   :  { %7475 = vmatmul.mubr.f32.gmra.mrb[32].mxu1 %v13082_v4 }
 0x670   :  { %7553 = vmatprep.mubr.f32.mxu1 %v11127_v5 }
 0x671   :  { %6865 = vmatmul.mubr.f32.vlgmr.msra.gmra.mrb[26].mxu0 %v13071_v37 }
 0x672   :  { %6870 = vmatprep.mubr.f32.mxu0 %v11127_v5 }
 0x673   :  { %7555 = vmatmul.mubr.f32.vlgmr.msra.gmra.mrb[26].mxu1 %v13071_v37  ;;  %v7598_v37 = vld [vmem:[%s13868_s1 + $0x88] sm:$0xff] }
 0x674   :  { %7560 = vmatprep.mubr.f32.mxu1 %v11127_v5 }
 0x675   :  { %6872 = vmatmul.mubr.f32.gmra.mrb[28].mxu0 %v13074_v39 }
 0x676   :  { %6877 = vmatprep.mubr.f32.mxu0 %v11127_v5 }
 0x677   :  { %7562 = vmatmul.mubr.f32.gmra.mrb[28].mxu1 %v13074_v39  ;;  %v7599_v39 = vld [vmem:[%s13868_s1 + $0x90] sm:$0xff] }
 0x678   :  { %7567 = vmatprep.mubr.f32.mxu1 %v11127_v5  ;;  %v7616_v53 = vsel %vm2359_vm1, %v7599_v39, 0 }
 0x679   :  { %6879 = vmatmul.mubr.f32.gmra.mrb[30].mxu0 %v13080_v22  ;;  %v13396_v63 = vand.u32 4294901760, %v7616_v53 }
 0x67a   :  { %6884 = vmatprep.mubr.f32.mxu0 %v11127_v5 }
 0x67b   :  { %7569 = vmatmul.mubr.f32.gmra.mrb[30].mxu1 %v13080_v22  ;;  %v7613_v22 = vsel %vm2359_vm1, %v7598_v37, 0  ;;  %v13402_v47 = vsub.f32 %v7616_v53, %v13396_v63 }
 0x67c   :  { %7574 = vmatprep.mubr.f32.mxu1 %v11127_v5  ;;  %v13394_v58 = vand.u32 4294901760, %v7613_v22 }
 0x67d   :  { %6886 = vmatmul.mubr.f32.gmra.mrb[32].mxu0 %v13082_v4  ;;  %v13408_v9 = vand.u32 4294901760, %v13402_v47 }
 0x67e   :  { %7690 = vmatprep.mubr.f32.mxu0 %v11127_v5  ;;  %v13399_v0 = vsub.f32 %v7613_v22, %v13394_v58 }
 0x67f   :  { %7576 = vmatmul.mubr.f32.gmra.mrb[32].mxu1 %v13082_v4  ;;  %v7705_v24 = vsub.f32 %v13402_v47, %v13408_v9 }
 0x680   :  { %8282 = vmatprep.mubr.f32.mxu1 %v11127_v5  ;;  %v13405_v61 = vand.u32 4294901760, %v13399_v0 }
 0x681   :  { %v13421_v37 = vand.u32 4294901760, %v7705_v24 }
 0x682   :  { %v7694_v13 = vsub.f32 %v13399_v0, %v13405_v61 }
 0x684   :  { %v13418_v55 = vand.u32 4294901760, %v7694_v13 }
 0x744   :  { %v6866_v40 = vpop.f32.mrb[26].mxu0 }
 0x745   :  { %v10582_v52 = vadd.f32 %v6866_v40, %v6173_v60  ;;  %v6868_v56 = vpop.f32.mrb[27].mxu0 }
 0x746   :  { %v7556_v4 = vpop.f32.mrb[26].mxu1  ;;  %v10583_v46 = vadd.f32 %v6868_v56, %v6173_v60 }
 0x747   :  { %11094 = vtanh.f32 %v10582_v52  ;;  %v10590_v6 = vadd.f32 %v7556_v4, %v6173_v60  ;;  %v7558_v17 = vpop.f32.mrb[27].mxu1 }
 0x748   :  { %11096 = vtanh.f32 %v10583_v46  ;;  %v10591_v2 = vadd.f32 %v7558_v17, %v6173_v60  ;;  %v6873_v49 = vpop.f32.mrb[28].mxu0 }
 0x749   :  { %11098 = vtanh.f32 %v10590_v6  ;;  %v10584_v7 = vadd.f32 %v6873_v49, %v6178_v45  ;;  %v6875_v30 = vpop.f32.mrb[29].mxu0 }
 0x74a   :  { %11100 = vtanh.f32 %v10591_v2  ;;  %v7563_v51 = vpop.f32.mrb[28].mxu1  ;;  %v10585_v43 = vadd.f32 %v6875_v30, %v6178_v45 }
 0x74b   :  { %11102 = vtanh.f32 %v10584_v7  ;;  %v10592_v15 = vadd.f32 %v7563_v51, %v6178_v45  ;;  %v7565_v36 = vpop.f32.mrb[29].mxu1 }
 0x74c   :  { %11104 = vtanh.f32 %v10585_v43  ;;  %v10593_v42 = vadd.f32 %v7565_v36, %v6178_v45  ;;  %v6880_v26 = vpop.f32.mrb[30].mxu0 }
 0x74d   :  { %11106 = vtanh.f32 %v10592_v15  ;;  %v10586_v35 = vadd.f32 %v6880_v26, %v6183_v27  ;;  %v6882_v62 = vpop.f32.mrb[31].mxu0 }
 0x74e   :  { %11108 = vtanh.f32 %v10593_v42  ;;  %v7570_v1 = vpop.f32.mrb[30].mxu1  ;;  %v10587_v14 = vadd.f32 %v6882_v62, %v6183_v27 }
 0x74f   :  { %11110 = vtanh.f32 %v10586_v35  ;;  %v10594_v38 = vadd.f32 %v7570_v1, %v6183_v27  ;;  %v7572_v25 = vpop.f32.mrb[31].mxu1 }
 0x750   :  { %11112 = vtanh.f32 %v10587_v14  ;;  %v10595_v23 = vadd.f32 %v7572_v25, %v6183_v27  ;;  %v6887_v21 = vpop.f32.mrb[32].mxu0 }
 0x751   :  { %v11095_v54 = vpop.eup %11094  ;;  %11114 = vtanh.f32 %v10594_v38  ;;  %v10588_v32 = vadd.f32 %v6887_v21, %v6188_v18  ;;  %v6889_v3 = vpop.f32.mrb[33].mxu0 }
 0x752   :  { %v11097_v59 = vpop.eup %11096  ;;  %11116 = vtanh.f32 %v10595_v23  ;;  %v7577_v33 = vpop.f32.mrb[32].mxu1  ;;  %v10589_v19 = vadd.f32 %v6889_v3, %v6188_v18  ;;  %v7620_v29 = vand.u32 4294901760, %v11095_v54 }
 0x753   :  { %v11099_v31 = vpop.eup %11098  ;;  %11118 = vtanh.f32 %v10588_v32  ;;  %v10596_v57 = vadd.f32 %v7577_v33, %v6188_v18  ;;  %v7579_v16 = vpop.f32.mrb[33].mxu1  ;;  %v7618_v20 = vand.u32 4294901760, %v11097_v59 }
 0x754   :  { %v11101_v12 = vpop.eup %11100  ;;  %11120 = vtanh.f32 %v10589_v19  ;;  %v10597_v48 = vadd.f32 %v7579_v16, %v6188_v18  ;;  %v13414_v11 = vsub.f32 %v11095_v54, %v7620_v29  ;;  %v8212_v10 = vand.u32 4294901760, %v11099_v31 }
 0x755   :  { %v11103_v28 = vpop.eup %11102  ;;  %11122 = vtanh.f32 %v10596_v57  ;;  %v13416_v8 = vsub.f32 %v11097_v59, %v7618_v20  ;;  %v8210_v34 = vand.u32 4294901760, %v11101_v12 }
 0x756   :  { %v11105_v50 = vpop.eup %11104  ;;  %11124 = vtanh.f32 %v10597_v48  ;;  %v7624_v41 = vand.u32 4294901760, %v11103_v28  ;;  %v7721_v44 = vand.u32 4294901760, %v13414_v11  ;;  %v13425_v60 = vsub.f32 %v11099_v31, %v8212_v10 }
 0x757   :  { %v11107_v39 = vpop.eup %11106  ;;  %v7622_v22 = vand.u32 4294901760, %v11105_v50  ;;  %v13423_v53 = vsub.f32 %v11101_v12, %v8210_v34  ;;  %v7715_v40 = vand.u32 4294901760, %v13416_v8 }
 0x758   :  { %v11109_v52 = vpop.eup %11108  ;;  %v13428_v56 = vpack.c.bf16 %v7624_v41, %v7620_v29  ;;  %v13430_v4 = vsub.f32 %v11103_v28, %v7624_v41  ;;  %v8216_v46 = vand.u32 4294901760, %v11107_v39  ;;  %v13435_v6 = vsub.f32 %v13414_v11, %v7721_v44 }
 0x759   :  { %v11111_v17 = vpop.eup %11110  ;;  %v13437_v45 = vpack.c.bf16 %v7622_v22, %v7618_v20  ;;  %v13439_v2 = vsub.f32 %v11105_v50, %v7622_v22  ;;  %v8214_v49 = vand.u32 4294901760, %v11109_v52  ;;  %v7716_v7 = vsub.f32 %v13416_v8, %v7715_v40 }
 0x75a   :  { %v11113_v30 = vpop.eup %11112  ;;  %v13444_v51 = vpack.c.bf16 %v8216_v46, %v8212_v10  ;;  %v13446_v43 = vsub.f32 %v11107_v39, %v8216_v46  ;;  %v7628_v15 = vand.u32 4294901760, %v11111_v17  ;;  %v8307_v36 = vand.u32 4294901760, %v13423_v53 }
 0x75b   :  { %v11115_v27 = vpop.eup %11114  ;;  %10435 = vmatprep.subr.bf16.mxu0 %v13437_v45  ;;  %v13450_v42 = vpack.c.bf16 %v8214_v49, %v8210_v34  ;;  %v13452_v26 = vsub.f32 %v11109_v52, %v8214_v49  ;;  %v7626_v35 = vand.u32 4294901760, %v11113_v30  ;;  %v7717_v62 = vand.u32 4294901760, %v7716_v7 }
 0x75c   :  { %v11117_v1 = vpop.eup %11116  ;;  %10437 = vmatpush1.bf16.msra.mxu0 %v13428_v56  ;;  %v13455_v14 = vsub.f32 %v11111_v17, %v7628_v15  ;;  %v8220_v38 = vand.u32 4294901760, %v11115_v27  ;;  %v7727_v25 = vand.u32 4294901760, %v13439_v2  ;;  %v8308_v18 = vsub.f32 %v13423_v53, %v8307_v36 }
 0x75d   :  { %v11119_v23 = vpop.eup %11118  ;;  %10483 = vmatprep.subr.bf16.mxu1 %v13450_v42  ;;  %v13462_v21 = vsub.f32 %v11113_v30, %v7626_v35  ;;  %v8218_v54 = vand.u32 4294901760, %v11117_v1  ;;  %v8319_v32 = vand.u32 4294901760, %v13452_v26  ;;  %v7723_v3 = vand.u32 4294901760, %v13435_v6 }
 0x75e   :  { %v11121_v13 = vpop.eup %11120  ;;  %10485 = vmatpush1.bf16.msra.mxu1 %v13444_v51  ;;  %v7632_v59 = vand.u32 4294901760, %v11119_v23  ;;  %v13467_v33 = vsub.f32 %v11115_v27, %v8220_v38  ;;  %v7728_v19 = vsub.f32 %v13439_v2, %v7727_v25  ;;  %v8309_v29 = vand.u32 4294901760, %v8308_v18 }
 0x75f   :  { %v11123_v24 = vpop.eup %11122  ;;  %v7630_v31 = vand.u32 4294901760, %v11121_v13  ;;  %v13472_v57 = vsub.f32 %v11117_v1, %v8218_v54  ;;  %v8320_v16 = vsub.f32 %v13452_v26, %v8319_v32  ;;  %v7733_v20 = vand.u32 4294901760, %v13430_v4 }
 0x760   :  { %v11125_v12 = vpop.eup %11124  ;;  %v13478_v48 = vpack.c.bf16 %v7632_v59, %v7628_v15  ;;  %v13480_v10 = vsub.f32 %v11119_v23, %v7632_v59  ;;  %v8224_v28 = vand.u32 4294901760, %v11123_v24  ;;  %v7729_v34 = vand.u32 4294901760, %v7728_v19 }
 0x761   :  { %v13482_v50 = vpack.c.bf16 %v7630_v31, %v7626_v35  ;;  %v13484_v41 = vsub.f32 %v11121_v13, %v7630_v31  ;;  %v8222_v39 = vand.u32 4294901760, %v11125_v12  ;;  %v8321_v22 = vand.u32 4294901760, %v8320_v16 }
 0x762   :  { %v13486_v52 = vpack.c.bf16 %v8224_v28, %v8220_v38  ;;  %v13488_v46 = vsub.f32 %v11123_v24, %v8224_v28  ;;  %v10442_v6 = vpack.c.bf16 %v7729_v34, %v7717_v62  ;;  %v7734_v17 = vsub.f32 %v13430_v4, %v7733_v20 }
 0x763   :  { %10439 = vmatprep.subr.bf16.mxu0 %v13482_v50  ;;  %v13494_v49 = vpack.c.bf16 %v8222_v39, %v8218_v54  ;;  %v13496_v7 = vsub.f32 %v11125_v12, %v8222_v39  ;;  %v10490_v30 = vpack.c.bf16 %v8321_v22, %v8309_v29  ;;  %v8313_v15 = vand.u32 4294901760, %v13425_v60 }
 0x764   :  { %10441 = vmatpush1.bf16.msra.mxu0 %v13478_v48  ;;  %v7735_v27 = vand.u32 4294901760, %v7734_v17  ;;  %v8325_v35 = vand.u32 4294901760, %v13446_v43  ;;  %v7739_v62 = vand.u32 4294901760, %v13462_v21  ;;  %v7751_v1 = vand.u32 4294901760, %v13484_v41 }
 0x765   :  { %10487 = vmatprep.subr.bf16.mxu1 %v13494_v49  ;;  %10443 = vmatprep.subr.bf16.mxu0 %v10442_v6  ;;  %v8314_v38 = vsub.f32 %v13425_v60, %v8313_v15  ;;  %v8331_v18 = vand.u32 4294901760, %v13472_v57  ;;  %v8343_v23 = vand.u32 4294901760, %v13496_v7  ;;  %v7745_v54 = vand.u32 4294901760, %v13455_v14 }
 0x766   :  { %10489 = vmatpush1.bf16.msra.mxu1 %v13486_v52  ;;  %v10444_v13 = vpack.c.bf16 %v7735_v27, %v7723_v3  ;;  %v8326_v59 = vsub.f32 %v13446_v43, %v8325_v35  ;;  %v7740_v19 = vsub.f32 %v13462_v21, %v7739_v62  ;;  %v7752_v29 = vsub.f32 %v13484_v41, %v7751_v1 }
 0x767   :  { %10491 = vmatprep.subr.bf16.mxu1 %v10490_v30  ;;  %7696 = vmatmul.mubr.f32.vlgmr.msra.gmra.mrb[34].mxu0 %v13418_v55  ;;  %v8315_v24 = vand.u32 4294901760, %v8314_v38  ;;  %v8332_v31 = vsub.f32 %v13472_v57, %v8331_v18  ;;  %v8344_v16 = vsub.f32 %v13496_v7, %v8343_v23  ;;  %v7746_v12 = vsub.f32 %v13455_v14, %v7745_v54 }
 0x768   :  { %10445 = vmatpush1.bf16.msra.mxu0 %v10444_v13  ;;  %v8327_v28 = vand.u32 4294901760, %v8326_v59  ;;  %7701 = vmatprep.mubr.f32.mxu0 %v11127_v5  ;;  %v7741_v3 = vand.u32 4294901760, %v7740_v19  ;;  %v7753_v34 = vand.u32 4294901760, %v7752_v29  ;;  %v7757_v39 = vand.u32 4294901760, %v13480_v10 }
 0x769   :  { %8288 = vmatmul.mubr.f32.vlgmr.msra.gmra.mrb[34].mxu1 %v13418_v55  ;;  %v8333_v22 = vand.u32 4294901760, %v8332_v31  ;;  %v8345_v6 = vand.u32 4294901760, %v8344_v16  ;;  %v7747_v17 = vand.u32 4294901760, %v7746_v12  ;;  %v8337_v30 = vand.u32 4294901760, %v13467_v33 }
 0x76a   :  { %v10492_v27 = vpack.c.bf16 %v8327_v28, %v8315_v24  ;;  %8293 = vmatprep.mubr.f32.mxu1 %v11127_v5  ;;  %v10446_v38 = vpack.c.bf16 %v7753_v34, %v7741_v3  ;;  %v7758_v13 = vsub.f32 %v13480_v10, %v7757_v39  ;;  %v8349_v59 = vand.u32 4294901760, %v13488_v46 }
 0x76b   :  { %7707 = vmatmul.mubr.f32.gmra.mrb[36].mxu0 %v13421_v37  ;;  %v10494_v19 = vpack.c.bf16 %v8345_v6, %v8333_v22  ;;  %v8338_v29 = vsub.f32 %v13467_v33, %v8337_v30  ;;  %v10450_v55 = vpack.c.bf16 %v13439_v2, %v13416_v8  ;;  %v10498_v31 = vpack.c.bf16 %v13452_v26, %v13423_v53 }
 0x76c   :  { %10493 = vmatpush1.bf16.msra.mxu1 %v10492_v27  ;;  %10447 = vmatprep.subr.bf16.mxu0 %v10446_v38  ;;  %v7759_v24 = vand.u32 4294901760, %v7758_v13  ;;  %v8350_v16 = vsub.f32 %v13488_v46, %v8349_v59  ;;  %v10452_v12 = vpack.c.bf16 %v13430_v4, %v13414_v11  ;;  %v10500_v28 = vpack.c.bf16 %v13446_v43, %v13425_v60  ;;  %v7610_v60 = vpop.permute.xlu0 %7609 }
 0x76d   :  { %8299 = vmatmul.mubr.f32.gmra.mrb[36].mxu1 %v13421_v37  ;;  %10495 = vmatprep.subr.bf16.mxu1 %v10494_v19  ;;  %v8339_v3 = vand.u32 4294901760, %v8338_v29  ;;  %v10454_v34 = vpack.c.bf16 %v13484_v41, %v13462_v21  ;;  %v10502_v22 = vpack.c.bf16 %v13496_v7, %v13472_v57  ;;  %v10456_v6 = vpack.c.bf16 %v13480_v10, %v13455_v14 }
 0x76e   :  { %v10448_v27 = vpack.c.bf16 %v7759_v24, %v7747_v17  ;;  %v8351_v38 = vand.u32 4294901760, %v8350_v16  ;;  %7817 = vmatprep.mubr.f32.mxu0 %v11127_v5  ;;  %8409 = vmatprep.mubr.f32.mxu1 %v11127_v5  ;;  %v10504_v37 = vpack.c.bf16 %v13488_v46, %v13467_v33  ;;  %v10466_v43 = vpack.c.bf16 %v7727_v25, %v7715_v40 }
 0x76f   :  { %v10514_v21 = vpack.c.bf16 %v8319_v32, %v8307_v36  ;;  %v10468_v14 = vpack.c.bf16 %v7733_v20, %v7721_v44  ;;  %v10516_v57 = vpack.c.bf16 %v8325_v35, %v8313_v15  ;;  %v10470_v10 = vpack.c.bf16 %v7751_v1, %v7739_v62 }
 0x770   :  { %10449 = vmatpush1.bf16.msra.mxu0 %v10448_v27  ;;  %v10496_v33 = vpack.c.bf16 %v8351_v38, %v8339_v3  ;;  %v10518_v8 = vpack.c.bf16 %v8343_v23, %v8331_v18  ;;  %v10472_v41 = vpack.c.bf16 %v7757_v39, %v7745_v54  ;;  %v10520_v2 = vpack.c.bf16 %v8349_v59, %v8337_v30 }
 0x771   :  { %10451 = vmatprep.subr.bf16.mxu0 %v10450_v55 }
 0x772   :  { %10497 = vmatpush1.bf16.msra.mxu1 %v10496_v33 }
 0x773   :  { %10499 = vmatprep.subr.bf16.mxu1 %v10498_v31  ;;  %7819 = vmatmul.mubr.f32.vlgmr.msra.gmra.mrb[34].mxu0 %v13394_v58 }
 0x774   :  { %10453 = vmatpush1.bf16.msra.mxu0 %v10452_v12  ;;  %7824 = vmatprep.mubr.f32.mxu0 %v11127_v5 }
 0x775   :  { %8411 = vmatmul.mubr.f32.vlgmr.msra.gmra.mrb[34].mxu1 %v13394_v58  ;;  %10455 = vmatprep.subr.bf16.mxu0 %v10454_v34 }
 0x776   :  { %10501 = vmatpush1.bf16.msra.mxu1 %v10500_v28  ;;  %8416 = vmatprep.mubr.f32.mxu1 %v11127_v5 }
 0x777   :  { %10503 = vmatprep.subr.bf16.mxu1 %v10502_v22  ;;  %7826 = vmatmul.mubr.f32.gmra.mrb[36].mxu0 %v13396_v63 }
 0x778   :  { %10457 = vmatpush1.bf16.msra.mxu0 %v10456_v6  ;;  %7912 = vmatprep.mubr.f32.mxu0 %v11127_v5 }
 0x779   :  { %8418 = vmatmul.mubr.f32.gmra.mrb[36].mxu1 %v13396_v63  ;;  %10459 = vmatprep.subr.bf16.mxu0 %v13437_v45 }
 0x77a   :  { %10505 = vmatpush1.bf16.msra.mxu1 %v10504_v37  ;;  %8504 = vmatprep.mubr.f32.mxu1 %v11127_v5 }
 0x77b   :  { %10507 = vmatprep.subr.bf16.mxu1 %v13450_v42  ;;  %7915 = vmatmul.mubr.f32.vlgmr.msra.gmra.mrb[34].mxu0 %v13399_v0 }
 0x77c   :  { %10461 = vmatpush1.bf16.msra.mxu0 %v13428_v56  ;;  %7920 = vmatprep.mubr.f32.mxu0 %v11127_v5 }
 0x77d   :  { %8507 = vmatmul.mubr.f32.vlgmr.msra.gmra.mrb[34].mxu1 %v13399_v0  ;;  %10463 = vmatprep.subr.bf16.mxu0 %v13482_v50  ;;  %v7605_v0 = vpop.permute.xlu1 %7604 }
 0x77e   :  { %10509 = vmatpush1.bf16.msra.mxu1 %v13444_v51  ;;  %8512 = vmatprep.mubr.f32.mxu1 %v11127_v5 }
 0x77f   :  { %10511 = vmatprep.subr.bf16.mxu1 %v13494_v49  ;;  %7923 = vmatmul.mubr.f32.gmra.mrb[36].mxu0 %v13402_v47 }
 0x780   :  { %10465 = vmatpush1.bf16.msra.mxu0 %v13478_v48  ;;  %8001 = vmatprep.mubr.f32.mxu0 %v11127_v5 }
 0x781   :  { %8515 = vmatmul.mubr.f32.gmra.mrb[36].mxu1 %v13402_v47  ;;  %10467 = vmatprep.subr.bf16.mxu0 %v10466_v43 }
 0x782   :  { %10513 = vmatpush1.bf16.msra.mxu1 %v13486_v52  ;;  %8593 = vmatprep.mubr.f32.mxu1 %v11127_v5 }
 0x783   :  { %10515 = vmatprep.subr.bf16.mxu1 %v10514_v21  ;;  %8005 = vmatmul.mubr.f32.vlgmr.msra.gmra.mrb[34].mxu0 %v13405_v61 }
 0x784   :  { %10469 = vmatpush1.bf16.msra.mxu0 %v10468_v14  ;;  %8010 = vmatprep.mubr.f32.mxu0 %v11127_v5 }
 0x785   :  { %8597 = vmatmul.mubr.f32.vlgmr.msra.gmra.mrb[34].mxu1 %v13405_v61  ;;  %10471 = vmatprep.subr.bf16.mxu0 %v10470_v10 }
 0x786   :  { %10517 = vmatpush1.bf16.msra.mxu1 %v10516_v57  ;;  %8602 = vmatprep.mubr.f32.mxu1 %v11127_v5 }
 0x787   :  { %10519 = vmatprep.subr.bf16.mxu1 %v10518_v8  ;;  %8014 = vmatmul.mubr.f32.gmra.mrb[36].mxu0 %v13408_v9 }
 0x788   :  { %10473 = vmatpush1.bf16.msra.mxu0 %v10472_v41  ;;  %8108 = vmatprep.mubr.f32.mxu0 %v11127_v5 }
 0x789   :  { %8606 = vmatmul.mubr.f32.gmra.mrb[36].mxu1 %v13408_v9  ;;  %10475 = vmatprep.subr.bf16.mxu0 %v13437_v45 }
 0x78a   :  { %10521 = vmatpush1.bf16.msra.mxu1 %v10520_v2  ;;  %8700 = vmatprep.mubr.f32.mxu1 %v11127_v5 }
 0x78b   :  { %10523 = vmatprep.subr.bf16.mxu1 %v13450_v42  ;;  %8110 = vmatmul.mubr.f32.vlgmr.msra.gmra.mrb[34].mxu0 %v13394_v58 }
 0x78c   :  { %10477 = vmatpush1.bf16.msra.mxu0 %v13428_v56  ;;  %8115 = vmatprep.mubr.f32.mxu0 %v11127_v5 }
 0x78d   :  { %8702 = vmatmul.mubr.f32.vlgmr.msra.gmra.mrb[34].mxu1 %v13394_v58  ;;  %10479 = vmatprep.subr.bf16.mxu0 %v13482_v50 }
 0x78e   :  { %10525 = vmatpush1.bf16.msra.mxu1 %v13444_v51  ;;  %8707 = vmatprep.mubr.f32.mxu1 %v11127_v5 }
 0x78f   :  { %10527 = vmatprep.subr.bf16.mxu1 %v13494_v49  ;;  %8117 = vmatmul.mubr.f32.gmra.mrb[36].mxu0 %v13396_v63 }
 0x790   :  { %10481 = vmatpush1.bf16.msra.mxu0 %v13478_v48  ;;  %8195 = vmatprep.mubr.f32.mxu0 %v11127_v5 }
 0x791   :  { %8709 = vmatmul.mubr.f32.gmra.mrb[36].mxu1 %v13396_v63 }
 0x792   :  { %10529 = vmatpush1.bf16.msra.mxu1 %v13486_v52  ;;  %8787 = vmatprep.mubr.f32.mxu1 %v11127_v5 }
 0x793   :  { %8197 = vmatmul.mubr.f32.vlgmr.msra.gmra.mrb[34].mxu0 %v13394_v58 }
 0x794   :  { %8202 = vmatprep.mubr.f32.mxu0 %v11127_v5 }
 0x795   :  { %8789 = vmatmul.mubr.f32.vlgmr.msra.gmra.mrb[34].mxu1 %v13394_v58 }
 0x796   :  { %8794 = vmatprep.mubr.f32.mxu1 %v11127_v5 }
 0x797   :  { %8204 = vmatmul.mubr.f32.gmra.mrb[36].mxu0 %v13396_v63 }
 0x799   :  { %8796 = vmatmul.mubr.f32.gmra.mrb[36].mxu1 %v13396_v63 }
 0x866   :  { %v8198_v47 = vpop.f32.mrb[34].mxu0 }
 0x867   :  { %v10598_v61 = vadd.f32 %v8198_v47, %v7605_v0  ;;  %v8200_v9 = vpop.f32.mrb[35].mxu0 }
 0x868   :  { %v8790_v11 = vpop.f32.mrb[34].mxu1  ;;  %v10599_v44 = vadd.f32 %v8200_v9, %v7605_v0 }
 0x869   :  { %v8792_v53 = vpop.f32.mrb[35].mxu1  ;;  %8802 = vxpose.xlu1.b32.start [1/2] (short) %v10598_v61, 128  ;;  %v10602_v63 = vadd.f32 %v8790_v11, %v7605_v0 }
 0x86a   :  { %v8205_v40 = vpop.f32.mrb[36].mxu0  ;;  %8834 = vxpose.xlu0.b32.start [1/2] (short) %v10599_v44, 128  ;;  %v10603_v51 = vadd.f32 %v8792_v53, %v7605_v0 }
 0x86b   :  { %v10600_v56 = vadd.f32 %v8205_v40, %v7610_v60  ;;  %v8207_v4 = vpop.f32.mrb[37].mxu0 }
 0x86c   :  { %v8797_v58 = vpop.f32.mrb[36].mxu1  ;;  %v10601_v45 = vadd.f32 %v8207_v4, %v7610_v60 }
 0x86d   :  { %v8799_v5 = vpop.f32.mrb[37].mxu1  ;;  %8803 = vxpose.xlu1.b32.end [2/2] (short) %v10600_v56, 128  ;;  %v10604_v42 = vadd.f32 %v8797_v58, %v7610_v60 }
 0x86e   :  { %8835 = vxpose.xlu0.b32.end [2/2] (short) %v10601_v45, 128  ;;  %v10605_v36 = vadd.f32 %v8799_v5, %v7610_v60 }
 0x8a6   :  { %8898 = vxpose.xlu1.b32.start [1/2] (short) %v10603_v51, 128 }
 0x8a7   :  { %8866 = vxpose.xlu0.b32.start [1/2] (short) %v10602_v63, 128 }
 0x8aa   :  { %8899 = vxpose.xlu1.b32.end [2/2] (short) %v10605_v36, 128 }
 0x8ab   :  { %8867 = vxpose.xlu0.b32.end [2/2] (short) %v10604_v42, 128 }
 0x8e9   :  { %v8818_v26 = vpop.trf.xlu1 }
 0x8ea   :  { %v8850_v25 = vpop.trf.xlu0  ;;  %8930 = vst.msk [vmem:[#allocation2] sm:$0xff] %vm106_vm0, %v8818_v26 }
 0x8eb   :  { %8946 = vst.msk [vmem:[#allocation2 + $0x80] sm:$0xff] %vm106_vm0, %v8850_v25 }
 0x8ed   :  { %v8819_v32 = vpop.trf.xlu1 }
 0x8ee   :  { %v8851_v20 = vpop.trf.xlu0  ;;  %8931 = vst.msk [vmem:[#allocation2 + $0x8] sm:$0xff] %vm106_vm0, %v8819_v32 }
 0x8ef   :  { %8947 = vst.msk [vmem:[#allocation2 + $0x88] sm:$0xff] %vm106_vm0, %v8851_v20 }
 0x8f1   :  { %v9147_v48 = vld [vmem:[#allocation2] sm:$0xff]  ;;  %v8820_v50 = vpop.trf.xlu1 }
 0x8f2   :  { %v9179_v52 = vld [vmem:[#allocation2 + $0x80] sm:$0xff]  ;;  %9148 = vst [vmem:[%s13870_s3] sm:$0xff] %v9147_v48  ;;  %v8852_v46 = vpop.trf.xlu0  ;;  %8932 = vst.msk [vmem:[#allocation2 + $0x10] sm:$0xff] %vm106_vm0, %v8820_v50 }
 0x8f3   :  { %9180 = vst [vmem:[%s13870_s3 + $0x80] sm:$0xff] %v9179_v52  ;;  %8948 = vst.msk [vmem:[#allocation2 + $0x90] sm:$0xff] %vm106_vm0, %v8852_v46 }
 0x8f5   :  { %v9149_v49 = vld [vmem:[#allocation2 + $0x8] sm:$0xff]  ;;  %v8821_v7 = vpop.trf.xlu1 }
 0x8f6   :  { %v9181_v15 = vld [vmem:[#allocation2 + $0x88] sm:$0xff]  ;;  %9150 = vst [vmem:[%s13870_s3 + $0x8] sm:$0xff] %v9149_v49  ;;  %v8853_v35 = vpop.trf.xlu0  ;;  %8933 = vst.msk [vmem:[#allocation2 + $0x18] sm:$0xff] %vm106_vm0, %v8821_v7 }
 0x8f7   :  { %9182 = vst [vmem:[%s13870_s3 + $0x88] sm:$0xff] %v9181_v15  ;;  %8949 = vst.msk [vmem:[#allocation2 + $0x98] sm:$0xff] %vm106_vm0, %v8853_v35 }
 0x8f9   :  { %v9151_v62 = vld [vmem:[#allocation2 + $0x10] sm:$0xff]  ;;  %v8822_v1 = vpop.trf.xlu1 }
 0x8fa   :  { %v9183_v18 = vld [vmem:[#allocation2 + $0x90] sm:$0xff]  ;;  %9152 = vst [vmem:[%s13870_s3 + $0x10] sm:$0xff] %v9151_v62  ;;  %v8854_v23 = vpop.trf.xlu0  ;;  %8934 = vst.msk [vmem:[#allocation2 + $0x20] sm:$0xff] %vm106_vm0, %v8822_v1 }
 0x8fb   :  { %9184 = vst [vmem:[%s13870_s3 + $0x90] sm:$0xff] %v9183_v18  ;;  %8950 = vst.msk [vmem:[#allocation2 + $0xa0] sm:$0xff] %vm106_vm0, %v8854_v23 }
 0x8fd   :  { %v9153_v54 = vld [vmem:[#allocation2 + $0x18] sm:$0xff]  ;;  %v8823_v39 = vpop.trf.xlu1 }
 0x8fe   :  { %v9185_v17 = vld [vmem:[#allocation2 + $0x98] sm:$0xff]  ;;  %9154 = vst [vmem:[%s13870_s3 + $0x18] sm:$0xff] %v9153_v54  ;;  %v8855_v30 = vpop.trf.xlu0  ;;  %8935 = vst.msk [vmem:[#allocation2 + $0x28] sm:$0xff] %vm106_vm0, %v8823_v39 }
 0x8ff   :  { %9186 = vst [vmem:[%s13870_s3 + $0x98] sm:$0xff] %v9185_v17  ;;  %8951 = vst.msk [vmem:[#allocation2 + $0xa8] sm:$0xff] %vm106_vm0, %v8855_v30 }
 0x901   :  { %v9155_v13 = vld [vmem:[#allocation2 + $0x20] sm:$0xff]  ;;  %v8824_v59 = vpop.trf.xlu1 }
 0x902   :  { %v9187_v19 = vld [vmem:[#allocation2 + $0xa0] sm:$0xff]  ;;  %9156 = vst [vmem:[%s13870_s3 + $0x20] sm:$0xff] %v9155_v13  ;;  %v8856_v29 = vpop.trf.xlu0  ;;  %8936 = vst.msk [vmem:[#allocation2 + $0x30] sm:$0xff] %vm106_vm0, %v8824_v59 }
 0x903   :  { %9188 = vst [vmem:[%s13870_s3 + $0xa0] sm:$0xff] %v9187_v19  ;;  %8952 = vst.msk [vmem:[#allocation2 + $0xb0] sm:$0xff] %vm106_vm0, %v8856_v29 }
 0x905   :  { %v9157_v55 = vld [vmem:[#allocation2 + $0x28] sm:$0xff]  ;;  %v8825_v31 = vpop.trf.xlu1 }
 0x906   :  { %v9189_v24 = vld [vmem:[#allocation2 + $0xa8] sm:$0xff]  ;;  %9158 = vst [vmem:[%s13870_s3 + $0x28] sm:$0xff] %v9157_v55  ;;  %v8857_v16 = vpop.trf.xlu0  ;;  %8937 = vst.msk [vmem:[#allocation2 + $0x38] sm:$0xff] %vm106_vm0, %v8825_v31 }
 0x907   :  { %9190 = vst [vmem:[%s13870_s3 + $0xa8] sm:$0xff] %v9189_v24  ;;  %8953 = vst.msk [vmem:[#allocation2 + $0xb8] sm:$0xff] %vm106_vm0, %v8857_v16 }
 0x909   :  { %v9159_v12 = vld [vmem:[#allocation2 + $0x30] sm:$0xff]  ;;  %v8826_v28 = vpop.trf.xlu1 }
 0x90a   :  { %v9191_v3 = vld [vmem:[#allocation2 + $0xb0] sm:$0xff]  ;;  %9160 = vst [vmem:[%s13870_s3 + $0x30] sm:$0xff] %v9159_v12  ;;  %v8858_v34 = vpop.trf.xlu0  ;;  %8938 = vst.msk [vmem:[#allocation2 + $0x40] sm:$0xff] %vm106_vm0, %v8826_v28 }
 0x90b   :  { %9192 = vst [vmem:[%s13870_s3 + $0xb0] sm:$0xff] %v9191_v3  ;;  %8954 = vst.msk [vmem:[#allocation2 + $0xc0] sm:$0xff] %vm106_vm0, %v8858_v34 }
 0x90d   :  { %v9161_v22 = vld [vmem:[#allocation2 + $0x38] sm:$0xff]  ;;  %v8827_v6 = vpop.trf.xlu1 }
 0x90e   :  { %v9193_v27 = vld [vmem:[#allocation2 + $0xb8] sm:$0xff]  ;;  %9162 = vst [vmem:[%s13870_s3 + $0x38] sm:$0xff] %v9161_v22  ;;  %v8859_v38 = vpop.trf.xlu0  ;;  %8939 = vst.msk [vmem:[#allocation2 + $0x48] sm:$0xff] %vm106_vm0, %v8827_v6 }
 0x90f   :  { %9194 = vst [vmem:[%s13870_s3 + $0xb8] sm:$0xff] %v9193_v27  ;;  %8955 = vst.msk [vmem:[#allocation2 + $0xc8] sm:$0xff] %vm106_vm0, %v8859_v38 }
 0x911   :  { %v9163_v37 = vld [vmem:[#allocation2 + $0x40] sm:$0xff]  ;;  %v8828_v43 = vpop.trf.xlu1 }
 0x912   :  { %v9195_v21 = vld [vmem:[#allocation2 + $0xc0] sm:$0xff]  ;;  %9164 = vst [vmem:[%s13870_s3 + $0x40] sm:$0xff] %v9163_v37  ;;  %v8860_v14 = vpop.trf.xlu0  ;;  %8940 = vst.msk [vmem:[#allocation2 + $0x50] sm:$0xff] %vm106_vm0, %v8828_v43 }
 0x913   :  { %9196 = vst [vmem:[%s13870_s3 + $0xc0] sm:$0xff] %v9195_v21  ;;  %8956 = vst.msk [vmem:[#allocation2 + $0xd0] sm:$0xff] %vm106_vm0, %v8860_v14 }
 0x915   :  { %v9165_v57 = vld [vmem:[#allocation2 + $0x48] sm:$0xff]  ;;  %v8829_v10 = vpop.trf.xlu1 }
 0x916   :  { %v9197_v33 = vld [vmem:[#allocation2 + $0xc8] sm:$0xff]  ;;  %9166 = vst [vmem:[%s13870_s3 + $0x48] sm:$0xff] %v9165_v57  ;;  %v8861_v8 = vpop.trf.xlu0  ;;  %8941 = vst.msk [vmem:[#allocation2 + $0x58] sm:$0xff] %vm106_vm0, %v8829_v10 }
 0x917   :  { %9198 = vst [vmem:[%s13870_s3 + $0xc8] sm:$0xff] %v9197_v33  ;;  %8957 = vst.msk [vmem:[#allocation2 + $0xd8] sm:$0xff] %vm106_vm0, %v8861_v8 }
 0x919   :  { %v9167_v41 = vld [vmem:[#allocation2 + $0x50] sm:$0xff]  ;;  %v8830_v2 = vpop.trf.xlu1 }
 0x91a   :  { %v9199_v0 = vld [vmem:[#allocation2 + $0xd0] sm:$0xff]  ;;  %9168 = vst [vmem:[%s13870_s3 + $0x50] sm:$0xff] %v9167_v41  ;;  %v8862_v47 = vpop.trf.xlu0  ;;  %8942 = vst.msk [vmem:[#allocation2 + $0x60] sm:$0xff] %vm106_vm0, %v8830_v2 }
 0x91b   :  { %9200 = vst [vmem:[%s13870_s3 + $0xd0] sm:$0xff] %v9199_v0  ;;  %8958 = vst.msk [vmem:[#allocation2 + $0xe0] sm:$0xff] %vm106_vm0, %v8862_v47 }
 0x91d   :  { %v9169_v61 = vld [vmem:[#allocation2 + $0x58] sm:$0xff]  ;;  %v8831_v9 = vpop.trf.xlu1 }
 0x91e   :  { %v9201_v11 = vld [vmem:[#allocation2 + $0xd8] sm:$0xff]  ;;  %9170 = vst [vmem:[%s13870_s3 + $0x58] sm:$0xff] %v9169_v61  ;;  %v8863_v44 = vpop.trf.xlu0  ;;  %8943 = vst.msk [vmem:[#allocation2 + $0x68] sm:$0xff] %vm106_vm0, %v8831_v9 }
 0x91f   :  { %9202 = vst [vmem:[%s13870_s3 + $0xd8] sm:$0xff] %v9201_v11  ;;  %8959 = vst.msk [vmem:[#allocation2 + $0xe8] sm:$0xff] %vm106_vm0, %v8863_v44 }
 0x921   :  { %v9171_v53 = vld [vmem:[#allocation2 + $0x60] sm:$0xff]  ;;  %v8832_v60 = vpop.trf.xlu1 }
 0x922   :  { %v9203_v40 = vld [vmem:[#allocation2 + $0xe0] sm:$0xff]  ;;  %9172 = vst [vmem:[%s13870_s3 + $0x60] sm:$0xff] %v9171_v53  ;;  %v8864_v56 = vpop.trf.xlu0  ;;  %8944 = vst.msk [vmem:[#allocation2 + $0x70] sm:$0xff] %vm106_vm0, %v8832_v60 }
 0x923   :  { %9204 = vst [vmem:[%s13870_s3 + $0xe0] sm:$0xff] %v9203_v40  ;;  %8960 = vst.msk [vmem:[#allocation2 + $0xf0] sm:$0xff] %vm106_vm0, %v8864_v56 }
 0x925   :  { %v9173_v4 = vld [vmem:[#allocation2 + $0x68] sm:$0xff]  ;;  %v8833_v58 = vpop.trf.xlu1 }
 0x926   :  { %v9205_v45 = vld [vmem:[#allocation2 + $0xe8] sm:$0xff]  ;;  %9174 = vst [vmem:[%s13870_s3 + $0x68] sm:$0xff] %v9173_v4  ;;  %v8865_v5 = vpop.trf.xlu0  ;;  %8945 = vst.msk [vmem:[#allocation2 + $0x78] sm:$0xff] %vm106_vm0, %v8833_v58 }
 0x927   :  { %9206 = vst [vmem:[%s13870_s3 + $0xe8] sm:$0xff] %v9205_v45  ;;  %8961 = vst.msk [vmem:[#allocation2 + $0xf8] sm:$0xff] %vm106_vm0, %v8865_v5 }
 0x929   :  { %v9175_v51 = vld [vmem:[#allocation2 + $0x70] sm:$0xff]  ;;  %v8914_v63 = vpop.trf.xlu1 }
 0x92a   :  { %v9207_v36 = vld [vmem:[#allocation2 + $0xf0] sm:$0xff]  ;;  %9176 = vst [vmem:[%s13870_s3 + $0x70] sm:$0xff] %v9175_v51  ;;  %v8882_v42 = vpop.trf.xlu0  ;;  %8978 = vst.msk [vmem:[#allocation2 + $0x180] sm:$0xff] %vm106_vm0, %v8914_v63 }
 0x92b   :  { %9208 = vst [vmem:[%s13870_s3 + $0xf0] sm:$0xff] %v9207_v36  ;;  %8962 = vst.msk [vmem:[#allocation2 + $0x100] sm:$0xff] %vm106_vm0, %v8882_v42 }
 0x92d   :  { %v9177_v26 = vld [vmem:[#allocation2 + $0x78] sm:$0xff]  ;;  %v8915_v25 = vpop.trf.xlu1 }
 0x92e   :  { %v9209_v32 = vld [vmem:[#allocation2 + $0xf8] sm:$0xff]  ;;  %9178 = vst [vmem:[%s13870_s3 + $0x78] sm:$0xff] %v9177_v26  ;;  %v8883_v20 = vpop.trf.xlu0  ;;  %8979 = vst.msk [vmem:[#allocation2 + $0x188] sm:$0xff] %vm106_vm0, %v8915_v25 }
 0x92f   :  { %9210 = vst [vmem:[%s13870_s3 + $0xf8] sm:$0xff] %v9209_v32  ;;  %8963 = vst.msk [vmem:[#allocation2 + $0x108] sm:$0xff] %vm106_vm0, %v8883_v20 }
 0x931   :  { %v9243_v48 = vld [vmem:[#allocation2 + $0x180] sm:$0xff]  ;;  %v8916_v50 = vpop.trf.xlu1 }
 0x932   :  { %v9211_v52 = vld [vmem:[#allocation2 + $0x100] sm:$0xff]  ;;  %9244 = vst [vmem:[%s13870_s3 + $0x180] sm:$0xff] %v9243_v48  ;;  %v8884_v46 = vpop.trf.xlu0  ;;  %8980 = vst.msk [vmem:[#allocation2 + $0x190] sm:$0xff] %vm106_vm0, %v8916_v50 }
 0x933   :  { %9212 = vst [vmem:[%s13870_s3 + $0x100] sm:$0xff] %v9211_v52  ;;  %8964 = vst.msk [vmem:[#allocation2 + $0x110] sm:$0xff] %vm106_vm0, %v8884_v46 }
 0x935   :  { %v9245_v49 = vld [vmem:[#allocation2 + $0x188] sm:$0xff]  ;;  %v8917_v7 = vpop.trf.xlu1 }
 0x936   :  { %v9213_v15 = vld [vmem:[#allocation2 + $0x108] sm:$0xff]  ;;  %9246 = vst [vmem:[%s13870_s3 + $0x188] sm:$0xff] %v9245_v49  ;;  %v8885_v35 = vpop.trf.xlu0  ;;  %8981 = vst.msk [vmem:[#allocation2 + $0x198] sm:$0xff] %vm106_vm0, %v8917_v7 }
 0x937   :  { %9214 = vst [vmem:[%s13870_s3 + $0x108] sm:$0xff] %v9213_v15  ;;  %8965 = vst.msk [vmem:[#allocation2 + $0x118] sm:$0xff] %vm106_vm0, %v8885_v35 }
 0x939   :  { %v9247_v62 = vld [vmem:[#allocation2 + $0x190] sm:$0xff]  ;;  %v8918_v1 = vpop.trf.xlu1 }
 0x93a   :  { %v9215_v18 = vld [vmem:[#allocation2 + $0x110] sm:$0xff]  ;;  %9248 = vst [vmem:[%s13870_s3 + $0x190] sm:$0xff] %v9247_v62  ;;  %v8886_v23 = vpop.trf.xlu0  ;;  %8982 = vst.msk [vmem:[#allocation2 + $0x1a0] sm:$0xff] %vm106_vm0, %v8918_v1 }
 0x93b   :  { %9216 = vst [vmem:[%s13870_s3 + $0x110] sm:$0xff] %v9215_v18  ;;  %8966 = vst.msk [vmem:[#allocation2 + $0x120] sm:$0xff] %vm106_vm0, %v8886_v23 }
 0x93d   :  { %v9249_v54 = vld [vmem:[#allocation2 + $0x198] sm:$0xff]  ;;  %v8919_v39 = vpop.trf.xlu1 }
 0x93e   :  { %v9217_v17 = vld [vmem:[#allocation2 + $0x118] sm:$0xff]  ;;  %9250 = vst [vmem:[%s13870_s3 + $0x198] sm:$0xff] %v9249_v54  ;;  %v8887_v30 = vpop.trf.xlu0  ;;  %8983 = vst.msk [vmem:[#allocation2 + $0x1a8] sm:$0xff] %vm106_vm0, %v8919_v39 }
 0x93f   :  { %9218 = vst [vmem:[%s13870_s3 + $0x118] sm:$0xff] %v9217_v17  ;;  %8967 = vst.msk [vmem:[#allocation2 + $0x128] sm:$0xff] %vm106_vm0, %v8887_v30 }
 0x941   :  { %v9251_v13 = vld [vmem:[#allocation2 + $0x1a0] sm:$0xff]  ;;  %v8920_v59 = vpop.trf.xlu1 }
 0x942   :  { %v9219_v19 = vld [vmem:[#allocation2 + $0x120] sm:$0xff]  ;;  %9252 = vst [vmem:[%s13870_s3 + $0x1a0] sm:$0xff] %v9251_v13  ;;  %v8888_v29 = vpop.trf.xlu0  ;;  %8984 = vst.msk [vmem:[#allocation2 + $0x1b0] sm:$0xff] %vm106_vm0, %v8920_v59 }
 0x943   :  { %9220 = vst [vmem:[%s13870_s3 + $0x120] sm:$0xff] %v9219_v19  ;;  %8968 = vst.msk [vmem:[#allocation2 + $0x130] sm:$0xff] %vm106_vm0, %v8888_v29 }
 0x945   :  { %v9253_v55 = vld [vmem:[#allocation2 + $0x1a8] sm:$0xff]  ;;  %v8921_v31 = vpop.trf.xlu1 }
 0x946   :  { %v9221_v24 = vld [vmem:[#allocation2 + $0x128] sm:$0xff]  ;;  %9254 = vst [vmem:[%s13870_s3 + $0x1a8] sm:$0xff] %v9253_v55  ;;  %v8889_v16 = vpop.trf.xlu0  ;;  %8985 = vst.msk [vmem:[#allocation2 + $0x1b8] sm:$0xff] %vm106_vm0, %v8921_v31 }
 0x947   :  { %9222 = vst [vmem:[%s13870_s3 + $0x128] sm:$0xff] %v9221_v24  ;;  %8969 = vst.msk [vmem:[#allocation2 + $0x138] sm:$0xff] %vm106_vm0, %v8889_v16 }
 0x949   :  { %v9255_v12 = vld [vmem:[#allocation2 + $0x1b0] sm:$0xff]  ;;  %v8922_v28 = vpop.trf.xlu1 }
 0x94a   :  { %v9223_v3 = vld [vmem:[#allocation2 + $0x130] sm:$0xff]  ;;  %9256 = vst [vmem:[%s13870_s3 + $0x1b0] sm:$0xff] %v9255_v12  ;;  %v8890_v34 = vpop.trf.xlu0  ;;  %8986 = vst.msk [vmem:[#allocation2 + $0x1c0] sm:$0xff] %vm106_vm0, %v8922_v28 }
 0x94b   :  { %9224 = vst [vmem:[%s13870_s3 + $0x130] sm:$0xff] %v9223_v3  ;;  %8970 = vst.msk [vmem:[#allocation2 + $0x140] sm:$0xff] %vm106_vm0, %v8890_v34 }
 0x94d   :  { %v9257_v22 = vld [vmem:[#allocation2 + $0x1b8] sm:$0xff]  ;;  %v8923_v6 = vpop.trf.xlu1 }
 0x94e   :  { %v9225_v27 = vld [vmem:[#allocation2 + $0x138] sm:$0xff]  ;;  %9258 = vst [vmem:[%s13870_s3 + $0x1b8] sm:$0xff] %v9257_v22  ;;  %v8891_v38 = vpop.trf.xlu0  ;;  %8987 = vst.msk [vmem:[#allocation2 + $0x1c8] sm:$0xff] %vm106_vm0, %v8923_v6 }
 0x94f   :  { %9226 = vst [vmem:[%s13870_s3 + $0x138] sm:$0xff] %v9225_v27  ;;  %8971 = vst.msk [vmem:[#allocation2 + $0x148] sm:$0xff] %vm106_vm0, %v8891_v38 }
 0x951   :  { %v9259_v37 = vld [vmem:[#allocation2 + $0x1c0] sm:$0xff]  ;;  %v8924_v43 = vpop.trf.xlu1 }
 0x952   :  { %v9227_v21 = vld [vmem:[#allocation2 + $0x140] sm:$0xff]  ;;  %9260 = vst [vmem:[%s13870_s3 + $0x1c0] sm:$0xff] %v9259_v37  ;;  %v8892_v14 = vpop.trf.xlu0  ;;  %8988 = vst.msk [vmem:[#allocation2 + $0x1d0] sm:$0xff] %vm106_vm0, %v8924_v43 }
 0x953   :  { %9228 = vst [vmem:[%s13870_s3 + $0x140] sm:$0xff] %v9227_v21  ;;  %8972 = vst.msk [vmem:[#allocation2 + $0x150] sm:$0xff] %vm106_vm0, %v8892_v14 }
 0x955   :  { %v9261_v57 = vld [vmem:[#allocation2 + $0x1c8] sm:$0xff]  ;;  %v8925_v10 = vpop.trf.xlu1 }
 0x956   :  { %v9229_v33 = vld [vmem:[#allocation2 + $0x148] sm:$0xff]  ;;  %9262 = vst [vmem:[%s13870_s3 + $0x1c8] sm:$0xff] %v9261_v57  ;;  %v8893_v8 = vpop.trf.xlu0  ;;  %8989 = vst.msk [vmem:[#allocation2 + $0x1d8] sm:$0xff] %vm106_vm0, %v8925_v10 }
 0x957   :  { %9230 = vst [vmem:[%s13870_s3 + $0x148] sm:$0xff] %v9229_v33  ;;  %8973 = vst.msk [vmem:[#allocation2 + $0x158] sm:$0xff] %vm106_vm0, %v8893_v8 }
 0x959   :  { %v9263_v41 = vld [vmem:[#allocation2 + $0x1d0] sm:$0xff]  ;;  %v8926_v2 = vpop.trf.xlu1 }
 0x95a   :  { %v9231_v0 = vld [vmem:[#allocation2 + $0x150] sm:$0xff]  ;;  %9264 = vst [vmem:[%s13870_s3 + $0x1d0] sm:$0xff] %v9263_v41  ;;  %v8894_v47 = vpop.trf.xlu0  ;;  %8990 = vst.msk [vmem:[#allocation2 + $0x1e0] sm:$0xff] %vm106_vm0, %v8926_v2 }
 0x95b   :  { %9232 = vst [vmem:[%s13870_s3 + $0x150] sm:$0xff] %v9231_v0  ;;  %8974 = vst.msk [vmem:[#allocation2 + $0x160] sm:$0xff] %vm106_vm0, %v8894_v47 }
 0x95d   :  { %v9265_v61 = vld [vmem:[#allocation2 + $0x1d8] sm:$0xff]  ;;  %v8927_v9 = vpop.trf.xlu1 }
 0x95e   :  { %v9233_v11 = vld [vmem:[#allocation2 + $0x158] sm:$0xff]  ;;  %9266 = vst [vmem:[%s13870_s3 + $0x1d8] sm:$0xff] %v9265_v61  ;;  %v8895_v44 = vpop.trf.xlu0  ;;  %8991 = vst.msk [vmem:[#allocation2 + $0x1e8] sm:$0xff] %vm106_vm0, %v8927_v9 }
 0x95f   :  { %9234 = vst [vmem:[%s13870_s3 + $0x158] sm:$0xff] %v9233_v11  ;;  %8975 = vst.msk [vmem:[#allocation2 + $0x168] sm:$0xff] %vm106_vm0, %v8895_v44 }
 0x961   :  { %v9267_v53 = vld [vmem:[#allocation2 + $0x1e0] sm:$0xff]  ;;  %v8928_v60 = vpop.trf.xlu1 }
 0x962   :  { %v9235_v40 = vld [vmem:[#allocation2 + $0x160] sm:$0xff]  ;;  %9268 = vst [vmem:[%s13870_s3 + $0x1e0] sm:$0xff] %v9267_v53  ;;  %v8896_v56 = vpop.trf.xlu0  ;;  %8992 = vst.msk [vmem:[#allocation2 + $0x1f0] sm:$0xff] %vm106_vm0, %v8928_v60 }
 0x963   :  { %9236 = vst [vmem:[%s13870_s3 + $0x160] sm:$0xff] %v9235_v40  ;;  %8976 = vst.msk [vmem:[#allocation2 + $0x170] sm:$0xff] %vm106_vm0, %v8896_v56 }
 0x965   :  { %v9269_v4 = vld [vmem:[#allocation2 + $0x1e8] sm:$0xff]  ;;  %v8929_v58 = vpop.trf.xlu1 }
 0x966   :  { %v9237_v45 = vld [vmem:[#allocation2 + $0x168] sm:$0xff]  ;;  %9270 = vst [vmem:[%s13870_s3 + $0x1e8] sm:$0xff] %v9269_v4  ;;  %v8897_v5 = vpop.trf.xlu0 }
 0x967   :  { %9238 = vst [vmem:[%s13870_s3 + $0x168] sm:$0xff] %v9237_v45  ;;  %8977 = vst.msk [vmem:[#allocation2 + $0x178] sm:$0xff] %vm106_vm0, %v8897_v5 }
 0x969   :  { %v9271_v51 = vld [vmem:[#allocation2 + $0x1f0] sm:$0xff] }
 0x96a   :  { %v9239_v63 = vld [vmem:[#allocation2 + $0x170] sm:$0xff]  ;;  %9272 = vst [vmem:[%s13870_s3 + $0x1f0] sm:$0xff] %v9271_v51 }
 0x96b   :  { %9240 = vst [vmem:[%s13870_s3 + $0x170] sm:$0xff] %v9239_v63 }
 0x96e   :  { %v9241_v36 = vld [vmem:[#allocation2 + $0x178] sm:$0xff] }
 0x96f   :  { %9242 = vst [vmem:[%s13870_s3 + $0x178] sm:$0xff] %v9241_v36 }

</bundles_post_ra>
